<compile_context>
chip_gen: v7x
topology: tpu7x:2x2x1
jax: 0.10.0
libtpu: 0.0.40
codegen_flags: <defaults>
</compile_context>

<pallas_src>
import math

import jax
import jax.numpy as jnp
from jax.experimental import pallas as pl
from jax.experimental.pallas import tpu as pltpu

_HALF_LOG_2PI = 0.5 * math.log(2.0 * math.pi)
_K_PAD = 8              # mixture components padded to a sublane-friendly width
_NEG_BIG = -1e30        # bias of padded (dummy) components -> exp() == 0


def _round_up(x, m):
    return ((x + m - 1) // m) * m


def _gmm_kernel(x_ref, a_ref, b_ref, c_ref, out_ref):
    """One row tile:  lp = x^2 @ A + x @ B + c ;  out = logsumexp_k(lp)."""
    x = x_ref[...]                                     # (TN, D) f32
    x2 = x * x                                         # one VPU mul per vreg

    # Both multiply-reduce passes over D run on the MXU (f32 accumulation).
    lp = jnp.dot(x2, a_ref[...], preferred_element_type=jnp.float32)
    lp = lp + jnp.dot(x, b_ref[...], preferred_element_type=jnp.float32)
    lp = lp + c_ref[...]                               # (TN, K_PAD)

    # logsumexp over the (tiny, padded) mixture axis.
    m = jnp.max(lp, axis=-1, keepdims=True)            # (TN, 1)
    s = jnp.sum(jnp.exp(lp - m), axis=-1, keepdims=True)
    out_ref[...] = (m + jnp.log(s)).astype(out_ref.dtype)


def _vmem_budget_and_limit():
    """(per-kernel working-set budget, vmem_limit_bytes) for this chip."""
    try:
        cap = int(pltpu.get_tpu_info().vmem_capacity_bytes)
    except Exception:
        cap = 64 * 1024 * 1024          # conservative default (v7x physical)
    limit = min(cap - 8 * 1024 * 1024, 100 * 1024 * 1024)
    budget = limit // 3                 # double-buffered tiles fit with slack
    return budget, limit


def _choose_block_n(n, d, budget_bytes):
    """D-aware row tile: as large as the VMEM budget allows (multiple of 8)."""
    d_lanes = _round_up(d, 128)                       # VMEM lane padding of X
    # 2x double-buffered X tile + 2x double-buffered (rows, 1) output column
    # (the column is lane-padded to 128 in VMEM).
    bytes_per_row = 2 * 4 * d_lanes + 2 * 512
    rows = max(128, (budget_bytes // bytes_per_row) // 8 * 8)
    # Keep >= ~8 grid steps for large inputs (v7x megacore + pipelining).
    if n >= 8 * 1024:
        rows = min(rows, _round_up(-(-n // 8), 8))
    rows = min(rows, _round_up(n, 8))
    return max(8, rows)


def gmm_forward(X, mean, log_std, mix_logits, *, block_n=None):
    """Pallas equivalent of GMM.forward; returns log-probs of shape (N,)."""
    N, D = X.shape
    K, D2 = mean.shape
    assert D == D2 and log_std.shape == (K, D) and mix_logits.shape == (K,)
    assert K <= _K_PAD

    X = X.astype(jnp.float32)
    mean = mean.astype(jnp.float32)
    log_std = log_std.astype(jnp.float32)
    mix_logits = mix_logits.astype(jnp.float32)

    # --- per-component constants hoisted out of the kernel / grid loop ------
    a = 0.5 * jnp.exp(-2.0 * log_std)                  # (K, D) = 1/(2*var)
    coef_a = -a.T                                      # (D, K)
    coef_b = (2.0 * mean * a).T                        # (D, K)
    const = (jax.nn.log_softmax(mix_logits)
             - jnp.sum(mean * mean * a + log_std, axis=-1)
             - D * _HALF_LOG_2PI)                      # (K,)

    coef_a = jnp.pad(coef_a, ((0, 0), (0, _K_PAD - K)))
    coef_b = jnp.pad(coef_b, ((0, 0), (0, _K_PAD - K)))
    const = jnp.pad(const, (0, _K_PAD - K),
                    constant_values=_NEG_BIG).reshape(1, _K_PAD)

    budget, vmem_limit = _vmem_budget_and_limit()
    if block_n is None:
        block_n = _choose_block_n(N, D, budget)
    assert block_n % 8 == 0
    grid = (pl.cdiv(N, block_n),)                      # no jnp.pad of X

    out = pl.pallas_call(
        _gmm_kernel,
        grid=grid,
        in_specs=[
            pl.BlockSpec((block_n, D), lambda i: (i, 0)),     # X row tile
            pl.BlockSpec((D, _K_PAD), lambda i: (0, 0)),      # A (full)
            pl.BlockSpec((D, _K_PAD), lambda i: (0, 0)),      # B (full)
            pl.BlockSpec((1, _K_PAD), lambda i: (0, 0)),      # c (full)
        ],
        out_specs=pl.BlockSpec((block_n, 1), lambda i: (i, 0)),
        out_shape=jax.ShapeDtypeStruct((N, 1), jnp.float32),
        compiler_params=pltpu.CompilerParams(
            dimension_semantics=("parallel",),
            vmem_limit_bytes=int(vmem_limit)),
    )(X, coef_a, coef_b, const)
    return out[:, 0]


class GMM:
    """JAX/Pallas port of the PyTorch GMM module."""

    def __init__(self, dim, key):
        k1, k2, k3 = jax.random.split(key, 3)
        mean = jax.random.normal(k1, (3, dim), dtype=jnp.float32)
        mean = mean.at[0, :].add(1.0)
        mean = mean.at[2, :].add(-1.0)
        self.mean = mean
        self.log_std = jax.random.normal(k2, (3, dim), dtype=jnp.float32)
        self.mix_logits = jax.random.normal(k3, (3,), dtype=jnp.float32)

    def __call__(self, X):
        return gmm_forward(X, self.mean, self.log_std, self.mix_logits)


def gmm_reference(X, mean, log_std, mix_logits):
    """Pure-JAX reference matching the PyTorch forward."""
    energy = ((X[:, None, :] - mean[None, :, :]) ** 2
              / (2.0 * jnp.exp(2.0 * log_std))[None, :, :]
              + math.log(2.0 * math.pi) / 2.0
              + log_std[None, :, :])
    log_prob = -jnp.sum(energy, axis=-1)
    log_prob = log_prob + jax.nn.log_softmax(mix_logits)[None, :]
    return jax.scipy.special.logsumexp(log_prob, axis=-1)


if __name__ == "__main__":
    N, dim = 1000, 32
    key = jax.random.PRNGKey(0)
    k_model, k_x = jax.random.split(key)

    model = GMM(dim, k_model)
    X = jax.random.normal(k_x, (N, dim), dtype=jnp.float32)

    ref = gmm_reference(X, model.mean, model.log_std, model.mix_logits)

    # Default path: auto-chosen (large) row tile.
    out = model(X)
    jax.block_until_ready(out)
    assert out.shape == (N,)
    assert jnp.allclose(out, ref, rtol=1e-4, atol=1e-3), (
        float(jnp.max(jnp.abs(out - ref))))

    # Multi-step grid with a partial last block (1000 = 3*256 + 232).
    out_tiled = gmm_forward(X, model.mean, model.log_std, model.mix_logits,
                            block_n=256)
    jax.block_until_ready(out_tiled)
    assert jnp.allclose(out_tiled, ref, rtol=1e-4, atol=1e-3), (
        float(jnp.max(jnp.abs(out_tiled - ref))))

    print("KERNEL_OK")
</pallas_src>

<mosaic_0001>
module attributes {stable_mosaic.version = 11 : i64} {
  func.func @_gmm_kernel(%arg0: i32, %arg1: memref<1000x32xf32, #tpu.memory_space<vmem>>, %arg2: memref<32x8xf32, #tpu.memory_space<vmem>>, %arg3: memref<32x8xf32, #tpu.memory_space<vmem>>, %arg4: memref<1x8xf32, #tpu.memory_space<vmem>>, %arg5: memref<1000x1xf32, #tpu.memory_space<vmem>>) attributes {dimension_semantics = [#tpu.dimension_semantics<parallel>], iteration_bounds = array<i64: 1>, scalar_prefetch = 0 : i64, scratch_operands = 0 : i64, tpu.core_type = #tpu.core_type<tc>, window_params = [{transform_indices = @transform_0, window_bounds = array<i64: 1000, 32>}, {pipeline_mode = #tpu.pipeline_mode<synchronous>, transform_indices = @transform_1, window_bounds = array<i64: 32, 8>}, {pipeline_mode = #tpu.pipeline_mode<synchronous>, transform_indices = @transform_2, window_bounds = array<i64: 32, 8>}, {pipeline_mode = #tpu.pipeline_mode<synchronous>, transform_indices = @transform_3, window_bounds = array<i64: 1, 8>}, {transform_indices = @transform_4, window_bounds = array<i64: 1000, 1>}]} {
    %c0 = arith.constant 0 : index
    %c0_0 = arith.constant 0 : index
    %0 = vector.load %arg1[%c0, %c0_0] : memref<1000x32xf32, #tpu.memory_space<vmem>>, vector<1000x32xf32>
    %1 = arith.mulf %0, %0 : vector<1000x32xf32>
    %c0_1 = arith.constant 0 : index
    %c0_2 = arith.constant 0 : index
    %2 = vector.load %arg2[%c0_1, %c0_2] : memref<32x8xf32, #tpu.memory_space<vmem>>, vector<32x8xf32>
    %cst = arith.constant dense<0.000000e+00> : vector<1000x8xf32>
    %3 = tpu.matmul %1, %2, %cst {dimension_numbers = #tpu.dot_dimension_numbers<[1], [0], [0], [1], [0, 0, 1, 1], [], []>} : vector<1000x32xf32>, vector<32x8xf32>, vector<1000x8xf32> -> vector<1000x8xf32>
    %c0_3 = arith.constant 0 : index
    %c0_4 = arith.constant 0 : index
    %4 = vector.load %arg3[%c0_3, %c0_4] : memref<32x8xf32, #tpu.memory_space<vmem>>, vector<32x8xf32>
    %cst_5 = arith.constant dense<0.000000e+00> : vector<1000x8xf32>
    %5 = tpu.matmul %0, %4, %cst_5 {dimension_numbers = #tpu.dot_dimension_numbers<[1], [0], [0], [1], [0, 0, 1, 1], [], []>} : vector<1000x32xf32>, vector<32x8xf32>, vector<1000x8xf32> -> vector<1000x8xf32>
    %6 = arith.addf %3, %5 : vector<1000x8xf32>
    %c0_6 = arith.constant 0 : index
    %c0_7 = arith.constant 0 : index
    %7 = vector.load %arg4[%c0_6, %c0_7] : memref<1x8xf32, #tpu.memory_space<vmem>>, vector<1x8xf32>
    %8 = vector.broadcast %7 : vector<1x8xf32> to vector<1000x8xf32>
    %9 = arith.addf %6, %8 : vector<1000x8xf32>
    %cst_8 = arith.constant dense<0xFF800000> : vector<1000xf32>
    %10 = vector.multi_reduction <maximumf>, %9, %cst_8 [1] : vector<1000x8xf32> to vector<1000xf32>
    %11 = vector.shape_cast %10 : vector<1000xf32> to vector<1000x1xf32>
    %12 = vector.broadcast %11 : vector<1000x1xf32> to vector<1000x8xf32>
    %13 = arith.subf %9, %12 : vector<1000x8xf32>
    %14 = math.exp %13 : vector<1000x8xf32>
    %cst_9 = arith.constant dense<0.000000e+00> : vector<1000xf32>
    %15 = vector.multi_reduction <add>, %14, %cst_9 [1] : vector<1000x8xf32> to vector<1000xf32>
    %16 = vector.shape_cast %15 : vector<1000xf32> to vector<1000x1xf32>
    %17 = math.log %16 : vector<1000x1xf32>
    %18 = arith.addf %11, %17 : vector<1000x1xf32>
    %c0_10 = arith.constant 0 : index
    %c0_11 = arith.constant 0 : index
    %19 = vector.load %arg5[%c0_10, %c0_11] : memref<1000x1xf32, #tpu.memory_space<vmem>>, vector<1000x1xf32>
    tpu.vector_store %arg5[%c0_10, %c0_11], %18 {strides = array<i32>} : memref<1000x1xf32, #tpu.memory_space<vmem>>, vector<1000x1xf32>,
    return
  }
  func.func @transform_0(%arg0: i32) -> (i32, i32) {
    %c0_i32 = arith.constant 0 : i32
    %c0_i32_0 = arith.constant 0 : i32
    return %arg0, %c0_i32 : i32, i32
  }
  func.func @transform_1(%arg0: i32) -> (i32, i32) {
    %c0_i32 = arith.constant 0 : i32
    %c0_i32_0 = arith.constant 0 : i32
    %c0_i32_1 = arith.constant 0 : i32
    return %c0_i32, %c0_i32_0 : i32, i32
  }
  func.func @transform_2(%arg0: i32) -> (i32, i32) {
    %c0_i32 = arith.constant 0 : i32
    %c0_i32_0 = arith.constant 0 : i32
    %c0_i32_1 = arith.constant 0 : i32
    return %c0_i32, %c0_i32_0 : i32, i32
  }
  func.func @transform_3(%arg0: i32) -> (i32, i32) {
    %c0_i32 = arith.constant 0 : i32
    %c0_i32_0 = arith.constant 0 : i32
    %c0_i32_1 = arith.constant 0 : i32
    return %c0_i32, %c0_i32_0 : i32, i32
  }
  func.func @transform_4(%arg0: i32) -> (i32, i32) {
    %c0_i32 = arith.constant 0 : i32
    %c0_i32_0 = arith.constant 0 : i32
    return %arg0, %c0_i32 : i32, i32
  }
}

</mosaic_0001>

<bundles_post_ra>
// kernel: tpu_custom_call.1
= control target key start
LH: loop header
LB: loop body
LE: loop exit
PB: predicated region body
PF: predicated region fallthrough
CT: control target
= control target key end

     0   :  { %v5963_v0 = vmov 0.0|0.0   ;;  %vm5964_vm0 = vmmov 0   ;;  %v9059_v8 = vmov 0.0   ;;  %vm275_vm1 = vcmask 261120   ;;  %s9040_s2 = inlined_call_operand.vmem [shape: f32[32,8], index: 2, kind: input, shape index: {}]   ;;  %s9041_s1 = inlined_call_operand.vmem [shape: f32[32,8], index: 1, kind: input, shape index: {}]   ;;  %s9042_s0 = inlined_call_operand.vmem [shape: f32[1000,32], index: 0, kind: input, shape index: {}]   ;;  %s9043_s3 = inlined_call_operand.vmem [shape: f32[1,8], index: 3, kind: input, shape index: {}]   ;;  %s9044_s4 = inlined_call_operand.vmem [shape: f32[1000,1], index: 4, kind: output, shape index: {}]  }
   0x1   :  { %5444 = vmatprep.subr.bf16.mxu0 %v5963_v0  ;;  %5450 = vmatprep.subr.bf16.mxu1 %v5963_v0  ;;  %v271_v1 = vld [vmem:[%s9040_s2] sm:$0xff]  ;;  %v272_v2 = vld [vmem:[%s9040_s2 + $0x8] sm:$0xff]  ;;  %v273_v6 = vld [vmem:[%s9040_s2 + $0x10] sm:$0xff]  ;;  %vm2538_vm2 = vcmask 64512   ;;  %vm4039_vm3 = vcmask 7168  }
   0x2   :  { %v267_v3 = vld [vmem:[%s9041_s1] sm:$0xff]  ;;  %v5445_v4 = vpack.c.bf16 %v272_v2, %v271_v1  ;;  %v268_v5 = vld [vmem:[%s9041_s1 + $0x8] sm:$0xff]  ;;  %v274_v7 = vld [vmem:[%s9040_s2 + $0x18] sm:$0xff]  ;;  %4686 = vmatprep.mubr.msk.f32.mxu0 %vm5964_vm0, %v9059_v8  ;;  %5069 = vmatprep.mubr.msk.f32.mxu1 %vm5964_vm0, %v9059_v8 }
   0x3   :  { %v5451_v9 = vpack.c.bf16 %v268_v5, %v267_v3  ;;  %v269_v10 = vld [vmem:[%s9041_s1 + $0x10] sm:$0xff]  ;;  %v270_v11 = vld [vmem:[%s9041_s1 + $0x18] sm:$0xff]  ;;  %v5448_v12 = vpack.c.bf16 %v274_v7, %v273_v6  ;;  %v17_v14 = vld [vmem:[%s9042_s0] sm:$0xff] }
   0x4   :  { %5446 = vmatpush3.bf16.msra.mxu0 %v5445_v4  ;;  %v5454_v13 = vpack.c.bf16 %v270_v11, %v269_v10  ;;  %v142_v15 = vmul.f32 %v17_v14, %v17_v14  ;;  %v18_v16 = vld [vmem:[%s9042_s0 + $0x8] sm:$0xff]  ;;  %v19_v18 = vld [vmem:[%s9042_s0 + $0x10] sm:$0xff]  ;;  %v20_v20 = vld [vmem:[%s9042_s0 + $0x18] sm:$0xff] }
   0x5   :  { %5452 = vmatpush3.bf16.msra.mxu1 %v5451_v9  ;;  %5447 = vmatprep.subr.bf16.mxu0 %v5963_v0  ;;  %v143_v17 = vmul.f32 %v18_v16, %v18_v16  ;;  %v144_v19 = vmul.f32 %v19_v18, %v19_v18  ;;  %v145_v21 = vmul.f32 %v20_v20, %v20_v20  ;;  %v21_v22 = vld [vmem:[%s9042_s0 + $0x20] sm:$0xff]  ;;  %v22_v24 = vld [vmem:[%s9042_s0 + $0x28] sm:$0xff]  ;;  %v23_v26 = vld [vmem:[%s9042_s0 + $0x30] sm:$0xff] }
   0x6   :  { %5453 = vmatprep.subr.bf16.mxu1 %v5963_v0  ;;  %v146_v23 = vmul.f32 %v21_v22, %v21_v22  ;;  %v147_v25 = vmul.f32 %v22_v24, %v22_v24  ;;  %v148_v27 = vmul.f32 %v23_v26, %v23_v26  ;;  %v24_v28 = vld [vmem:[%s9042_s0 + $0x38] sm:$0xff]  ;;  %v25_v30 = vld [vmem:[%s9042_s0 + $0x40] sm:$0xff]  ;;  %v26_v32 = vld [vmem:[%s9042_s0 + $0x48] sm:$0xff] }
   0x7   :  { %v149_v29 = vmul.f32 %v24_v28, %v24_v28  ;;  %v150_v31 = vmul.f32 %v25_v30, %v25_v30  ;;  %v151_v33 = vmul.f32 %v26_v32, %v26_v32  ;;  %v27_v34 = vld [vmem:[%s9042_s0 + $0x50] sm:$0xff]  ;;  %v28_v36 = vld [vmem:[%s9042_s0 + $0x58] sm:$0xff]  ;;  %v29_v38 = vld [vmem:[%s9042_s0 + $0x60] sm:$0xff] }
   0x8   :  { %5449 = vmatpush3.bf16.msra.mxu0 %v5448_v12  ;;  %v152_v35 = vmul.f32 %v27_v34, %v27_v34  ;;  %v153_v37 = vmul.f32 %v28_v36, %v28_v36  ;;  %v154_v39 = vmul.f32 %v29_v38, %v29_v38  ;;  %v30_v40 = vld [vmem:[%s9042_s0 + $0x68] sm:$0xff]  ;;  %v31_v42 = vld [vmem:[%s9042_s0 + $0x70] sm:$0xff]  ;;  %v32_v44 = vld [vmem:[%s9042_s0 + $0x78] sm:$0xff] }
   0x9   :  { %5455 = vmatpush3.bf16.msra.mxu1 %v5454_v13  ;;  %v155_v41 = vmul.f32 %v30_v40, %v30_v40  ;;  %v156_v43 = vmul.f32 %v31_v42, %v31_v42  ;;  %v157_v45 = vmul.f32 %v32_v44, %v32_v44  ;;  %v33_v46 = vld [vmem:[%s9042_s0 + $0x80] sm:$0xff]  ;;  %v34_v48 = vld [vmem:[%s9042_s0 + $0x88] sm:$0xff]  ;;  %v35_v50 = vld [vmem:[%s9042_s0 + $0x90] sm:$0xff] }
   0xa   :  { %v158_v47 = vmul.f32 %v33_v46, %v33_v46  ;;  %v159_v49 = vmul.f32 %v34_v48, %v34_v48  ;;  %v160_v51 = vmul.f32 %v35_v50, %v35_v50  ;;  %v36_v52 = vld [vmem:[%s9042_s0 + $0x98] sm:$0xff]  ;;  %v37_v54 = vld [vmem:[%s9042_s0 + $0xa0] sm:$0xff]  ;;  %v38_v56 = vld [vmem:[%s9042_s0 + $0xa8] sm:$0xff] }
   0xb   :  { %4687 = vmatmul.mubr.msk.f32.vlgmr.msra.gmra.mrb[0].mxu0 %vm275_vm1, %v17_v14  ;;  %v161_v53 = vmul.f32 %v36_v52, %v36_v52  ;;  %v162_v55 = vmul.f32 %v37_v54, %v37_v54  ;;  %v163_v57 = vmul.f32 %v38_v56, %v38_v56  ;;  %v39_v58 = vld [vmem:[%s9042_s0 + $0xb0] sm:$0xff]  ;;  %v40_v60 = vld [vmem:[%s9042_s0 + $0xb8] sm:$0xff]  ;;  %v41_v62 = vld [vmem:[%s9042_s0 + $0xc0] sm:$0xff] }
   0xc   :  { %5070 = vmatmul.mubr.msk.f32.vlgmr.msra.gmra.mrb[0].mxu1 %vm275_vm1, %v142_v15  ;;  %4689 = vmatprep.mubr.msk.f32.mxu0 %vm5964_vm0, %v9059_v8  ;;  %v164_v59 = vmul.f32 %v39_v58, %v39_v58  ;;  %v165_v61 = vmul.f32 %v40_v60, %v40_v60  ;;  %v166_v63 = vmul.f32 %v41_v62, %v41_v62  ;;  %v42_v0 = vld [vmem:[%s9042_s0 + $0xc8] sm:$0xff]  ;;  %v43_v2 = vld [vmem:[%s9042_s0 + $0xd0] sm:$0xff]  ;;  %v44_v4 = vld [vmem:[%s9042_s0 + $0xd8] sm:$0xff] }
   0xd   :  { %5072 = vmatprep.mubr.msk.f32.mxu1 %vm5964_vm0, %v9059_v8  ;;  %v167_v1 = vmul.f32 %v42_v0, %v42_v0  ;;  %v168_v3 = vmul.f32 %v43_v2, %v43_v2  ;;  %v169_v5 = vmul.f32 %v44_v4, %v44_v4  ;;  %v45_v6 = vld [vmem:[%s9042_s0 + $0xe0] sm:$0xff]  ;;  %v46_v9 = vld [vmem:[%s9042_s0 + $0xe8] sm:$0xff]  ;;  %v47_v11 = vld [vmem:[%s9042_s0 + $0xf0] sm:$0xff] }
   0xe   :  { %v170_v7 = vmul.f32 %v45_v6, %v45_v6  ;;  %v171_v10 = vmul.f32 %v46_v9, %v46_v9  ;;  %v172_v12 = vmul.f32 %v47_v11, %v47_v11  ;;  %v48_v13 = vld [vmem:[%s9042_s0 + $0xf8] sm:$0xff]  ;;  %v49_v15 = vld [vmem:[%s9042_s0 + $0x100] sm:$0xff] }
   0xf   :  { %4690 = vmatmul.mubr.msk.f32.gmra.mrb[2].mxu0 %vm275_vm1, %v18_v16  ;;  %v173_v14 = vmul.f32 %v48_v13, %v48_v13  ;;  %v174_v16 = vmul.f32 %v49_v15, %v49_v15 }
  0x10   :  { %5073 = vmatmul.mubr.msk.f32.gmra.mrb[2].mxu1 %vm275_vm1, %v143_v17  ;;  %4692 = vmatprep.mubr.msk.f32.mxu0 %vm5964_vm0, %v9059_v8  ;;  %v50_v17 = vld [vmem:[%s9042_s0 + $0x108] sm:$0xff] }
  0x11   :  { %5075 = vmatprep.mubr.msk.f32.mxu1 %vm5964_vm0, %v9059_v8 }
  0x13   :  { %4693 = vmatmul.mubr.msk.f32.gmra.mrb[4].mxu0 %vm275_vm1, %v19_v18  ;;  %v175_v18 = vmul.f32 %v50_v17, %v50_v17 }
  0x14   :  { %5076 = vmatmul.mubr.msk.f32.gmra.mrb[4].mxu1 %vm275_vm1, %v144_v19  ;;  %4695 = vmatprep.mubr.msk.f32.mxu0 %vm5964_vm0, %v9059_v8  ;;  %v51_v19 = vld [vmem:[%s9042_s0 + $0x110] sm:$0xff] }
  0x15   :  { %5078 = vmatprep.mubr.msk.f32.mxu1 %vm5964_vm0, %v9059_v8 }
  0x17   :  { %4696 = vmatmul.mubr.msk.f32.gmra.mrb[6].mxu0 %vm275_vm1, %v20_v20  ;;  %v176_v20 = vmul.f32 %v51_v19, %v51_v19 }
  0x18   :  { %5079 = vmatmul.mubr.msk.f32.gmra.mrb[6].mxu1 %vm275_vm1, %v145_v21  ;;  %4698 = vmatprep.mubr.msk.f32.mxu0 %vm5964_vm0, %v9059_v8  ;;  %v52_v21 = vld [vmem:[%s9042_s0 + $0x118] sm:$0xff] }
  0x19   :  { %5081 = vmatprep.mubr.msk.f32.mxu1 %vm5964_vm0, %v9059_v8 }
  0x1b   :  { %4699 = vmatmul.mubr.msk.f32.gmra.mrb[8].mxu0 %vm275_vm1, %v21_v22  ;;  %v177_v22 = vmul.f32 %v52_v21, %v52_v21 }
  0x1c   :  { %5082 = vmatmul.mubr.msk.f32.gmra.mrb[8].mxu1 %vm275_vm1, %v146_v23  ;;  %4701 = vmatprep.mubr.msk.f32.mxu0 %vm5964_vm0, %v9059_v8  ;;  %v53_v23 = vld [vmem:[%s9042_s0 + $0x120] sm:$0xff] }
  0x1d   :  { %5084 = vmatprep.mubr.msk.f32.mxu1 %vm5964_vm0, %v9059_v8 }
  0x1f   :  { %4702 = vmatmul.mubr.msk.f32.gmra.mrb[10].mxu0 %vm275_vm1, %v22_v24  ;;  %v178_v24 = vmul.f32 %v53_v23, %v53_v23 }
  0x20   :  { %5085 = vmatmul.mubr.msk.f32.gmra.mrb[10].mxu1 %vm275_vm1, %v147_v25  ;;  %4704 = vmatprep.mubr.msk.f32.mxu0 %vm5964_vm0, %v9059_v8  ;;  %v54_v25 = vld [vmem:[%s9042_s0 + $0x128] sm:$0xff] }
  0x21   :  { %5087 = vmatprep.mubr.msk.f32.mxu1 %vm5964_vm0, %v9059_v8 }
  0x23   :  { %4705 = vmatmul.mubr.msk.f32.gmra.mrb[12].mxu0 %vm275_vm1, %v23_v26  ;;  %v179_v26 = vmul.f32 %v54_v25, %v54_v25 }
  0x24   :  { %5088 = vmatmul.mubr.msk.f32.gmra.mrb[12].mxu1 %vm275_vm1, %v148_v27  ;;  %4707 = vmatprep.mubr.msk.f32.mxu0 %vm5964_vm0, %v9059_v8  ;;  %v55_v27 = vld [vmem:[%s9042_s0 + $0x130] sm:$0xff] }
  0x25   :  { %5090 = vmatprep.mubr.msk.f32.mxu1 %vm5964_vm0, %v9059_v8 }
  0x27   :  { %4708 = vmatmul.mubr.msk.f32.gmra.mrb[14].mxu0 %vm275_vm1, %v24_v28  ;;  %v180_v28 = vmul.f32 %v55_v27, %v55_v27 }
  0x28   :  { %5091 = vmatmul.mubr.msk.f32.gmra.mrb[14].mxu1 %vm275_vm1, %v149_v29  ;;  %4710 = vmatprep.mubr.msk.f32.mxu0 %vm5964_vm0, %v9059_v8  ;;  %v56_v29 = vld [vmem:[%s9042_s0 + $0x138] sm:$0xff] }
  0x29   :  { %5093 = vmatprep.mubr.msk.f32.mxu1 %vm5964_vm0, %v9059_v8 }
  0x2b   :  { %4711 = vmatmul.mubr.msk.f32.gmra.mrb[16].mxu0 %vm275_vm1, %v25_v30  ;;  %v181_v30 = vmul.f32 %v56_v29, %v56_v29 }
  0x2c   :  { %5094 = vmatmul.mubr.msk.f32.gmra.mrb[16].mxu1 %vm275_vm1, %v150_v31  ;;  %4713 = vmatprep.mubr.msk.f32.mxu0 %vm5964_vm0, %v9059_v8  ;;  %v57_v31 = vld [vmem:[%s9042_s0 + $0x140] sm:$0xff] }
  0x2d   :  { %5096 = vmatprep.mubr.msk.f32.mxu1 %vm5964_vm0, %v9059_v8 }
  0x2f   :  { %4714 = vmatmul.mubr.msk.f32.gmra.mrb[18].mxu0 %vm275_vm1, %v26_v32  ;;  %v182_v32 = vmul.f32 %v57_v31, %v57_v31 }
  0x30   :  { %5097 = vmatmul.mubr.msk.f32.gmra.mrb[18].mxu1 %vm275_vm1, %v151_v33  ;;  %4716 = vmatprep.mubr.msk.f32.mxu0 %vm5964_vm0, %v9059_v8  ;;  %v58_v33 = vld [vmem:[%s9042_s0 + $0x148] sm:$0xff] }
  0x31   :  { %5099 = vmatprep.mubr.msk.f32.mxu1 %vm5964_vm0, %v9059_v8 }
  0x33   :  { %4717 = vmatmul.mubr.msk.f32.gmra.mrb[20].mxu0 %vm275_vm1, %v27_v34  ;;  %v183_v34 = vmul.f32 %v58_v33, %v58_v33 }
  0x34   :  { %5100 = vmatmul.mubr.msk.f32.gmra.mrb[20].mxu1 %vm275_vm1, %v152_v35  ;;  %4719 = vmatprep.mubr.msk.f32.mxu0 %vm5964_vm0, %v9059_v8  ;;  %v59_v35 = vld [vmem:[%s9042_s0 + $0x150] sm:$0xff] }
  0x35   :  { %5102 = vmatprep.mubr.msk.f32.mxu1 %vm5964_vm0, %v9059_v8 }
  0x37   :  { %4720 = vmatmul.mubr.msk.f32.gmra.mrb[22].mxu0 %vm275_vm1, %v28_v36  ;;  %v184_v36 = vmul.f32 %v59_v35, %v59_v35 }
  0x38   :  { %5103 = vmatmul.mubr.msk.f32.gmra.mrb[22].mxu1 %vm275_vm1, %v153_v37  ;;  %4722 = vmatprep.mubr.msk.f32.mxu0 %vm5964_vm0, %v9059_v8  ;;  %v60_v37 = vld [vmem:[%s9042_s0 + $0x158] sm:$0xff] }
  0x39   :  { %5105 = vmatprep.mubr.msk.f32.mxu1 %vm5964_vm0, %v9059_v8 }
  0x3b   :  { %4723 = vmatmul.mubr.msk.f32.gmra.mrb[24].mxu0 %vm275_vm1, %v29_v38  ;;  %v185_v38 = vmul.f32 %v60_v37, %v60_v37 }
  0x3c   :  { %5106 = vmatmul.mubr.msk.f32.gmra.mrb[24].mxu1 %vm275_vm1, %v154_v39  ;;  %4725 = vmatprep.mubr.msk.f32.mxu0 %vm5964_vm0, %v9059_v8  ;;  %v61_v39 = vld [vmem:[%s9042_s0 + $0x160] sm:$0xff] }
  0x3d   :  { %5108 = vmatprep.mubr.msk.f32.mxu1 %vm5964_vm0, %v9059_v8 }
  0x3f   :  { %4726 = vmatmul.mubr.msk.f32.gmra.mrb[26].mxu0 %vm275_vm1, %v30_v40  ;;  %v186_v40 = vmul.f32 %v61_v39, %v61_v39 }
  0x40   :  { %5109 = vmatmul.mubr.msk.f32.gmra.mrb[26].mxu1 %vm275_vm1, %v155_v41  ;;  %4728 = vmatprep.mubr.msk.f32.mxu0 %vm5964_vm0, %v9059_v8  ;;  %v62_v41 = vld [vmem:[%s9042_s0 + $0x168] sm:$0xff] }
  0x41   :  { %5111 = vmatprep.mubr.msk.f32.mxu1 %vm5964_vm0, %v9059_v8 }
  0x43   :  { %4729 = vmatmul.mubr.msk.f32.gmra.mrb[28].mxu0 %vm275_vm1, %v31_v42  ;;  %v187_v42 = vmul.f32 %v62_v41, %v62_v41 }
  0x44   :  { %5112 = vmatmul.mubr.msk.f32.gmra.mrb[28].mxu1 %vm275_vm1, %v156_v43  ;;  %4731 = vmatprep.mubr.msk.f32.mxu0 %vm5964_vm0, %v9059_v8  ;;  %v63_v43 = vld [vmem:[%s9042_s0 + $0x170] sm:$0xff] }
  0x45   :  { %5114 = vmatprep.mubr.msk.f32.mxu1 %vm5964_vm0, %v9059_v8 }
  0x47   :  { %4732 = vmatmul.mubr.msk.f32.gmra.mrb[30].mxu0 %vm275_vm1, %v32_v44  ;;  %v188_v44 = vmul.f32 %v63_v43, %v63_v43 }
  0x48   :  { %5115 = vmatmul.mubr.msk.f32.gmra.mrb[30].mxu1 %vm275_vm1, %v157_v45  ;;  %4734 = vmatprep.mubr.msk.f32.mxu0 %vm5964_vm0, %v9059_v8  ;;  %v64_v45 = vld [vmem:[%s9042_s0 + $0x178] sm:$0xff] }
  0x49   :  { %5117 = vmatprep.mubr.msk.f32.mxu1 %vm5964_vm0, %v9059_v8 }
  0x4b   :  { %4735 = vmatmul.mubr.msk.f32.gmra.mrb[32].mxu0 %vm275_vm1, %v33_v46  ;;  %v189_v46 = vmul.f32 %v64_v45, %v64_v45 }
  0x4c   :  { %5118 = vmatmul.mubr.msk.f32.gmra.mrb[32].mxu1 %vm275_vm1, %v158_v47  ;;  %4737 = vmatprep.mubr.msk.f32.mxu0 %vm5964_vm0, %v9059_v8  ;;  %v65_v47 = vld [vmem:[%s9042_s0 + $0x180] sm:$0xff] }
  0x4d   :  { %5120 = vmatprep.mubr.msk.f32.mxu1 %vm5964_vm0, %v9059_v8 }
  0x4f   :  { %4738 = vmatmul.mubr.msk.f32.gmra.mrb[34].mxu0 %vm275_vm1, %v34_v48  ;;  %v190_v48 = vmul.f32 %v65_v47, %v65_v47 }
  0x50   :  { %5121 = vmatmul.mubr.msk.f32.gmra.mrb[34].mxu1 %vm275_vm1, %v159_v49  ;;  %4740 = vmatprep.mubr.msk.f32.mxu0 %vm5964_vm0, %v9059_v8  ;;  %v66_v49 = vld [vmem:[%s9042_s0 + $0x188] sm:$0xff] }
  0x51   :  { %5123 = vmatprep.mubr.msk.f32.mxu1 %vm5964_vm0, %v9059_v8 }
  0x53   :  { %4741 = vmatmul.mubr.msk.f32.gmra.mrb[36].mxu0 %vm275_vm1, %v35_v50  ;;  %v191_v50 = vmul.f32 %v66_v49, %v66_v49 }
  0x54   :  { %5124 = vmatmul.mubr.msk.f32.gmra.mrb[36].mxu1 %vm275_vm1, %v160_v51  ;;  %4743 = vmatprep.mubr.msk.f32.mxu0 %vm5964_vm0, %v9059_v8  ;;  %v67_v51 = vld [vmem:[%s9042_s0 + $0x190] sm:$0xff] }
  0x55   :  { %5126 = vmatprep.mubr.msk.f32.mxu1 %vm5964_vm0, %v9059_v8 }
  0x57   :  { %4744 = vmatmul.mubr.msk.f32.gmra.mrb[38].mxu0 %vm275_vm1, %v36_v52  ;;  %v192_v52 = vmul.f32 %v67_v51, %v67_v51 }
  0x58   :  { %5127 = vmatmul.mubr.msk.f32.gmra.mrb[38].mxu1 %vm275_vm1, %v161_v53  ;;  %4746 = vmatprep.mubr.msk.f32.mxu0 %vm5964_vm0, %v9059_v8  ;;  %v68_v53 = vld [vmem:[%s9042_s0 + $0x198] sm:$0xff] }
  0x59   :  { %5129 = vmatprep.mubr.msk.f32.mxu1 %vm5964_vm0, %v9059_v8 }
  0x5b   :  { %4747 = vmatmul.mubr.msk.f32.gmra.mrb[40].mxu0 %vm275_vm1, %v37_v54  ;;  %v193_v54 = vmul.f32 %v68_v53, %v68_v53 }
  0x5c   :  { %5130 = vmatmul.mubr.msk.f32.gmra.mrb[40].mxu1 %vm275_vm1, %v162_v55  ;;  %4749 = vmatprep.mubr.msk.f32.mxu0 %vm5964_vm0, %v9059_v8  ;;  %v69_v55 = vld [vmem:[%s9042_s0 + $0x1a0] sm:$0xff] }
  0x5d   :  { %5132 = vmatprep.mubr.msk.f32.mxu1 %vm5964_vm0, %v9059_v8 }
  0x5f   :  { %4750 = vmatmul.mubr.msk.f32.gmra.mrb[42].mxu0 %vm275_vm1, %v38_v56  ;;  %v194_v56 = vmul.f32 %v69_v55, %v69_v55 }
  0x60   :  { %5133 = vmatmul.mubr.msk.f32.gmra.mrb[42].mxu1 %vm275_vm1, %v163_v57  ;;  %4752 = vmatprep.mubr.msk.f32.mxu0 %vm5964_vm0, %v9059_v8  ;;  %v70_v57 = vld [vmem:[%s9042_s0 + $0x1a8] sm:$0xff] }
  0x61   :  { %5135 = vmatprep.mubr.msk.f32.mxu1 %vm5964_vm0, %v9059_v8 }
  0x63   :  { %4753 = vmatmul.mubr.msk.f32.gmra.mrb[44].mxu0 %vm275_vm1, %v39_v58  ;;  %v195_v58 = vmul.f32 %v70_v57, %v70_v57 }
  0x64   :  { %5136 = vmatmul.mubr.msk.f32.gmra.mrb[44].mxu1 %vm275_vm1, %v164_v59  ;;  %4755 = vmatprep.mubr.msk.f32.mxu0 %vm5964_vm0, %v9059_v8  ;;  %v71_v59 = vld [vmem:[%s9042_s0 + $0x1b0] sm:$0xff] }
  0x65   :  { %5138 = vmatprep.mubr.msk.f32.mxu1 %vm5964_vm0, %v9059_v8 }
  0x67   :  { %4756 = vmatmul.mubr.msk.f32.gmra.mrb[46].mxu0 %vm275_vm1, %v40_v60 }
  0x68   :  { %5139 = vmatmul.mubr.msk.f32.gmra.mrb[46].mxu1 %vm275_vm1, %v165_v61  ;;  %4758 = vmatprep.mubr.msk.f32.mxu0 %vm5964_vm0, %v9059_v8 }
  0x69   :  { %5141 = vmatprep.mubr.msk.f32.mxu1 %vm5964_vm0, %v9059_v8 }
  0x6b   :  { %4759 = vmatmul.mubr.msk.f32.gmra.mrb[48].mxu0 %vm275_vm1, %v41_v62 }
  0x6c   :  { %5142 = vmatmul.mubr.msk.f32.gmra.mrb[48].mxu1 %vm275_vm1, %v166_v63  ;;  %4761 = vmatprep.mubr.msk.f32.mxu0 %vm5964_vm0, %v9059_v8  ;;  %v6506_v63 = vld [vmem:[%s9043_s3] ss:$0 sm:$0xff] }
  0x6d   :  { %5144 = vmatprep.mubr.msk.f32.mxu1 %vm5964_vm0, %v9059_v8 }
  0x6f   :  { %4762 = vmatmul.mubr.msk.f32.gmra.mrb[50].mxu0 %vm275_vm1, %v42_v0 }
  0x70   :  { %5145 = vmatmul.mubr.msk.f32.gmra.mrb[50].mxu1 %vm275_vm1, %v167_v1  ;;  %4764 = vmatprep.mubr.msk.f32.mxu0 %vm5964_vm0, %v9059_v8 }
  0x71   :  { %5147 = vmatprep.mubr.msk.f32.mxu1 %vm5964_vm0, %v9059_v8 }
  0x73   :  { %4765 = vmatmul.mubr.msk.f32.gmra.mrb[52].mxu0 %vm275_vm1, %v43_v2  ;;  %v196_v2 = vmul.f32 %v71_v59, %v71_v59 }
  0x74   :  { %5148 = vmatmul.mubr.msk.f32.gmra.mrb[52].mxu1 %vm275_vm1, %v168_v3  ;;  %4767 = vmatprep.mubr.msk.f32.mxu0 %vm5964_vm0, %v9059_v8  ;;  %v72_v3 = vld [vmem:[%s9042_s0 + $0x1b8] sm:$0xff] }
  0x75   :  { %5150 = vmatprep.mubr.msk.f32.mxu1 %vm5964_vm0, %v9059_v8 }
  0x77   :  { %4768 = vmatmul.mubr.msk.f32.gmra.mrb[54].mxu0 %vm275_vm1, %v44_v4 }
  0x78   :  { %5151 = vmatmul.mubr.msk.f32.gmra.mrb[54].mxu1 %vm275_vm1, %v169_v5  ;;  %4770 = vmatprep.mubr.msk.f32.mxu0 %vm5964_vm0, %v9059_v8 }
  0x79   :  { %5153 = vmatprep.mubr.msk.f32.mxu1 %vm5964_vm0, %v9059_v8 }
  0x7b   :  { %4771 = vmatmul.mubr.msk.f32.gmra.mrb[56].mxu0 %vm275_vm1, %v45_v6 }
  0x7c   :  { %5154 = vmatmul.mubr.msk.f32.gmra.mrb[56].mxu1 %vm275_vm1, %v170_v7  ;;  %4773 = vmatprep.mubr.msk.f32.mxu0 %vm5964_vm0, %v9059_v8 }
  0x7d   :  { %5156 = vmatprep.mubr.msk.f32.mxu1 %vm5964_vm0, %v9059_v8 }
  0x7f   :  { %4774 = vmatmul.mubr.msk.f32.gmra.mrb[58].mxu0 %vm275_vm1, %v46_v9 }
  0x80   :  { %5157 = vmatmul.mubr.msk.f32.gmra.mrb[58].mxu1 %vm275_vm1, %v171_v10  ;;  %4776 = vmatprep.mubr.msk.f32.mxu0 %vm5964_vm0, %v9059_v8 }
  0x81   :  { %5159 = vmatprep.mubr.msk.f32.mxu1 %vm5964_vm0, %v9059_v8 }
  0x83   :  { %4777 = vmatmul.mubr.msk.f32.gmra.mrb[60].mxu0 %vm275_vm1, %v47_v11 }
  0x84   :  { %5160 = vmatmul.mubr.msk.f32.gmra.mrb[60].mxu1 %vm275_vm1, %v172_v12  ;;  %4779 = vmatprep.mubr.msk.f32.mxu0 %vm5964_vm0, %v9059_v8  ;;  %v197_v12 = vmul.f32 %v72_v3, %v72_v3 }
  0x85   :  { %5162 = vmatprep.mubr.msk.f32.mxu1 %vm5964_vm0, %v9059_v8 }
  0x87   :  { %4780 = vmatmul.mubr.msk.f32.gmra.mrb[62].mxu0 %vm275_vm1, %v48_v13  ;;  %v73_v13 = vld [vmem:[%s9042_s0 + $0x1c0] sm:$0xff] }
  0x88   :  { %5163 = vmatmul.mubr.msk.f32.gmra.mrb[62].mxu1 %vm275_vm1, %v173_v14  ;;  %4782 = vmatprep.mubr.msk.f32.mxu0 %vm5964_vm0, %v9059_v8 }
  0x89   :  { %5165 = vmatprep.mubr.msk.f32.mxu1 %vm5964_vm0, %v9059_v8 }
  0x8b   :  { %4783 = vmatmul.mubr.msk.f32.gmra.mrb[64].mxu0 %vm275_vm1, %v49_v15 }
  0x8c   :  { %5166 = vmatmul.mubr.msk.f32.gmra.mrb[64].mxu1 %vm275_vm1, %v174_v16  ;;  %4785 = vmatprep.mubr.msk.f32.mxu0 %vm5964_vm0, %v9059_v8 }
  0x8d   :  { %5168 = vmatprep.mubr.msk.f32.mxu1 %vm5964_vm0, %v9059_v8 }
  0x8f   :  { %4786 = vmatmul.mubr.msk.f32.gmra.mrb[66].mxu0 %vm275_vm1, %v50_v17 }
  0x90   :  { %5169 = vmatmul.mubr.msk.f32.gmra.mrb[66].mxu1 %vm275_vm1, %v175_v18  ;;  %4788 = vmatprep.mubr.msk.f32.mxu0 %vm5964_vm0, %v9059_v8 }
  0x91   :  { %5171 = vmatprep.mubr.msk.f32.mxu1 %vm5964_vm0, %v9059_v8 }
  0x93   :  { %4789 = vmatmul.mubr.msk.f32.gmra.mrb[68].mxu0 %vm275_vm1, %v51_v19 }
  0x94   :  { %5172 = vmatmul.mubr.msk.f32.gmra.mrb[68].mxu1 %vm275_vm1, %v176_v20  ;;  %4791 = vmatprep.mubr.msk.f32.mxu0 %vm5964_vm0, %v9059_v8 }
  0x95   :  { %5174 = vmatprep.mubr.msk.f32.mxu1 %vm5964_vm0, %v9059_v8 }
  0x97   :  { %4792 = vmatmul.mubr.msk.f32.gmra.mrb[70].mxu0 %vm275_vm1, %v52_v21  ;;  %v198_v21 = vmul.f32 %v73_v13, %v73_v13 }
  0x98   :  { %5175 = vmatmul.mubr.msk.f32.gmra.mrb[70].mxu1 %vm275_vm1, %v177_v22  ;;  %4794 = vmatprep.mubr.msk.f32.mxu0 %vm5964_vm0, %v9059_v8  ;;  %v74_v22 = vld [vmem:[%s9042_s0 + $0x1c8] sm:$0xff] }
  0x99   :  { %5177 = vmatprep.mubr.msk.f32.mxu1 %vm5964_vm0, %v9059_v8 }
  0x9b   :  { %4795 = vmatmul.mubr.msk.f32.gmra.mrb[72].mxu0 %vm275_vm1, %v53_v23 }
  0x9c   :  { %5178 = vmatmul.mubr.msk.f32.gmra.mrb[72].mxu1 %vm275_vm1, %v178_v24  ;;  %4797 = vmatprep.mubr.msk.f32.mxu0 %vm5964_vm0, %v9059_v8 }
  0x9d   :  { %5180 = vmatprep.mubr.msk.f32.mxu1 %vm5964_vm0, %v9059_v8 }
  0x9f   :  { %4798 = vmatmul.mubr.msk.f32.gmra.mrb[74].mxu0 %vm275_vm1, %v54_v25 }
  0xa0   :  { %5181 = vmatmul.mubr.msk.f32.gmra.mrb[74].mxu1 %vm275_vm1, %v179_v26  ;;  %4800 = vmatprep.mubr.msk.f32.mxu0 %vm5964_vm0, %v9059_v8 }
  0xa1   :  { %5183 = vmatprep.mubr.msk.f32.mxu1 %vm5964_vm0, %v9059_v8 }
  0xa3   :  { %4801 = vmatmul.mubr.msk.f32.gmra.mrb[76].mxu0 %vm275_vm1, %v55_v27 }
  0xa4   :  { %5184 = vmatmul.mubr.msk.f32.gmra.mrb[76].mxu1 %vm275_vm1, %v180_v28  ;;  %4803 = vmatprep.mubr.msk.f32.mxu0 %vm5964_vm0, %v9059_v8 }
  0xa5   :  { %5186 = vmatprep.mubr.msk.f32.mxu1 %vm5964_vm0, %v9059_v8 }
  0xa7   :  { %4804 = vmatmul.mubr.msk.f32.gmra.mrb[78].mxu0 %vm275_vm1, %v56_v29 }
  0xa8   :  { %5187 = vmatmul.mubr.msk.f32.gmra.mrb[78].mxu1 %vm275_vm1, %v181_v30  ;;  %4806 = vmatprep.mubr.msk.f32.mxu0 %vm5964_vm0, %v9059_v8  ;;  %v199_v30 = vmul.f32 %v74_v22, %v74_v22 }
  0xa9   :  { %5189 = vmatprep.mubr.msk.f32.mxu1 %vm5964_vm0, %v9059_v8 }
  0xab   :  { %4807 = vmatmul.mubr.msk.f32.gmra.mrb[80].mxu0 %vm275_vm1, %v57_v31  ;;  %v75_v31 = vld [vmem:[%s9042_s0 + $0x1d0] sm:$0xff] }
  0xac   :  { %5190 = vmatmul.mubr.msk.f32.gmra.mrb[80].mxu1 %vm275_vm1, %v182_v32  ;;  %4809 = vmatprep.mubr.msk.f32.mxu0 %vm5964_vm0, %v9059_v8 }
  0xad   :  { %5192 = vmatprep.mubr.msk.f32.mxu1 %vm5964_vm0, %v9059_v8 }
  0xaf   :  { %4810 = vmatmul.mubr.msk.f32.gmra.mrb[82].mxu0 %vm275_vm1, %v58_v33 }
  0xb0   :  { %5193 = vmatmul.mubr.msk.f32.gmra.mrb[82].mxu1 %vm275_vm1, %v183_v34  ;;  %4812 = vmatprep.mubr.msk.f32.mxu0 %vm5964_vm0, %v9059_v8 }
  0xb1   :  { %5195 = vmatprep.mubr.msk.f32.mxu1 %vm5964_vm0, %v9059_v8 }
  0xb3   :  { %4813 = vmatmul.mubr.msk.f32.gmra.mrb[84].mxu0 %vm275_vm1, %v59_v35 }
  0xb4   :  { %5196 = vmatmul.mubr.msk.f32.gmra.mrb[84].mxu1 %vm275_vm1, %v184_v36  ;;  %4815 = vmatprep.mubr.msk.f32.mxu0 %vm5964_vm0, %v9059_v8 }
  0xb5   :  { %5198 = vmatprep.mubr.msk.f32.mxu1 %vm5964_vm0, %v9059_v8 }
  0xb7   :  { %4816 = vmatmul.mubr.msk.f32.gmra.mrb[86].mxu0 %vm275_vm1, %v60_v37 }
  0xb8   :  { %5199 = vmatmul.mubr.msk.f32.gmra.mrb[86].mxu1 %vm275_vm1, %v185_v38  ;;  %4818 = vmatprep.mubr.msk.f32.mxu0 %vm5964_vm0, %v9059_v8 }
  0xb9   :  { %5201 = vmatprep.mubr.msk.f32.mxu1 %vm5964_vm0, %v9059_v8 }
  0xbb   :  { %4819 = vmatmul.mubr.msk.f32.gmra.mrb[88].mxu0 %vm275_vm1, %v61_v39  ;;  %v200_v39 = vmul.f32 %v75_v31, %v75_v31 }
  0xbc   :  { %5202 = vmatmul.mubr.msk.f32.gmra.mrb[88].mxu1 %vm275_vm1, %v186_v40  ;;  %4821 = vmatprep.mubr.msk.f32.mxu0 %vm5964_vm0, %v9059_v8  ;;  %v76_v40 = vld [vmem:[%s9042_s0 + $0x1d8] sm:$0xff] }
  0xbd   :  { %5204 = vmatprep.mubr.msk.f32.mxu1 %vm5964_vm0, %v9059_v8 }
  0xbf   :  { %4822 = vmatmul.mubr.msk.f32.gmra.mrb[90].mxu0 %vm275_vm1, %v62_v41 }
  0xc0   :  { %5205 = vmatmul.mubr.msk.f32.gmra.mrb[90].mxu1 %vm275_vm1, %v187_v42  ;;  %4824 = vmatprep.mubr.msk.f32.mxu0 %vm5964_vm0, %v9059_v8 }
  0xc1   :  { %5207 = vmatprep.mubr.msk.f32.mxu1 %vm5964_vm0, %v9059_v8 }
  0xc3   :  { %4825 = vmatmul.mubr.msk.f32.gmra.mrb[92].mxu0 %vm275_vm1, %v63_v43 }
  0xc4   :  { %5208 = vmatmul.mubr.msk.f32.gmra.mrb[92].mxu1 %vm275_vm1, %v188_v44  ;;  %4827 = vmatprep.mubr.msk.f32.mxu0 %vm5964_vm0, %v9059_v8 }
  0xc5   :  { %5210 = vmatprep.mubr.msk.f32.mxu1 %vm5964_vm0, %v9059_v8 }
  0xc7   :  { %4828 = vmatmul.mubr.msk.f32.gmra.mrb[94].mxu0 %vm275_vm1, %v64_v45 }
  0xc8   :  { %5211 = vmatmul.mubr.msk.f32.gmra.mrb[94].mxu1 %vm275_vm1, %v189_v46  ;;  %4830 = vmatprep.mubr.msk.f32.mxu0 %vm5964_vm0, %v9059_v8 }
  0xc9   :  { %5213 = vmatprep.mubr.msk.f32.mxu1 %vm5964_vm0, %v9059_v8 }
  0xcb   :  { %4831 = vmatmul.mubr.msk.f32.gmra.mrb[96].mxu0 %vm275_vm1, %v65_v47 }
  0xcc   :  { %5214 = vmatmul.mubr.msk.f32.gmra.mrb[96].mxu1 %vm275_vm1, %v190_v48  ;;  %4833 = vmatprep.mubr.msk.f32.mxu0 %vm5964_vm0, %v9059_v8  ;;  %v201_v48 = vmul.f32 %v76_v40, %v76_v40 }
  0xcd   :  { %5216 = vmatprep.mubr.msk.f32.mxu1 %vm5964_vm0, %v9059_v8 }
  0xcf   :  { %4834 = vmatmul.mubr.msk.f32.gmra.mrb[98].mxu0 %vm275_vm1, %v66_v49  ;;  %v77_v49 = vld [vmem:[%s9042_s0 + $0x1e0] sm:$0xff] }
  0xd0   :  { %5217 = vmatmul.mubr.msk.f32.gmra.mrb[98].mxu1 %vm275_vm1, %v191_v50  ;;  %4836 = vmatprep.mubr.msk.f32.mxu0 %vm5964_vm0, %v9059_v8 }
  0xd1   :  { %5219 = vmatprep.mubr.msk.f32.mxu1 %vm5964_vm0, %v9059_v8 }
  0xd3   :  { %4837 = vmatmul.mubr.msk.f32.gmra.mrb[100].mxu0 %vm275_vm1, %v67_v51 }
  0xd4   :  { %5220 = vmatmul.mubr.msk.f32.gmra.mrb[100].mxu1 %vm275_vm1, %v192_v52  ;;  %4839 = vmatprep.mubr.msk.f32.mxu0 %vm5964_vm0, %v9059_v8 }
  0xd5   :  { %5222 = vmatprep.mubr.msk.f32.mxu1 %vm5964_vm0, %v9059_v8 }
  0xd7   :  { %4840 = vmatmul.mubr.msk.f32.gmra.mrb[102].mxu0 %vm275_vm1, %v68_v53 }
  0xd8   :  { %5223 = vmatmul.mubr.msk.f32.gmra.mrb[102].mxu1 %vm275_vm1, %v193_v54  ;;  %4842 = vmatprep.mubr.msk.f32.mxu0 %vm5964_vm0, %v9059_v8 }
  0xd9   :  { %5225 = vmatprep.mubr.msk.f32.mxu1 %vm5964_vm0, %v9059_v8 }
  0xdb   :  { %4843 = vmatmul.mubr.msk.f32.gmra.mrb[104].mxu0 %vm275_vm1, %v69_v55 }
  0xdc   :  { %5226 = vmatmul.mubr.msk.f32.gmra.mrb[104].mxu1 %vm275_vm1, %v194_v56  ;;  %4845 = vmatprep.mubr.msk.f32.mxu0 %vm5964_vm0, %v9059_v8 }
  0xdd   :  { %5228 = vmatprep.mubr.msk.f32.mxu1 %vm5964_vm0, %v9059_v8 }
  0xde   :  { %v717_v60 = vpop.f32.mrb[0].mxu0 }
  0xdf   :  { %v1782_v61 = vpop.f32.mrb[0].mxu1  ;;  %v4688_v62 = vpop.f32.mrb[1].mxu0  ;;  %4846 = vmatmul.mubr.msk.f32.gmra.mrb[106].mxu0 %vm275_vm1, %v70_v57  ;;  %v202_v57 = vmul.f32 %v77_v49, %v77_v49 }
  0xe0   :  { %v1783_v0 = vadd.f32 %v1782_v61, %v717_v60  ;;  %v5071_v1 = vpop.f32.mrb[1].mxu1  ;;  %5229 = vmatmul.mubr.msk.f32.gmra.mrb[106].mxu1 %vm275_vm1, %v195_v58  ;;  %4848 = vmatprep.mubr.msk.f32.mxu0 %vm5964_vm0, %v9059_v8  ;;  %v78_v58 = vld [vmem:[%s9042_s0 + $0x1e8] sm:$0xff] }
  0xe1   :  { %5231 = vmatprep.mubr.msk.f32.mxu1 %vm5964_vm0, %v9059_v8 }
  0xe2   :  { %v722_v4 = vpop.f32.mrb[2].mxu0  ;;  %v6517_v5 = vadd.f32 %v6506_v63, %v1783_v0 }
  0xe3   :  { %v1787_v6 = vpop.f32.mrb[2].mxu1  ;;  %v4691_v7 = vpop.f32.mrb[3].mxu0  ;;  %4849 = vmatmul.mubr.msk.f32.gmra.mrb[108].mxu0 %vm275_vm1, %v71_v59 }
  0xe4   :  { %v1788_v9 = vadd.f32 %v1787_v6, %v722_v4  ;;  %v5074_v10 = vpop.f32.mrb[3].mxu1  ;;  %5232 = vmatmul.mubr.msk.f32.gmra.mrb[108].mxu1 %vm275_vm1, %v196_v2  ;;  %v2539_v11 = vsel %vm2538_vm2, %v6517_v5, -inf  ;;  %4851 = vmatprep.mubr.msk.f32.mxu0 %vm5964_vm0, %v9059_v8  ;;  %v79_v4 = vld [vmem:[%s9042_s0 + $0x1f0] sm:$0xff] }
  0xe5   :  { %2540 = vmax.xlane.f32.xlu0 %v2539_v11  ;;  %5234 = vmatprep.mubr.msk.f32.mxu1 %vm5964_vm0, %v9059_v8 }
  0xe6   :  { %v727_v14 = vpop.f32.mrb[4].mxu0  ;;  %v6531_v15 = vadd.f32 %v6506_v63, %v1788_v9 }
  0xe7   :  { %v1792_v16 = vpop.f32.mrb[4].mxu1  ;;  %v4694_v17 = vpop.f32.mrb[5].mxu0  ;;  %4852 = vmatmul.mubr.msk.f32.gmra.mrb[110].mxu0 %vm275_vm1, %v72_v3  ;;  %v203_v3 = vmul.f32 %v78_v58, %v78_v58 }
  0xe8   :  { %v1793_v18 = vadd.f32 %v1792_v16, %v727_v14  ;;  %v5077_v19 = vpop.f32.mrb[5].mxu1  ;;  %5235 = vmatmul.mubr.msk.f32.gmra.mrb[110].mxu1 %vm275_vm1, %v197_v12  ;;  %v2542_v20 = vsel %vm2538_vm2, %v6531_v15, -inf  ;;  %4854 = vmatprep.mubr.msk.f32.mxu0 %vm5964_vm0, %v9059_v8  ;;  %v204_v14 = vmul.f32 %v79_v4, %v79_v4  ;;  %v80_v16 = vld [vmem:[%s9042_s0 + $0x1f8] sm:$0xff] }
  0xe9   :  { %2543 = vmax.xlane.f32.xlu0 %v2542_v20  ;;  %5237 = vmatprep.mubr.msk.f32.mxu1 %vm5964_vm0, %v9059_v8 }
  0xea   :  { %v732_v23 = vpop.f32.mrb[6].mxu0  ;;  %v6545_v24 = vadd.f32 %v6506_v63, %v1793_v18 }
  0xeb   :  { %v1797_v25 = vpop.f32.mrb[6].mxu1  ;;  %v4697_v26 = vpop.f32.mrb[7].mxu0  ;;  %4855 = vmatmul.mubr.msk.f32.gmra.mrb[112].mxu0 %vm275_vm1, %v73_v13 }
  0xec   :  { %v1798_v27 = vadd.f32 %v1797_v25, %v732_v23  ;;  %v5080_v28 = vpop.f32.mrb[7].mxu1  ;;  %5238 = vmatmul.mubr.msk.f32.gmra.mrb[112].mxu1 %vm275_vm1, %v198_v21  ;;  %v2545_v29 = vsel %vm2538_vm2, %v6545_v24, -inf  ;;  %4857 = vmatprep.mubr.msk.f32.mxu0 %vm5964_vm0, %v9059_v8  ;;  %v205_v25 = vmul.f32 %v80_v16, %v80_v16  ;;  %v81_v26 = vld [vmem:[%s9042_s0 + $0x200] sm:$0xff] }
  0xed   :  { %2546 = vmax.xlane.f32.xlu1 %v2545_v29  ;;  %5240 = vmatprep.mubr.msk.f32.mxu1 %vm5964_vm0, %v9059_v8 }
  0xee   :  { %v737_v32 = vpop.f32.mrb[8].mxu0  ;;  %v6559_v33 = vadd.f32 %v6506_v63, %v1798_v27 }
  0xef   :  { %v1802_v34 = vpop.f32.mrb[8].mxu1  ;;  %v4700_v35 = vpop.f32.mrb[9].mxu0  ;;  %4858 = vmatmul.mubr.msk.f32.gmra.mrb[114].mxu0 %vm275_vm1, %v74_v22 }
  0xf0   :  { %v1803_v36 = vadd.f32 %v1802_v34, %v737_v32  ;;  %v5083_v37 = vpop.f32.mrb[9].mxu1  ;;  %5241 = vmatmul.mubr.msk.f32.gmra.mrb[114].mxu1 %vm275_vm1, %v199_v30  ;;  %v2548_v38 = vsel %vm2538_vm2, %v6559_v33, -inf  ;;  %4860 = vmatprep.mubr.msk.f32.mxu0 %vm5964_vm0, %v9059_v8  ;;  %v206_v35 = vmul.f32 %v81_v26, %v81_v26 }
  0xf1   :  { %2549 = vmax.xlane.f32.xlu1 %v2548_v38  ;;  %5243 = vmatprep.mubr.msk.f32.mxu1 %vm5964_vm0, %v9059_v8 }
  0xf2   :  { %v742_v41 = vpop.f32.mrb[10].mxu0  ;;  %v6573_v42 = vadd.f32 %v6506_v63, %v1803_v36  ;;  %v82_v36 = vld [vmem:[%s9042_s0 + $0x208] sm:$0xff] }
  0xf3   :  { %v1807_v43 = vpop.f32.mrb[10].mxu1  ;;  %v4703_v44 = vpop.f32.mrb[11].mxu0  ;;  %4861 = vmatmul.mubr.msk.f32.gmra.mrb[116].mxu0 %vm275_vm1, %v75_v31 }
  0xf4   :  { %v1808_v45 = vadd.f32 %v1807_v43, %v742_v41  ;;  %v5086_v46 = vpop.f32.mrb[11].mxu1  ;;  %5244 = vmatmul.mubr.msk.f32.gmra.mrb[116].mxu1 %vm275_vm1, %v200_v39  ;;  %v2551_v47 = vsel %vm2538_vm2, %v6573_v42, -inf  ;;  %4863 = vmatprep.mubr.msk.f32.mxu0 %vm5964_vm0, %v9059_v8 }
  0xf5   :  { %2552 = vmax.xlane.f32.xlu0 %v2551_v47  ;;  %5246 = vmatprep.mubr.msk.f32.mxu1 %vm5964_vm0, %v9059_v8  ;;  %v83_v46 = vld [vmem:[%s9042_s0 + $0x210] sm:$0xff] }
  0xf6   :  { %v747_v50 = vpop.f32.mrb[12].mxu0  ;;  %v6587_v51 = vadd.f32 %v6506_v63, %v1808_v45  ;;  %v207_v45 = vmul.f32 %v82_v36, %v82_v36 }
  0xf7   :  { %v1812_v52 = vpop.f32.mrb[12].mxu1  ;;  %v4706_v53 = vpop.f32.mrb[13].mxu0  ;;  %4864 = vmatmul.mubr.msk.f32.gmra.mrb[118].mxu0 %vm275_vm1, %v76_v40 }
  0xf8   :  { %v1813_v54 = vadd.f32 %v1812_v52, %v747_v50  ;;  %v5089_v55 = vpop.f32.mrb[13].mxu1  ;;  %5247 = vmatmul.mubr.msk.f32.gmra.mrb[118].mxu1 %vm275_vm1, %v201_v48  ;;  %v2554_v56 = vsel %vm2538_vm2, %v6587_v51, -inf  ;;  %4866 = vmatprep.mubr.msk.f32.mxu0 %vm5964_vm0, %v9059_v8 }
  0xf9   :  { %2555 = vmax.xlane.f32.xlu1 %v2554_v56  ;;  %5249 = vmatprep.mubr.msk.f32.mxu1 %vm5964_vm0, %v9059_v8  ;;  %v208_v55 = vmul.f32 %v83_v46, %v83_v46  ;;  %v84_v56 = vld [vmem:[%s9042_s0 + $0x218] sm:$0xff] }
  0xfa   :  { %v752_v59 = vpop.f32.mrb[14].mxu0  ;;  %v6601_v60 = vadd.f32 %v6506_v63, %v1813_v54 }
  0xfb   :  { %v1817_v61 = vpop.f32.mrb[14].mxu1  ;;  %v4709_v62 = vpop.f32.mrb[15].mxu0  ;;  %4867 = vmatmul.mubr.msk.f32.gmra.mrb[120].mxu0 %vm275_vm1, %v77_v49 }
  0xfc   :  { %v1818_v0 = vadd.f32 %v1817_v61, %v752_v59  ;;  %v5092_v1 = vpop.f32.mrb[15].mxu1  ;;  %5250 = vmatmul.mubr.msk.f32.gmra.mrb[120].mxu1 %vm275_vm1, %v202_v57  ;;  %v2557_v2 = vsel %vm2538_vm2, %v6601_v60, -inf  ;;  %4869 = vmatprep.mubr.msk.f32.mxu0 %vm5964_vm0, %v9059_v8 }
  0xfd   :  { %2558 = vmax.xlane.f32.xlu0 %v2557_v2  ;;  %5252 = vmatprep.mubr.msk.f32.mxu1 %vm5964_vm0, %v9059_v8  ;;  %v209_v2 = vmul.f32 %v84_v56, %v84_v56 }
  0xfe   :  { %v757_v6 = vpop.f32.mrb[16].mxu0  ;;  %v6615_v7 = vadd.f32 %v6506_v63, %v1818_v0 }
  0xff   :  { %v1822_v9 = vpop.f32.mrb[16].mxu1  ;;  %v4712_v10 = vpop.f32.mrb[17].mxu0  ;;  %4870 = vmatmul.mubr.msk.f32.gmra.mrb[122].mxu0 %vm275_vm1, %v78_v58 }
 0x100   :  { %v1823_v11 = vadd.f32 %v1822_v9, %v757_v6  ;;  %v5095_v12 = vpop.f32.mrb[17].mxu1  ;;  %5253 = vmatmul.mubr.msk.f32.gmra.mrb[122].mxu1 %vm275_vm1, %v203_v3  ;;  %v2560_v13 = vsel %vm2538_vm2, %v6615_v7, -inf  ;;  %4872 = vmatprep.mubr.msk.f32.mxu0 %vm5964_vm0, %v9059_v8  ;;  %v85_v3 = vld [vmem:[%s9042_s0 + $0x220] sm:$0xff] }
 0x101   :  { %2561 = vmax.xlane.f32.xlu1 %v2560_v13  ;;  %5255 = vmatprep.mubr.msk.f32.mxu1 %vm5964_vm0, %v9059_v8 }
 0x102   :  { %v762_v17 = vpop.f32.mrb[18].mxu0  ;;  %v6629_v18 = vadd.f32 %v6506_v63, %v1823_v11 }
 0x103   :  { %v1827_v19 = vpop.f32.mrb[18].mxu1  ;;  %v4715_v20 = vpop.f32.mrb[19].mxu0  ;;  %4873 = vmatmul.mubr.msk.f32.gmra.mrb[124].mxu0 %vm275_vm1, %v79_v4 }
 0x104   :  { %v1828_v21 = vadd.f32 %v1827_v19, %v762_v17  ;;  %v5098_v22 = vpop.f32.mrb[19].mxu1  ;;  %5256 = vmatmul.mubr.msk.f32.gmra.mrb[124].mxu1 %vm275_vm1, %v204_v14  ;;  %v2563_v23 = vsel %vm2538_vm2, %v6629_v18, -inf  ;;  %4875 = vmatprep.mubr.msk.f32.mxu0 %vm5964_vm0, %v9059_v8  ;;  %v210_v14 = vmul.f32 %v85_v3, %v85_v3 }
 0x105   :  { %2564 = vmax.xlane.f32.xlu0 %v2563_v23  ;;  %5258 = vmatprep.mubr.msk.f32.mxu1 %vm5964_vm0, %v9059_v8 }
 0x106   :  { %v767_v27 = vpop.f32.mrb[20].mxu0  ;;  %v6643_v28 = vadd.f32 %v6506_v63, %v1828_v21 }
 0x107   :  { %v1832_v29 = vpop.f32.mrb[20].mxu1  ;;  %v4718_v30 = vpop.f32.mrb[21].mxu0  ;;  %4876 = vmatmul.mubr.msk.f32.gmra.mrb[126].mxu0 %vm275_vm1, %v80_v16  ;;  %v86_v16 = vld [vmem:[%s9042_s0 + $0x228] sm:$0xff] }
 0x108   :  { %v1833_v31 = vadd.f32 %v1832_v29, %v767_v27  ;;  %v5101_v32 = vpop.f32.mrb[21].mxu1  ;;  %5259 = vmatmul.mubr.msk.f32.gmra.mrb[126].mxu1 %vm275_vm1, %v205_v25  ;;  %v2566_v34 = vsel %vm2538_vm2, %v6643_v28, -inf  ;;  %4878 = vmatprep.mubr.msk.f32.mxu0 %vm5964_vm0, %v9059_v8  ;;  %v87_v27 = vld [vmem:[%s9042_s0 + $0x230] sm:$0xff] }
 0x109   :  { %2567 = vmax.xlane.f32.xlu1 %v2566_v34  ;;  %5261 = vmatprep.mubr.msk.f32.mxu1 %vm5964_vm0, %v9059_v8 }
 0x10a   :  { %v772_v37 = vpop.f32.mrb[22].mxu0  ;;  %v6657_v38 = vadd.f32 %v6506_v63, %v1833_v31 }
 0x10b   :  { %v1837_v39 = vpop.f32.mrb[22].mxu1  ;;  %v4721_v40 = vpop.f32.mrb[23].mxu0  ;;  %4879 = vmatmul.mubr.msk.f32.gmra.mrb[128].mxu0 %vm275_vm1, %v81_v26  ;;  %v211_v26 = vmul.f32 %v86_v16, %v86_v16 }
 0x10c   :  { %v1838_v41 = vadd.f32 %v1837_v39, %v772_v37  ;;  %v5104_v43 = vpop.f32.mrb[23].mxu1  ;;  %5262 = vmatmul.mubr.msk.f32.gmra.mrb[128].mxu1 %vm275_vm1, %v206_v35  ;;  %v2569_v44 = vsel %vm2538_vm2, %v6657_v38, -inf  ;;  %4881 = vmatprep.mubr.msk.f32.mxu0 %vm5964_vm0, %v9059_v8  ;;  %v212_v37 = vmul.f32 %v87_v27, %v87_v27  ;;  %v88_v39 = vld [vmem:[%s9042_s0 + $0x238] sm:$0xff] }
 0x10d   :  { %2570 = vmax.xlane.f32.xlu0 %v2569_v44  ;;  %5264 = vmatprep.mubr.msk.f32.mxu1 %vm5964_vm0, %v9059_v8 }
 0x10e   :  { %v777_v47 = vpop.f32.mrb[24].mxu0  ;;  %v6671_v48 = vadd.f32 %v6506_v63, %v1838_v41 }
 0x10f   :  { %v1842_v49 = vpop.f32.mrb[24].mxu1  ;;  %v4724_v50 = vpop.f32.mrb[25].mxu0  ;;  %4882 = vmatmul.mubr.msk.f32.gmra.mrb[130].mxu0 %vm275_vm1, %v82_v36 }
 0x110   :  { %v1843_v52 = vadd.f32 %v1842_v49, %v777_v47  ;;  %v5107_v53 = vpop.f32.mrb[25].mxu1  ;;  %5265 = vmatmul.mubr.msk.f32.gmra.mrb[130].mxu1 %vm275_vm1, %v207_v45  ;;  %v2572_v54 = vsel %vm2538_vm2, %v6671_v48, -inf  ;;  %4884 = vmatprep.mubr.msk.f32.mxu0 %vm5964_vm0, %v9059_v8  ;;  %v213_v49 = vmul.f32 %v88_v39, %v88_v39  ;;  %v89_v50 = vld [vmem:[%s9042_s0 + $0x240] sm:$0xff] }
 0x111   :  { %2573 = vmax.xlane.f32.xlu1 %v2572_v54  ;;  %5267 = vmatprep.mubr.msk.f32.mxu1 %vm5964_vm0, %v9059_v8 }
 0x112   :  { %v782_v57 = vpop.f32.mrb[26].mxu0  ;;  %v6685_v58 = vadd.f32 %v6506_v63, %v1843_v52 }
 0x113   :  { %v1847_v59 = vpop.f32.mrb[26].mxu1  ;;  %v4727_v61 = vpop.f32.mrb[27].mxu0  ;;  %4885 = vmatmul.mubr.msk.f32.gmra.mrb[132].mxu0 %vm275_vm1, %v83_v46 }
 0x114   :  { %v1848_v62 = vadd.f32 %v1847_v59, %v782_v57  ;;  %v5110_v0 = vpop.f32.mrb[27].mxu1  ;;  %5268 = vmatmul.mubr.msk.f32.gmra.mrb[132].mxu1 %vm275_vm1, %v208_v55  ;;  %v2575_v1 = vsel %vm2538_vm2, %v6685_v58, -inf  ;;  %4887 = vmatprep.mubr.msk.f32.mxu0 %vm5964_vm0, %v9059_v8  ;;  %v214_v61 = vmul.f32 %v89_v50, %v89_v50 }
 0x115   :  { %2576 = vmax.xlane.f32.xlu0 %v2575_v1  ;;  %5270 = vmatprep.mubr.msk.f32.mxu1 %vm5964_vm0, %v9059_v8 }
 0x116   :  { %v787_v4 = vpop.f32.mrb[28].mxu0  ;;  %v6699_v6 = vadd.f32 %v6506_v63, %v1848_v62  ;;  %v90_v62 = vld [vmem:[%s9042_s0 + $0x248] sm:$0xff] }
 0x117   :  { %v1852_v9 = vpop.f32.mrb[28].mxu1  ;;  %v4730_v10 = vpop.f32.mrb[29].mxu0  ;;  %4888 = vmatmul.mubr.msk.f32.gmra.mrb[134].mxu0 %vm275_vm1, %v84_v56 }
 0x118   :  { %v1853_v11 = vadd.f32 %v1852_v9, %v787_v4  ;;  %v5113_v12 = vpop.f32.mrb[29].mxu1  ;;  %5271 = vmatmul.mubr.msk.f32.gmra.mrb[134].mxu1 %vm275_vm1, %v209_v2  ;;  %v2578_v13 = vsel %vm2538_vm2, %v6699_v6, -inf  ;;  %4890 = vmatprep.mubr.msk.f32.mxu0 %vm5964_vm0, %v9059_v8 }
 0x119   :  { %2579 = vmax.xlane.f32.xlu1 %v2578_v13  ;;  %5273 = vmatprep.mubr.msk.f32.mxu1 %vm5964_vm0, %v9059_v8  ;;  %v91_v12 = vld [vmem:[%s9042_s0 + $0x250] sm:$0xff] }
 0x11a   :  { %v792_v17 = vpop.f32.mrb[30].mxu0  ;;  %v6713_v19 = vadd.f32 %v6506_v63, %v1853_v11  ;;  %v215_v11 = vmul.f32 %v90_v62, %v90_v62 }
 0x11b   :  { %v1857_v20 = vpop.f32.mrb[30].mxu1  ;;  %v4733_v21 = vpop.f32.mrb[31].mxu0  ;;  %4891 = vmatmul.mubr.msk.f32.gmra.mrb[136].mxu0 %vm275_vm1, %v85_v3 }
 0x11c   :  { %v1858_v22 = vadd.f32 %v1857_v20, %v792_v17  ;;  %v5116_v23 = vpop.f32.mrb[31].mxu1  ;;  %5274 = vmatmul.mubr.msk.f32.gmra.mrb[136].mxu1 %vm275_vm1, %v210_v14  ;;  %v2581_v25 = vsel %vm2538_vm2, %v6713_v19, -inf  ;;  %4893 = vmatprep.mubr.msk.f32.mxu0 %vm5964_vm0, %v9059_v8 }
 0x11d   :  { %2582 = vmax.xlane.f32.xlu0 %v2581_v25  ;;  %5276 = vmatprep.mubr.msk.f32.mxu1 %vm5964_vm0, %v9059_v8  ;;  %v216_v23 = vmul.f32 %v91_v12, %v91_v12  ;;  %v92_v25 = vld [vmem:[%s9042_s0 + $0x258] sm:$0xff] }
 0x11e   :  { %v797_v29 = vpop.f32.mrb[32].mxu0  ;;  %v6727_v30 = vadd.f32 %v6506_v63, %v1858_v22 }
 0x11f   :  { %v1862_v31 = vpop.f32.mrb[32].mxu1  ;;  %v4736_v32 = vpop.f32.mrb[33].mxu0  ;;  %4894 = vmatmul.mubr.msk.f32.gmra.mrb[138].mxu0 %vm275_vm1, %v86_v16 }
 0x120   :  { %v1863_v34 = vadd.f32 %v1862_v31, %v797_v29  ;;  %v5119_v35 = vpop.f32.mrb[33].mxu1  ;;  %5277 = vmatmul.mubr.msk.f32.gmra.mrb[138].mxu1 %vm275_vm1, %v211_v26  ;;  %v2584_v36 = vsel %vm2538_vm2, %v6727_v30, -inf  ;;  %4896 = vmatprep.mubr.msk.f32.mxu0 %vm5964_vm0, %v9059_v8 }
 0x121   :  { %2585 = vmax.xlane.f32.xlu1 %v2584_v36  ;;  %5279 = vmatprep.mubr.msk.f32.mxu1 %vm5964_vm0, %v9059_v8  ;;  %v217_v36 = vmul.f32 %v92_v25, %v92_v25 }
 0x122   :  { %v802_v40 = vpop.f32.mrb[34].mxu0  ;;  %v6741_v41 = vadd.f32 %v6506_v63, %v1863_v34 }
 0x123   :  { %v1867_v43 = vpop.f32.mrb[34].mxu1  ;;  %v4739_v44 = vpop.f32.mrb[35].mxu0  ;;  %4897 = vmatmul.mubr.msk.f32.gmra.mrb[140].mxu0 %vm275_vm1, %v87_v27 }
 0x124   :  { %v1868_v45 = vadd.f32 %v1867_v43, %v802_v40  ;;  %v5122_v46 = vpop.f32.mrb[35].mxu1  ;;  %5280 = vmatmul.mubr.msk.f32.gmra.mrb[140].mxu1 %vm275_vm1, %v212_v37  ;;  %v2587_v47 = vsel %vm2538_vm2, %v6741_v41, -inf  ;;  %4899 = vmatprep.mubr.msk.f32.mxu0 %vm5964_vm0, %v9059_v8  ;;  %v93_v37 = vld [vmem:[%s9042_s0 + $0x260] sm:$0xff] }
 0x125   :  { %2588 = vmax.xlane.f32.xlu0 %v2587_v47  ;;  %5282 = vmatprep.mubr.msk.f32.mxu1 %vm5964_vm0, %v9059_v8 }
 0x126   :  { %v807_v52 = vpop.f32.mrb[36].mxu0  ;;  %v6755_v53 = vadd.f32 %v6506_v63, %v1868_v45 }
 0x127   :  { %v1872_v54 = vpop.f32.mrb[36].mxu1  ;;  %v4742_v55 = vpop.f32.mrb[37].mxu0  ;;  %4900 = vmatmul.mubr.msk.f32.gmra.mrb[142].mxu0 %vm275_vm1, %v88_v39 }
 0x128   :  { %v1873_v56 = vadd.f32 %v1872_v54, %v807_v52  ;;  %v5125_v57 = vpop.f32.mrb[37].mxu1  ;;  %5283 = vmatmul.mubr.msk.f32.gmra.mrb[142].mxu1 %vm275_vm1, %v213_v49  ;;  %v2590_v59 = vsel %vm2538_vm2, %v6755_v53, -inf  ;;  %4902 = vmatprep.mubr.msk.f32.mxu0 %vm5964_vm0, %v9059_v8  ;;  %v218_v49 = vmul.f32 %v93_v37, %v93_v37 }
 0x129   :  { %2591 = vmax.xlane.f32.xlu1 %v2590_v59  ;;  %5285 = vmatprep.mubr.msk.f32.mxu1 %vm5964_vm0, %v9059_v8 }
 0x12a   :  { %v812_v0 = vpop.f32.mrb[38].mxu0  ;;  %v6769_v1 = vadd.f32 %v6506_v63, %v1873_v56 }
 0x12b   :  { %v1877_v2 = vpop.f32.mrb[38].mxu1  ;;  %v4745_v3 = vpop.f32.mrb[39].mxu0  ;;  %4903 = vmatmul.mubr.msk.f32.gmra.mrb[144].mxu0 %vm275_vm1, %v89_v50  ;;  %v94_v50 = vld [vmem:[%s9042_s0 + $0x268] sm:$0xff] }
 0x12c   :  { %v1878_v4 = vadd.f32 %v1877_v2, %v812_v0  ;;  %v5128_v9 = vpop.f32.mrb[39].mxu1  ;;  %5286 = vmatmul.mubr.msk.f32.gmra.mrb[144].mxu1 %vm275_vm1, %v214_v61  ;;  %v2593_v10 = vsel %vm2538_vm2, %v6769_v1, -inf  ;;  %4905 = vmatprep.mubr.msk.f32.mxu0 %vm5964_vm0, %v9059_v8  ;;  %v95_v0 = vld [vmem:[%s9042_s0 + $0x270] sm:$0xff] }
 0x12d   :  { %2594 = vmax.xlane.f32.xlu0 %v2593_v10  ;;  %5288 = vmatprep.mubr.msk.f32.mxu1 %vm5964_vm0, %v9059_v8 }
 0x12e   :  { %v817_v13 = vpop.f32.mrb[40].mxu0  ;;  %v6783_v14 = vadd.f32 %v6506_v63, %v1878_v4 }
 0x12f   :  { %v1882_v16 = vpop.f32.mrb[40].mxu1  ;;  %v4748_v17 = vpop.f32.mrb[41].mxu0  ;;  %4906 = vmatmul.mubr.msk.f32.gmra.mrb[146].mxu0 %vm275_vm1, %v90_v62  ;;  %v219_v62 = vmul.f32 %v94_v50, %v94_v50 }
 0x130   :  { %v1883_v20 = vadd.f32 %v1882_v16, %v817_v13  ;;  %v5131_v21 = vpop.f32.mrb[41].mxu1  ;;  %5289 = vmatmul.mubr.msk.f32.gmra.mrb[146].mxu1 %vm275_vm1, %v215_v11  ;;  %v2596_v22 = vsel %vm2538_vm2, %v6783_v14, -inf  ;;  %4908 = vmatprep.mubr.msk.f32.mxu0 %vm5964_vm0, %v9059_v8  ;;  %v220_v13 = vmul.f32 %v95_v0, %v95_v0  ;;  %v96_v16 = vld [vmem:[%s9042_s0 + $0x278] sm:$0xff] }
 0x131   :  { %2597 = vmax.xlane.f32.xlu1 %v2596_v22  ;;  %5291 = vmatprep.mubr.msk.f32.mxu1 %vm5964_vm0, %v9059_v8 }
 0x132   :  { %v822_v26 = vpop.f32.mrb[42].mxu0  ;;  %v6797_v27 = vadd.f32 %v6506_v63, %v1883_v20 }
 0x133   :  { %v1887_v29 = vpop.f32.mrb[42].mxu1  ;;  %v4751_v31 = vpop.f32.mrb[43].mxu0  ;;  %4909 = vmatmul.mubr.msk.f32.gmra.mrb[148].mxu0 %vm275_vm1, %v91_v12 }
 0x134   :  { %v1888_v32 = vadd.f32 %v1887_v29, %v822_v26  ;;  %v5134_v34 = vpop.f32.mrb[43].mxu1  ;;  %5292 = vmatmul.mubr.msk.f32.gmra.mrb[148].mxu1 %vm275_vm1, %v216_v23  ;;  %v2599_v35 = vsel %vm2538_vm2, %v6797_v27, -inf  ;;  %4911 = vmatprep.mubr.msk.f32.mxu0 %vm5964_vm0, %v9059_v8  ;;  %v221_v29 = vmul.f32 %v96_v16, %v96_v16  ;;  %v97_v31 = vld [vmem:[%s9042_s0 + $0x280] sm:$0xff] }
 0x135   :  { %2600 = vmax.xlane.f32.xlu0 %v2599_v35  ;;  %5294 = vmatprep.mubr.msk.f32.mxu1 %vm5964_vm0, %v9059_v8 }
 0x136   :  { %v827_v39 = vpop.f32.mrb[44].mxu0  ;;  %v6811_v40 = vadd.f32 %v6506_v63, %v1888_v32 }
 0x137   :  { %v1892_v43 = vpop.f32.mrb[44].mxu1  ;;  %v4754_v44 = vpop.f32.mrb[45].mxu0  ;;  %4912 = vmatmul.mubr.msk.f32.gmra.mrb[150].mxu0 %vm275_vm1, %v92_v25 }
 0x138   :  { %v1893_v45 = vadd.f32 %v1892_v43, %v827_v39  ;;  %v5137_v46 = vpop.f32.mrb[45].mxu1  ;;  %5295 = vmatmul.mubr.msk.f32.gmra.mrb[150].mxu1 %vm275_vm1, %v217_v36  ;;  %v2602_v47 = vsel %vm2538_vm2, %v6811_v40, -inf  ;;  %4914 = vmatprep.mubr.msk.f32.mxu0 %vm5964_vm0, %v9059_v8  ;;  %v222_v44 = vmul.f32 %v97_v31, %v97_v31 }
 0x139   :  { %2603 = vmax.xlane.f32.xlu1 %v2602_v47  ;;  %5297 = vmatprep.mubr.msk.f32.mxu1 %vm5964_vm0, %v9059_v8 }
 0x13a   :  { %v832_v52 = vpop.f32.mrb[46].mxu0  ;;  %v6825_v54 = vadd.f32 %v6506_v63, %v1893_v45  ;;  %v98_v45 = vld [vmem:[%s9042_s0 + $0x288] sm:$0xff] }
 0x13b   :  { %v1897_v55 = vpop.f32.mrb[46].mxu1  ;;  %v4757_v56 = vpop.f32.mrb[47].mxu0  ;;  %4915 = vmatmul.mubr.msk.f32.gmra.mrb[152].mxu0 %vm275_vm1, %v93_v37 }
 0x13c   :  { %v1898_v57 = vadd.f32 %v1897_v55, %v832_v52  ;;  %v5140_v59 = vpop.f32.mrb[47].mxu1  ;;  %5298 = vmatmul.mubr.msk.f32.gmra.mrb[152].mxu1 %vm275_vm1, %v218_v49  ;;  %v2605_v61 = vsel %vm2538_vm2, %v6825_v54, -inf  ;;  %4917 = vmatprep.mubr.msk.f32.mxu0 %vm5964_vm0, %v9059_v8 }
 0x13d   :  { %2606 = vmax.xlane.f32.xlu0 %v2605_v61  ;;  %5300 = vmatprep.mubr.msk.f32.mxu1 %vm5964_vm0, %v9059_v8  ;;  %v99_v59 = vld [vmem:[%s9042_s0 + $0x290] sm:$0xff] }
 0x13e   :  { %v837_v2 = vpop.f32.mrb[48].mxu0  ;;  %v6839_v3 = vadd.f32 %v6506_v63, %v1898_v57  ;;  %v223_v57 = vmul.f32 %v98_v45, %v98_v45 }
 0x13f   :  { %v1902_v4 = vpop.f32.mrb[48].mxu1  ;;  %v4760_v9 = vpop.f32.mrb[49].mxu0  ;;  %4918 = vmatmul.mubr.msk.f32.gmra.mrb[154].mxu0 %vm275_vm1, %v94_v50 }
 0x140   :  { %v1903_v10 = vadd.f32 %v1902_v4, %v837_v2  ;;  %v5143_v11 = vpop.f32.mrb[49].mxu1  ;;  %5301 = vmatmul.mubr.msk.f32.gmra.mrb[154].mxu1 %vm275_vm1, %v219_v62  ;;  %v2608_v12 = vsel %vm2538_vm2, %v6839_v3, -inf  ;;  %4920 = vmatprep.mubr.msk.f32.mxu0 %vm5964_vm0, %v9059_v8 }
 0x141   :  { %2609 = vmax.xlane.f32.xlu1 %v2608_v12  ;;  %5303 = vmatprep.mubr.msk.f32.mxu1 %vm5964_vm0, %v9059_v8  ;;  %v224_v11 = vmul.f32 %v99_v59, %v99_v59  ;;  %v100_v12 = vld [vmem:[%s9042_s0 + $0x298] sm:$0xff] }
 0x142   :  { %v842_v17 = vpop.f32.mrb[50].mxu0  ;;  %v6853_v20 = vadd.f32 %v6506_v63, %v1903_v10 }
 0x143   :  { %v1907_v21 = vpop.f32.mrb[50].mxu1  ;;  %v4763_v22 = vpop.f32.mrb[51].mxu0  ;;  %4921 = vmatmul.mubr.msk.f32.gmra.mrb[156].mxu0 %vm275_vm1, %v95_v0 }
 0x144   :  { %v1908_v23 = vadd.f32 %v1907_v21, %v842_v17  ;;  %v5146_v25 = vpop.f32.mrb[51].mxu1  ;;  %5304 = vmatmul.mubr.msk.f32.gmra.mrb[156].mxu1 %vm275_vm1, %v220_v13  ;;  %v2611_v26 = vsel %vm2538_vm2, %v6853_v20, -inf  ;;  %4923 = vmatprep.mubr.msk.f32.mxu0 %vm5964_vm0, %v9059_v8 }
 0x145   :  { %2612 = vmax.xlane.f32.xlu0 %v2611_v26  ;;  %5306 = vmatprep.mubr.msk.f32.mxu1 %vm5964_vm0, %v9059_v8  ;;  %v225_v26 = vmul.f32 %v100_v12, %v100_v12 }
 0x146   :  { %v847_v32 = vpop.f32.mrb[52].mxu0  ;;  %v6867_v34 = vadd.f32 %v6506_v63, %v1908_v23 }
 0x147   :  { %v1912_v35 = vpop.f32.mrb[52].mxu1  ;;  %v4766_v36 = vpop.f32.mrb[53].mxu0  ;;  %4924 = vmatmul.mubr.msk.f32.gmra.mrb[158].mxu0 %vm275_vm1, %v96_v16 }
 0x148   :  { %v1913_v37 = vadd.f32 %v1912_v35, %v847_v32  ;;  %v5149_v39 = vpop.f32.mrb[53].mxu1  ;;  %5307 = vmatmul.mubr.msk.f32.gmra.mrb[158].mxu1 %vm275_vm1, %v221_v29  ;;  %v2614_v43 = vsel %vm2538_vm2, %v6867_v34, -inf  ;;  %4926 = vmatprep.mubr.msk.f32.mxu0 %vm5964_vm0, %v9059_v8  ;;  %v101_v29 = vld [vmem:[%s9042_s0 + $0x2a0] sm:$0xff] }
 0x149   :  { %2615 = vmax.xlane.f32.xlu1 %v2614_v43  ;;  %5309 = vmatprep.mubr.msk.f32.mxu1 %vm5964_vm0, %v9059_v8 }
 0x14a   :  { %v852_v46 = vpop.f32.mrb[54].mxu0  ;;  %v6881_v47 = vadd.f32 %v6506_v63, %v1913_v37 }
 0x14b   :  { %v1917_v49 = vpop.f32.mrb[54].mxu1  ;;  %v4769_v50 = vpop.f32.mrb[55].mxu0  ;;  %4927 = vmatmul.mubr.msk.f32.gmra.mrb[160].mxu0 %vm275_vm1, %v97_v31 }
 0x14c   :  { %v1918_v52 = vadd.f32 %v1917_v49, %v852_v46  ;;  %v5152_v55 = vpop.f32.mrb[55].mxu1  ;;  %5310 = vmatmul.mubr.msk.f32.gmra.mrb[160].mxu1 %vm275_vm1, %v222_v44  ;;  %v2617_v56 = vsel %vm2538_vm2, %v6881_v47, -inf  ;;  %4929 = vmatprep.mubr.msk.f32.mxu0 %vm5964_vm0, %v9059_v8  ;;  %v226_v44 = vmul.f32 %v101_v29, %v101_v29 }
 0x14d   :  { %2618 = vmax.xlane.f32.xlu0 %v2617_v56  ;;  %5312 = vmatprep.mubr.msk.f32.mxu1 %vm5964_vm0, %v9059_v8 }
 0x14e   :  { %v857_v61 = vpop.f32.mrb[56].mxu0  ;;  %v6895_v62 = vadd.f32 %v6506_v63, %v1918_v52 }
 0x14f   :  { %v1922_v0 = vpop.f32.mrb[56].mxu1  ;;  %v4772_v2 = vpop.f32.mrb[57].mxu0  ;;  %4930 = vmatmul.mubr.msk.f32.gmra.mrb[162].mxu0 %vm275_vm1, %v98_v45  ;;  %v102_v45 = vld [vmem:[%s9042_s0 + $0x2a8] sm:$0xff] }
 0x150   :  { %v1923_v4 = vadd.f32 %v1922_v0, %v857_v61  ;;  %v5155_v9 = vpop.f32.mrb[57].mxu1  ;;  %5313 = vmatmul.mubr.msk.f32.gmra.mrb[162].mxu1 %vm275_vm1, %v223_v57  ;;  %v2620_v10 = vsel %vm2538_vm2, %v6895_v62, -inf  ;;  %4932 = vmatprep.mubr.msk.f32.mxu0 %vm5964_vm0, %v9059_v8  ;;  %v103_v61 = vld [vmem:[%s9042_s0 + $0x2b0] sm:$0xff] }
 0x151   :  { %2621 = vmax.xlane.f32.xlu1 %v2620_v10  ;;  %5315 = vmatprep.mubr.msk.f32.mxu1 %vm5964_vm0, %v9059_v8 }
 0x152   :  { %v862_v13 = vpop.f32.mrb[58].mxu0  ;;  %v6909_v16 = vadd.f32 %v6506_v63, %v1923_v4 }
 0x153   :  { %v1927_v17 = vpop.f32.mrb[58].mxu1  ;;  %v4775_v21 = vpop.f32.mrb[59].mxu0  ;;  %4933 = vmatmul.mubr.msk.f32.gmra.mrb[164].mxu0 %vm275_vm1, %v99_v59  ;;  %v227_v59 = vmul.f32 %v102_v45, %v102_v45 }
 0x154   :  { %v1928_v22 = vadd.f32 %v1927_v17, %v862_v13  ;;  %v5158_v23 = vpop.f32.mrb[59].mxu1  ;;  %5316 = vmatmul.mubr.msk.f32.gmra.mrb[164].mxu1 %vm275_vm1, %v224_v11  ;;  %v2623_v25 = vsel %vm2538_vm2, %v6909_v16, -inf  ;;  %4935 = vmatprep.mubr.msk.f32.mxu0 %vm5964_vm0, %v9059_v8  ;;  %v228_v13 = vmul.f32 %v103_v61, %v103_v61  ;;  %v104_v17 = vld [vmem:[%s9042_s0 + $0x2b8] sm:$0xff] }
 0x155   :  { %2624 = vmax.xlane.f32.xlu0 %v2623_v25  ;;  %5318 = vmatprep.mubr.msk.f32.mxu1 %vm5964_vm0, %v9059_v8 }
 0x156   :  { %v867_v31 = vpop.f32.mrb[60].mxu0  ;;  %v6923_v32 = vadd.f32 %v6506_v63, %v1928_v22 }
 0x157   :  { %v1932_v35 = vpop.f32.mrb[60].mxu1  ;;  %v4778_v36 = vpop.f32.mrb[61].mxu0  ;;  %4936 = vmatmul.mubr.msk.f32.gmra.mrb[166].mxu0 %vm275_vm1, %v100_v12 }
 0x158   :  { %v1933_v37 = vadd.f32 %v1932_v35, %v867_v31  ;;  %v5161_v39 = vpop.f32.mrb[61].mxu1  ;;  %5319 = vmatmul.mubr.msk.f32.gmra.mrb[166].mxu1 %vm275_vm1, %v225_v26  ;;  %v2626_v43 = vsel %vm2538_vm2, %v6923_v32, -inf  ;;  %4938 = vmatprep.mubr.msk.f32.mxu0 %vm5964_vm0, %v9059_v8  ;;  %v229_v35 = vmul.f32 %v104_v17, %v104_v17  ;;  %v105_v36 = vld [vmem:[%s9042_s0 + $0x2c0] sm:$0xff] }
 0x159   :  { %2627 = vmax.xlane.f32.xlu1 %v2626_v43  ;;  %5321 = vmatprep.mubr.msk.f32.mxu1 %vm5964_vm0, %v9059_v8 }
 0x15a   :  { %v872_v46 = vpop.f32.mrb[62].mxu0  ;;  %v6937_v49 = vadd.f32 %v6506_v63, %v1933_v37 }
 0x15b   :  { %v1937_v50 = vpop.f32.mrb[62].mxu1  ;;  %v4781_v52 = vpop.f32.mrb[63].mxu0  ;;  %4939 = vmatmul.mubr.msk.f32.gmra.mrb[168].mxu0 %vm275_vm1, %v101_v29 }
 0x15c   :  { %v1938_v55 = vadd.f32 %v1937_v50, %v872_v46  ;;  %v5164_v56 = vpop.f32.mrb[63].mxu1  ;;  %5322 = vmatmul.mubr.msk.f32.gmra.mrb[168].mxu1 %vm275_vm1, %v226_v44  ;;  %v2629_v57 = vsel %vm2538_vm2, %v6937_v49, -inf  ;;  %4941 = vmatprep.mubr.msk.f32.mxu0 %vm5964_vm0, %v9059_v8  ;;  %v230_v52 = vmul.f32 %v105_v36, %v105_v36 }
 0x15d   :  { %2630 = vmax.xlane.f32.xlu0 %v2629_v57  ;;  %5324 = vmatprep.mubr.msk.f32.mxu1 %vm5964_vm0, %v9059_v8 }
 0x15e   :  { %v877_v0 = vpop.f32.mrb[64].mxu0  ;;  %v6951_v2 = vadd.f32 %v6506_v63, %v1938_v55  ;;  %v106_v55 = vld [vmem:[%s9042_s0 + $0x2c8] sm:$0xff] }
 0x15f   :  { %v1942_v4 = vpop.f32.mrb[64].mxu1  ;;  %v4784_v9 = vpop.f32.mrb[65].mxu0  ;;  %4942 = vmatmul.mubr.msk.f32.gmra.mrb[170].mxu0 %vm275_vm1, %v102_v45 }
 0x160   :  { %v1943_v10 = vadd.f32 %v1942_v4, %v877_v0  ;;  %v5167_v11 = vpop.f32.mrb[65].mxu1  ;;  %5325 = vmatmul.mubr.msk.f32.gmra.mrb[170].mxu1 %vm275_vm1, %v227_v59  ;;  %v2632_v12 = vsel %vm2538_vm2, %v6951_v2, -inf  ;;  %4944 = vmatprep.mubr.msk.f32.mxu0 %vm5964_vm0, %v9059_v8 }
 0x161   :  { %2633 = vmax.xlane.f32.xlu1 %v2632_v12  ;;  %5327 = vmatprep.mubr.msk.f32.mxu1 %vm5964_vm0, %v9059_v8  ;;  %v107_v11 = vld [vmem:[%s9042_s0 + $0x2d0] sm:$0xff] }
 0x162   :  { %v882_v21 = vpop.f32.mrb[66].mxu0  ;;  %v6965_v22 = vadd.f32 %v6506_v63, %v1943_v10  ;;  %v231_v10 = vmul.f32 %v106_v55, %v106_v55 }
 0x163   :  { %v1947_v23 = vpop.f32.mrb[66].mxu1  ;;  %v4787_v25 = vpop.f32.mrb[67].mxu0  ;;  %4945 = vmatmul.mubr.msk.f32.gmra.mrb[172].mxu0 %vm275_vm1, %v103_v61 }
 0x164   :  { %v1948_v26 = vadd.f32 %v1947_v23, %v882_v21  ;;  %v5170_v29 = vpop.f32.mrb[67].mxu1  ;;  %5328 = vmatmul.mubr.msk.f32.gmra.mrb[172].mxu1 %vm275_vm1, %v228_v13  ;;  %v2635_v31 = vsel %vm2538_vm2, %v6965_v22, -inf  ;;  %4947 = vmatprep.mubr.msk.f32.mxu0 %vm5964_vm0, %v9059_v8 }
 0x165   :  { %2636 = vmax.xlane.f32.xlu0 %v2635_v31  ;;  %5330 = vmatprep.mubr.msk.f32.mxu1 %vm5964_vm0, %v9059_v8  ;;  %v232_v29 = vmul.f32 %v107_v11, %v107_v11 }
 0x166   :  { %v887_v37 = vpop.f32.mrb[68].mxu0  ;;  %v6979_v39 = vadd.f32 %v6506_v63, %v1948_v26 }
 0x167   :  { %v1952_v43 = vpop.f32.mrb[68].mxu1  ;;  %v4790_v44 = vpop.f32.mrb[69].mxu0  ;;  %4948 = vmatmul.mubr.msk.f32.gmra.mrb[174].mxu0 %vm275_vm1, %v104_v17 }
 0x168   :  { %v1953_v45 = vadd.f32 %v1952_v43, %v887_v37  ;;  %v5173_v46 = vpop.f32.mrb[69].mxu1  ;;  %5331 = vmatmul.mubr.msk.f32.gmra.mrb[174].mxu1 %vm275_vm1, %v229_v35  ;;  %v2638_v50 = vsel %vm2538_vm2, %v6979_v39, -inf  ;;  %4950 = vmatprep.mubr.msk.f32.mxu0 %vm5964_vm0, %v9059_v8 }
 0x169   :  { %2639 = vmax.xlane.f32.xlu1 %v2638_v50  ;;  %5333 = vmatprep.mubr.msk.f32.mxu1 %vm5964_vm0, %v9059_v8 }
 0x16a   :  { %v892_v56 = vpop.f32.mrb[70].mxu0  ;;  %v6993_v57 = vadd.f32 %v6506_v63, %v1953_v45 }
 0x16b   :  { %v1957_v59 = vpop.f32.mrb[70].mxu1  ;;  %v4793_v61 = vpop.f32.mrb[71].mxu0  ;;  %4951 = vmatmul.mubr.msk.f32.gmra.mrb[176].mxu0 %vm275_vm1, %v105_v36  ;;  %v7025_v36 = vld [vmem:[%s9043_s3] ss:$0 sm:$0xff] }
 0x16c   :  { %v1958_v0 = vadd.f32 %v1957_v59, %v892_v56  ;;  %v5176_v4 = vpop.f32.mrb[71].mxu1  ;;  %5334 = vmatmul.mubr.msk.f32.gmra.mrb[176].mxu1 %vm275_vm1, %v230_v52  ;;  %v2641_v9 = vsel %vm2538_vm2, %v6993_v57, -inf  ;;  %4953 = vmatprep.mubr.msk.f32.mxu0 %vm5964_vm0, %v9059_v8 }
 0x16d   :  { %2642 = vmax.xlane.f32.xlu0 %v2641_v9  ;;  %5336 = vmatprep.mubr.msk.f32.mxu1 %vm5964_vm0, %v9059_v8 }
 0x16e   :  { %v897_v12 = vpop.f32.mrb[72].mxu0  ;;  %v7007_v13 = vadd.f32 %v6506_v63, %v1958_v0  ;;  %v108_v63 = vld [vmem:[%s9042_s0 + $0x2d8] sm:$0xff] }
 0x16f   :  { %v1962_v17 = vpop.f32.mrb[72].mxu1  ;;  %v4796_v21 = vpop.f32.mrb[73].mxu0  ;;  %4954 = vmatmul.mubr.msk.f32.gmra.mrb[178].mxu0 %vm275_vm1, %v106_v55  ;;  %v233_v55 = vmul.f32 %v108_v63, %v108_v63 }
 0x170   :  { %v1963_v23 = vadd.f32 %v1962_v17, %v897_v12  ;;  %v5179_v25 = vpop.f32.mrb[73].mxu1  ;;  %5337 = vmatmul.mubr.msk.f32.gmra.mrb[178].mxu1 %vm275_vm1, %v231_v10  ;;  %v2644_v26 = vsel %vm2538_vm2, %v7007_v13, -inf  ;;  %4956 = vmatprep.mubr.msk.f32.mxu0 %vm5964_vm0, %v9059_v8 }
 0x171   :  { %2645 = vmax.xlane.f32.xlu1 %v2644_v26  ;;  %5339 = vmatprep.mubr.msk.f32.mxu1 %vm5964_vm0, %v9059_v8 }
 0x172   :  { %v7020_v31 = vpop.xlane.xlu0 %2540  ;;  %v902_v35 = vpop.f32.mrb[74].mxu0  ;;  %v7028_v37 = vadd.f32 %v7025_v36, %v1963_v23 }
 0x173   :  { %v2914_v43 = vsub.f32 %v6517_v5, %v7020_v31  ;;  %v1967_v44 = vpop.f32.mrb[74].mxu1  ;;  %v4799_v45 = vpop.f32.mrb[75].mxu0  ;;  %4957 = vmatmul.mubr.msk.f32.gmra.mrb[180].mxu0 %vm275_vm1, %v107_v11  ;;  %v109_v5 = vld [vmem:[%s9042_s0 + $0x2e0] sm:$0xff] }
 0x174   :  { %v1968_v46 = vadd.f32 %v1967_v44, %v902_v35  ;;  %v5182_v50 = vpop.f32.mrb[75].mxu1  ;;  %5340 = vmatmul.mubr.msk.f32.gmra.mrb[180].mxu1 %vm275_vm1, %v232_v29  ;;  %v2647_v52 = vsel %vm2538_vm2, %v7028_v37, -inf  ;;  %4959 = vmatprep.mubr.msk.f32.mxu0 %vm5964_vm0, %v9059_v8  ;;  %v234_v21 = vmul.f32 %v109_v5, %v109_v5 }
 0x175   :  { %v3039_v56 = vmul.f32 1.442695, %v2914_v43  ;;  %2648 = vmax.xlane.f32.xlu0 %v2647_v52  ;;  %5342 = vmatprep.mubr.msk.f32.mxu1 %vm5964_vm0, %v9059_v8 }
 0x176   :  { %v7043_v59 = vpop.xlane.xlu0 %2543  ;;  %v907_v61 = vpop.f32.mrb[76].mxu0  ;;  %v7046_v0 = vadd.f32 %v7025_v36, %v1968_v46 }
 0x177   :  { %5459 = vpow2.f32 %v3039_v56  ;;  %v2915_v4 = vsub.f32 %v6531_v15, %v7043_v59  ;;  %v1972_v9 = vpop.f32.mrb[76].mxu1  ;;  %v4802_v10 = vpop.f32.mrb[77].mxu0  ;;  %4960 = vmatmul.mubr.msk.f32.gmra.mrb[182].mxu0 %vm275_vm1, %v108_v63  ;;  %v110_v15 = vld [vmem:[%s9042_s0 + $0x2e8] sm:$0xff] }
 0x178   :  { %v1973_v11 = vadd.f32 %v1972_v9, %v907_v61  ;;  %v5185_v12 = vpop.f32.mrb[77].mxu1  ;;  %5343 = vmatmul.mubr.msk.f32.gmra.mrb[182].mxu1 %vm275_vm1, %v233_v55  ;;  %v2650_v17 = vsel %vm2538_vm2, %v7046_v0, -inf  ;;  %4962 = vmatprep.mubr.msk.f32.mxu0 %vm5964_vm0, %v9059_v8  ;;  %v235_v50 = vmul.f32 %v110_v15, %v110_v15 }
 0x179   :  { %v3041_v23 = vmul.f32 1.442695, %v2915_v4  ;;  %2651 = vmax.xlane.f32.xlu1 %v2650_v17  ;;  %5345 = vmatprep.mubr.msk.f32.mxu1 %vm5964_vm0, %v9059_v8 }
 0x17a   :  { %v7061_v25 = vpop.xlane.xlu1 %2546  ;;  %v912_v26 = vpop.f32.mrb[78].mxu0  ;;  %v7064_v29 = vadd.f32 %v7025_v36, %v1973_v11 }
 0x17b   :  { %5461 = vpow2.f32 %v3041_v23  ;;  %v2916_v63 = vsub.f32 %v6545_v24, %v7061_v25  ;;  %v1977_v35 = vpop.f32.mrb[78].mxu1  ;;  %v4805_v43 = vpop.f32.mrb[79].mxu0  ;;  %4963 = vmatmul.mubr.msk.f32.gmra.mrb[184].mxu0 %vm275_vm1, %v109_v5  ;;  %v111_v24 = vld [vmem:[%s9042_s0 + $0x2f0] sm:$0xff] }
 0x17c   :  { %v1978_v44 = vadd.f32 %v1977_v35, %v912_v26  ;;  %v5188_v45 = vpop.f32.mrb[79].mxu1  ;;  %5346 = vmatmul.mubr.msk.f32.gmra.mrb[184].mxu1 %vm275_vm1, %v234_v21  ;;  %v2653_v46 = vsel %vm2538_vm2, %v7064_v29, -inf  ;;  %4965 = vmatprep.mubr.msk.f32.mxu0 %vm5964_vm0, %v9059_v8  ;;  %v236_v17 = vmul.f32 %v111_v24, %v111_v24 }
 0x17d   :  { %v3043_v52 = vmul.f32 1.442695, %v2916_v63  ;;  %2654 = vmax.xlane.f32.xlu0 %v2653_v46  ;;  %5348 = vmatprep.mubr.msk.f32.mxu1 %vm5964_vm0, %v9059_v8 }
 0x17e   :  { %v7079_v55 = vpop.xlane.xlu1 %2549  ;;  %v917_v56 = vpop.f32.mrb[80].mxu0  ;;  %v7082_v5 = vadd.f32 %v7025_v36, %v1978_v44 }
 0x17f   :  { %5463 = vpow2.f32 %v3043_v52  ;;  %v2917_v61 = vsub.f32 %v6559_v33, %v7079_v55  ;;  %v1982_v4 = vpop.f32.mrb[80].mxu1  ;;  %v4808_v9 = vpop.f32.mrb[81].mxu0  ;;  %4966 = vmatmul.mubr.msk.f32.gmra.mrb[186].mxu0 %vm275_vm1, %v110_v15  ;;  %v112_v33 = vld [vmem:[%s9042_s0 + $0x2f8] sm:$0xff] }
 0x180   :  { %v1983_v10 = vadd.f32 %v1982_v4, %v917_v56  ;;  %v5191_v11 = vpop.f32.mrb[81].mxu1  ;;  %5349 = vmatmul.mubr.msk.f32.gmra.mrb[186].mxu1 %vm275_vm1, %v235_v50  ;;  %v2656_v12 = vsel %vm2538_vm2, %v7082_v5, -inf  ;;  %4968 = vmatprep.mubr.msk.f32.mxu0 %vm5964_vm0, %v9059_v8  ;;  %v237_v56 = vmul.f32 %v112_v33, %v112_v33 }
 0x181   :  { %v5460_v21 = vpop.eup %5459  ;;  %v3045_v23 = vmul.f32 1.442695, %v2917_v61  ;;  %2657 = vmax.xlane.f32.xlu1 %v2656_v12  ;;  %5351 = vmatprep.mubr.msk.f32.mxu1 %vm5964_vm0, %v9059_v8 }
 0x182   :  { %v7097_v15 = vpop.xlane.xlu0 %2552  ;;  %v922_v26 = vpop.f32.mrb[82].mxu0  ;;  %v7100_v63 = vadd.f32 %v7025_v36, %v1983_v10  ;;  %v3289_v50 = vsel %vm2538_vm2, %v5460_v21, 0.0 }
 0x183   :  { %5465 = vpow2.f32 %v3045_v23  ;;  %v2918_v35 = vsub.f32 %v6573_v42, %v7097_v15  ;;  %v1987_v43 = vpop.f32.mrb[82].mxu1  ;;  %v4811_v44 = vpop.f32.mrb[83].mxu0  ;;  %4969 = vmatmul.mubr.msk.f32.gmra.mrb[188].mxu0 %vm275_vm1, %v111_v24  ;;  %v113_v42 = vld [vmem:[%s9042_s0 + $0x300] sm:$0xff] }
 0x184   :  { %v1988_v45 = vadd.f32 %v1987_v43, %v922_v26  ;;  %v5194_v46 = vpop.f32.mrb[83].mxu1  ;;  %5352 = vmatmul.mubr.msk.f32.gmra.mrb[188].mxu1 %vm275_vm1, %v236_v17  ;;  %v2659_v52 = vsel %vm2538_vm2, %v7100_v63, -inf  ;;  %4971 = vmatprep.mubr.msk.f32.mxu0 %vm5964_vm0, %v9059_v8  ;;  %v238_v43 = vmul.f32 %v113_v42, %v113_v42 }
 0x185   :  { %v5462_v61 = vpop.eup %5461  ;;  %v3047_v4 = vmul.f32 1.442695, %v2918_v35  ;;  %3290 = vadd.xlane.f32.xlu1 %v3289_v50  ;;  %2660 = vmax.xlane.f32.xlu0 %v2659_v52 }
 0x186   :  { %v7114_v24 = vpop.xlane.xlu1 %2555  ;;  %v927_v9 = vpop.f32.mrb[84].mxu0  ;;  %5354 = vmatprep.mubr.msk.f32.mxu1 %vm5964_vm0, %v9059_v8  ;;  %v7119_v10 = vadd.f32 %v7025_v36, %v1988_v45  ;;  %v3292_v26 = vsel %vm2538_vm2, %v5462_v61, 0.0 }
 0x187   :  { %5467 = vpow2.f32 %v3047_v4  ;;  %v2919_v11 = vsub.f32 %v6587_v51, %v7114_v24  ;;  %v1992_v12 = vpop.f32.mrb[84].mxu1  ;;  %v4814_v17 = vpop.f32.mrb[85].mxu0  ;;  %4972 = vmatmul.mubr.msk.f32.gmra.mrb[190].mxu0 %vm275_vm1, %v112_v33  ;;  %v114_v51 = vld [vmem:[%s9042_s0 + $0x308] sm:$0xff] }
 0x188   :  { %v1993_v21 = vadd.f32 %v1992_v12, %v927_v9  ;;  %v5197_v23 = vpop.f32.mrb[85].mxu1  ;;  %5355 = vmatmul.mubr.msk.f32.gmra.mrb[190].mxu1 %vm275_vm1, %v237_v56  ;;  %v2662_v35 = vsel %vm2538_vm2, %v7119_v10, -inf  ;;  %4974 = vmatprep.mubr.msk.f32.mxu0 %vm5964_vm0, %v9059_v8  ;;  %v239_v17 = vmul.f32 %v114_v51, %v114_v51 }
 0x189   :  { %v5464_v44 = vpop.eup %5463  ;;  %v3049_v45 = vmul.f32 1.442695, %v2919_v11  ;;  %3293 = vadd.xlane.f32.xlu0 %v3292_v26  ;;  %2663 = vmax.xlane.f32.xlu1 %v2662_v35 }
 0x18a   :  { %v7133_v33 = vpop.xlane.xlu0 %2558  ;;  %v932_v46 = vpop.f32.mrb[86].mxu0  ;;  %5357 = vmatprep.mubr.msk.f32.mxu1 %vm5964_vm0, %v9059_v8  ;;  %v7138_v50 = vadd.f32 %v7025_v36, %v1993_v21  ;;  %v3295_v11 = vsel %vm2538_vm2, %v5464_v44, 0.0 }
 0x18b   :  { %5469 = vpow2.f32 %v3049_v45  ;;  %v2920_v52 = vsub.f32 %v6601_v60, %v7133_v33  ;;  %v1997_v56 = vpop.f32.mrb[86].mxu1  ;;  %v4817_v61 = vpop.f32.mrb[87].mxu0  ;;  %4975 = vmatmul.mubr.msk.f32.gmra.mrb[192].mxu0 %vm275_vm1, %v113_v42  ;;  %v115_v60 = vld [vmem:[%s9042_s0 + $0x310] sm:$0xff] }
 0x18c   :  { %v1998_v4 = vadd.f32 %v1997_v56, %v932_v46  ;;  %v5200_v9 = vpop.f32.mrb[87].mxu1  ;;  %5358 = vmatmul.mubr.msk.f32.gmra.mrb[192].mxu1 %vm275_vm1, %v238_v43  ;;  %v2665_v12 = vsel %vm2538_vm2, %v7138_v50, -inf  ;;  %4977 = vmatprep.mubr.msk.f32.mxu0 %vm5964_vm0, %v9059_v8 }
 0x18d   :  { %v5466_v21 = vpop.eup %5465  ;;  %v3051_v23 = vmul.f32 1.442695, %v2920_v52  ;;  %3296 = vadd.xlane.f32.xlu1 %v3295_v11  ;;  %2666 = vmax.xlane.f32.xlu0 %v2665_v12 }
 0x18e   :  { %v7152_v42 = vpop.xlane.xlu1 %2561  ;;  %v937_v26 = vpop.f32.mrb[88].mxu0  ;;  %5360 = vmatprep.mubr.msk.f32.mxu1 %vm5964_vm0, %v9059_v8  ;;  %v7157_v35 = vadd.f32 %v7025_v36, %v1998_v4  ;;  %v3298_v56 = vsel %vm2538_vm2, %v5466_v21, 0.0  ;;  %v240_v4 = vmul.f32 %v115_v60, %v115_v60 }
 0x18f   :  { %5471 = vpow2.f32 %v3051_v23  ;;  %v2921_v43 = vsub.f32 %v6615_v7, %v7152_v42  ;;  %v2002_v44 = vpop.f32.mrb[88].mxu1  ;;  %v4820_v45 = vpop.f32.mrb[89].mxu0  ;;  %4978 = vmatmul.mubr.msk.f32.gmra.mrb[194].mxu0 %vm275_vm1, %v114_v51  ;;  %v116_v7 = vld [vmem:[%s9042_s0 + $0x318] sm:$0xff] }
 0x190   :  { %v2003_v46 = vadd.f32 %v2002_v44, %v937_v26  ;;  %v5203_v52 = vpop.f32.mrb[89].mxu1  ;;  %5361 = vmatmul.mubr.msk.f32.gmra.mrb[194].mxu1 %vm275_vm1, %v239_v17  ;;  %v2668_v61 = vsel %vm2538_vm2, %v7157_v35, -inf  ;;  %4980 = vmatprep.mubr.msk.f32.mxu0 %vm5964_vm0, %v9059_v8 }
 0x191   :  { %v5468_v9 = vpop.eup %5467  ;;  %v3053_v11 = vmul.f32 1.442695, %v2921_v43  ;;  %3299 = vadd.xlane.f32.xlu0 %v3298_v56  ;;  %2669 = vmax.xlane.f32.xlu1 %v2668_v61 }
 0x192   :  { %v7171_v51 = vpop.xlane.xlu0 %2564  ;;  %v942_v12 = vpop.f32.mrb[90].mxu0  ;;  %5363 = vmatprep.mubr.msk.f32.mxu1 %vm5964_vm0, %v9059_v8  ;;  %v7176_v17 = vadd.f32 %v7025_v36, %v2003_v46  ;;  %v3301_v45 = vsel %vm2538_vm2, %v5468_v9, 0.0  ;;  %v241_v46 = vmul.f32 %v116_v7, %v116_v7 }
 0x193   :  { %5473 = vpow2.f32 %v3053_v11  ;;  %v2922_v21 = vsub.f32 %v6629_v18, %v7171_v51  ;;  %v2007_v23 = vpop.f32.mrb[90].mxu1  ;;  %v4823_v26 = vpop.f32.mrb[91].mxu0  ;;  %4981 = vmatmul.mubr.msk.f32.gmra.mrb[196].mxu0 %vm275_vm1, %v115_v60  ;;  %v117_v18 = vld [vmem:[%s9042_s0 + $0x320] sm:$0xff] }
 0x194   :  { %v2008_v43 = vadd.f32 %v2007_v23, %v942_v12  ;;  %v5206_v44 = vpop.f32.mrb[91].mxu1  ;;  %5364 = vmatmul.mubr.msk.f32.gmra.mrb[196].mxu1 %vm275_vm1, %v240_v4  ;;  %v2671_v52 = vsel %vm2538_vm2, %v7176_v17, -inf  ;;  %4983 = vmatprep.mubr.msk.f32.mxu0 %vm5964_vm0, %v9059_v8 }
 0x195   :  { %v5470_v56 = vpop.eup %5469  ;;  %v3055_v61 = vmul.f32 1.442695, %v2922_v21  ;;  %3302 = vadd.xlane.f32.xlu1 %v3301_v45  ;;  %2672 = vmax.xlane.f32.xlu0 %v2671_v52 }
 0x196   :  { %v7190_v60 = vpop.xlane.xlu1 %2567  ;;  %v947_v4 = vpop.f32.mrb[92].mxu0  ;;  %5366 = vmatprep.mubr.msk.f32.mxu1 %vm5964_vm0, %v9059_v8  ;;  %v7195_v9 = vadd.f32 %v7025_v36, %v2008_v43  ;;  %v3304_v44 = vsel %vm2538_vm2, %v5470_v56, 0.0  ;;  %v242_v43 = vmul.f32 %v117_v18, %v117_v18 }
 0x197   :  { %9117 = vst [vmem:[#allocation2_spill] sm:$0xff] %v7190_v60  ;;  %5475 = vpow2.f32 %v3055_v61  ;;  %v2923_v11 = vsub.f32 %v6643_v28, %v7190_v60  ;;  %v2012_v12 = vpop.f32.mrb[92].mxu1  ;;  %v4826_v21 = vpop.f32.mrb[93].mxu0  ;;  %4984 = vmatmul.mubr.msk.f32.gmra.mrb[198].mxu0 %vm275_vm1, %v116_v7  ;;  %v118_v28 = vld [vmem:[%s9042_s0 + $0x328] sm:$0xff] }
 0x198   :  { %v2013_v23 = vadd.f32 %v2012_v12, %v947_v4  ;;  %v5209_v26 = vpop.f32.mrb[93].mxu1  ;;  %5367 = vmatmul.mubr.msk.f32.gmra.mrb[198].mxu1 %vm275_vm1, %v241_v46  ;;  %v2674_v45 = vsel %vm2538_vm2, %v7195_v9, -inf  ;;  %4986 = vmatprep.mubr.msk.f32.mxu0 %vm5964_vm0, %v9059_v8 }
 0x199   :  { %v5472_v52 = vpop.eup %5471  ;;  %v3057_v61 = vmul.f32 1.442695, %v2923_v11  ;;  %3305 = vadd.xlane.f32.xlu0 %v3304_v44  ;;  %2675 = vmax.xlane.f32.xlu1 %v2674_v45 }
 0x19a   :  { %v7209_v7 = vpop.xlane.xlu0 %2570  ;;  %v952_v46 = vpop.f32.mrb[94].mxu0  ;;  %5369 = vmatprep.mubr.msk.f32.mxu1 %vm5964_vm0, %v9059_v8  ;;  %v7214_v56 = vadd.f32 %v7025_v36, %v2013_v23  ;;  %v3307_v44 = vsel %vm2538_vm2, %v5472_v52, 0.0  ;;  %v243_v23 = vmul.f32 %v118_v28, %v118_v28 }
 0x19b   :  { %9118 = vst [vmem:[#allocation3_spill] sm:$0xff] %v7209_v7  ;;  %5477 = vpow2.f32 %v3057_v61  ;;  %v2924_v4 = vsub.f32 %v6657_v38, %v7209_v7  ;;  %v2017_v11 = vpop.f32.mrb[94].mxu1  ;;  %v4829_v12 = vpop.f32.mrb[95].mxu0  ;;  %4987 = vmatmul.mubr.msk.f32.gmra.mrb[200].mxu0 %vm275_vm1, %v117_v18  ;;  %v119_v38 = vld [vmem:[%s9042_s0 + $0x330] sm:$0xff] }
 0x19c   :  { %v2018_v21 = vadd.f32 %v2017_v11, %v952_v46  ;;  %v5212_v26 = vpop.f32.mrb[95].mxu1  ;;  %5370 = vmatmul.mubr.msk.f32.gmra.mrb[200].mxu1 %vm275_vm1, %v242_v43  ;;  %v2677_v45 = vsel %vm2538_vm2, %v7214_v56, -inf  ;;  %4989 = vmatprep.mubr.msk.f32.mxu0 %vm5964_vm0, %v9059_v8 }
 0x19d   :  { %v5474_v61 = vpop.eup %5473  ;;  %v3059_v60 = vmul.f32 1.442695, %v2924_v4  ;;  %3308 = vadd.xlane.f32.xlu1 %v3307_v44  ;;  %2678 = vmax.xlane.f32.xlu0 %v2677_v45 }
 0x19e   :  { %v7228_v18 = vpop.xlane.xlu1 %2573  ;;  %v957_v43 = vpop.f32.mrb[96].mxu0  ;;  %5372 = vmatprep.mubr.msk.f32.mxu1 %vm5964_vm0, %v9059_v8  ;;  %v7233_v52 = vadd.f32 %v7025_v36, %v2018_v21  ;;  %v3310_v44 = vsel %vm2538_vm2, %v5474_v61, 0.0 }
 0x19f   :  { %9119 = vst [vmem:[#allocation4_spill] sm:$0xff] %v7228_v18  ;;  %5479 = vpow2.f32 %v3059_v60  ;;  %v2925_v46 = vsub.f32 %v6671_v48, %v7228_v18  ;;  %v2022_v4 = vpop.f32.mrb[96].mxu1  ;;  %v4832_v11 = vpop.f32.mrb[97].mxu0  ;;  %4990 = vmatmul.mubr.msk.f32.gmra.mrb[202].mxu0 %vm275_vm1, %v118_v28  ;;  %v244_v60 = vmul.f32 %v119_v38, %v119_v38  ;;  %v120_v48 = vld [vmem:[%s9042_s0 + $0x338] sm:$0xff] }
 0x1a0   :  { %v2023_v12 = vadd.f32 %v2022_v4, %v957_v43  ;;  %v5215_v26 = vpop.f32.mrb[97].mxu1  ;;  %5373 = vmatmul.mubr.msk.f32.gmra.mrb[202].mxu1 %vm275_vm1, %v243_v23  ;;  %v2680_v45 = vsel %vm2538_vm2, %v7233_v52, -inf  ;;  %4992 = vmatprep.mubr.msk.f32.mxu0 %vm5964_vm0, %v9059_v8 }
 0x1a1   :  { %v5476_v21 = vpop.eup %5475  ;;  %v3061_v7 = vmul.f32 1.442695, %v2925_v46  ;;  %3311 = vadd.xlane.f32.xlu0 %v3310_v44  ;;  %2681 = vmax.xlane.f32.xlu1 %v2680_v45 }
 0x1a2   :  { %v7247_v28 = vpop.xlane.xlu0 %2576  ;;  %v962_v23 = vpop.f32.mrb[98].mxu0  ;;  %5375 = vmatprep.mubr.msk.f32.mxu1 %vm5964_vm0, %v9059_v8  ;;  %v7252_v61 = vadd.f32 %v7025_v36, %v2023_v12  ;;  %v3313_v44 = vsel %vm2538_vm2, %v5476_v21, 0.0 }
 0x1a3   :  { %9120 = vst [vmem:[#allocation5_spill] sm:$0xff] %v7247_v28  ;;  %5481 = vpow2.f32 %v3061_v7  ;;  %v2926_v43 = vsub.f32 %v6685_v58, %v7247_v28  ;;  %v2027_v46 = vpop.f32.mrb[98].mxu1  ;;  %v4835_v4 = vpop.f32.mrb[99].mxu0  ;;  %4993 = vmatmul.mubr.msk.f32.gmra.mrb[204].mxu0 %vm275_vm1, %v119_v38  ;;  %v245_v7 = vmul.f32 %v120_v48, %v120_v48  ;;  %v121_v58 = vld [vmem:[%s9042_s0 + $0x340] sm:$0xff] }
 0x1a4   :  { %v2028_v11 = vadd.f32 %v2027_v46, %v962_v23  ;;  %v5218_v26 = vpop.f32.mrb[99].mxu1  ;;  %5376 = vmatmul.mubr.msk.f32.gmra.mrb[204].mxu1 %vm275_vm1, %v244_v60  ;;  %v2683_v45 = vsel %vm2538_vm2, %v7252_v61, -inf  ;;  %4995 = vmatprep.mubr.msk.f32.mxu0 %vm5964_vm0, %v9059_v8 }
 0x1a5   :  { %v5478_v12 = vpop.eup %5477  ;;  %v3063_v18 = vmul.f32 1.442695, %v2926_v43  ;;  %3314 = vadd.xlane.f32.xlu1 %v3313_v44  ;;  %2684 = vmax.xlane.f32.xlu0 %v2683_v45 }
 0x1a6   :  { %v7266_v38 = vpop.xlane.xlu1 %2579  ;;  %v967_v60 = vpop.f32.mrb[100].mxu0  ;;  %5378 = vmatprep.mubr.msk.f32.mxu1 %vm5964_vm0, %v9059_v8  ;;  %v7271_v21 = vadd.f32 %v7025_v36, %v2028_v11  ;;  %v3316_v44 = vsel %vm2538_vm2, %v5478_v12, 0.0 }
 0x1a7   :  { %9121 = vst [vmem:[#allocation6_spill] sm:$0xff] %v7266_v38  ;;  %5483 = vpow2.f32 %v3063_v18  ;;  %v2927_v23 = vsub.f32 %v6699_v6, %v7266_v38  ;;  %v2032_v43 = vpop.f32.mrb[100].mxu1  ;;  %v4838_v46 = vpop.f32.mrb[101].mxu0  ;;  %4996 = vmatmul.mubr.msk.f32.gmra.mrb[206].mxu0 %vm275_vm1, %v120_v48  ;;  %v246_v18 = vmul.f32 %v121_v58, %v121_v58  ;;  %v122_v6 = vld [vmem:[%s9042_s0 + $0x348] sm:$0xff] }
 0x1a8   :  { %v2033_v4 = vadd.f32 %v2032_v43, %v967_v60  ;;  %v5221_v26 = vpop.f32.mrb[101].mxu1  ;;  %5379 = vmatmul.mubr.msk.f32.gmra.mrb[206].mxu1 %vm275_vm1, %v245_v7  ;;  %v2686_v45 = vsel %vm2538_vm2, %v7271_v21, -inf  ;;  %4998 = vmatprep.mubr.msk.f32.mxu0 %vm5964_vm0, %v9059_v8 }
 0x1a9   :  { %v5480_v11 = vpop.eup %5479  ;;  %v3065_v28 = vmul.f32 1.442695, %v2927_v23  ;;  %3317 = vadd.xlane.f32.xlu0 %v3316_v44  ;;  %2687 = vmax.xlane.f32.xlu1 %v2686_v45 }
 0x1aa   :  { %v7285_v48 = vpop.xlane.xlu0 %2582  ;;  %v972_v7 = vpop.f32.mrb[102].mxu0  ;;  %5381 = vmatprep.mubr.msk.f32.mxu1 %vm5964_vm0, %v9059_v8  ;;  %v7290_v12 = vadd.f32 %v7025_v36, %v2033_v4  ;;  %v3319_v44 = vsel %vm2538_vm2, %v5480_v11, 0.0 }
 0x1ab   :  { %9122 = vst [vmem:[#allocation7_spill] sm:$0xff] %v7285_v48  ;;  %5485 = vpow2.f32 %v3065_v28  ;;  %v2928_v60 = vsub.f32 %v6713_v19, %v7285_v48  ;;  %v2037_v23 = vpop.f32.mrb[102].mxu1  ;;  %v4841_v43 = vpop.f32.mrb[103].mxu0  ;;  %4999 = vmatmul.mubr.msk.f32.gmra.mrb[208].mxu0 %vm275_vm1, %v121_v58  ;;  %v247_v28 = vmul.f32 %v122_v6, %v122_v6  ;;  %v123_v19 = vld [vmem:[%s9042_s0 + $0x350] sm:$0xff] }
 0x1ac   :  { %v2038_v46 = vadd.f32 %v2037_v23, %v972_v7  ;;  %v5224_v26 = vpop.f32.mrb[103].mxu1  ;;  %5382 = vmatmul.mubr.msk.f32.gmra.mrb[208].mxu1 %vm275_vm1, %v246_v18  ;;  %v2689_v45 = vsel %vm2538_vm2, %v7290_v12, -inf  ;;  %5001 = vmatprep.mubr.msk.f32.mxu0 %vm5964_vm0, %v9059_v8 }
 0x1ad   :  { %v5482_v4 = vpop.eup %5481  ;;  %v3067_v38 = vmul.f32 1.442695, %v2928_v60  ;;  %3320 = vadd.xlane.f32.xlu1 %v3319_v44  ;;  %2690 = vmax.xlane.f32.xlu0 %v2689_v45 }
 0x1ae   :  { %v7304_v58 = vpop.xlane.xlu1 %2585  ;;  %v977_v18 = vpop.f32.mrb[104].mxu0  ;;  %5384 = vmatprep.mubr.msk.f32.mxu1 %vm5964_vm0, %v9059_v8  ;;  %v7309_v11 = vadd.f32 %v7025_v36, %v2038_v46  ;;  %v3322_v44 = vsel %vm2538_vm2, %v5482_v4, 0.0 }
 0x1af   :  { %9123 = vst [vmem:[#allocation8_spill] sm:$0xff] %v7304_v58  ;;  %5487 = vpow2.f32 %v3067_v38  ;;  %v2929_v7 = vsub.f32 %v6727_v30, %v7304_v58  ;;  %v2042_v60 = vpop.f32.mrb[104].mxu1  ;;  %v4844_v23 = vpop.f32.mrb[105].mxu0  ;;  %5002 = vmatmul.mubr.msk.f32.gmra.mrb[210].mxu0 %vm275_vm1, %v122_v6  ;;  %v248_v38 = vmul.f32 %v123_v19, %v123_v19  ;;  %v124_v30 = vld [vmem:[%s9042_s0 + $0x358] sm:$0xff] }
 0x1b0   :  { %v2043_v43 = vadd.f32 %v2042_v60, %v977_v18  ;;  %v5227_v26 = vpop.f32.mrb[105].mxu1  ;;  %5385 = vmatmul.mubr.msk.f32.gmra.mrb[210].mxu1 %vm275_vm1, %v247_v28  ;;  %v2692_v45 = vsel %vm2538_vm2, %v7309_v11, -inf  ;;  %5004 = vmatprep.mubr.msk.f32.mxu0 %vm5964_vm0, %v9059_v8 }
 0x1b1   :  { %v5484_v46 = vpop.eup %5483  ;;  %v3069_v48 = vmul.f32 1.442695, %v2929_v7  ;;  %3323 = vadd.xlane.f32.xlu0 %v3322_v44  ;;  %2693 = vmax.xlane.f32.xlu1 %v2692_v45 }
 0x1b2   :  { %v7323_v6 = vpop.xlane.xlu0 %2588  ;;  %v982_v28 = vpop.f32.mrb[106].mxu0  ;;  %5387 = vmatprep.mubr.msk.f32.mxu1 %vm5964_vm0, %v9059_v8  ;;  %v7328_v4 = vadd.f32 %v7025_v36, %v2043_v43  ;;  %v3325_v44 = vsel %vm2538_vm2, %v5484_v46, 0.0 }
 0x1b3   :  { %9124 = vst [vmem:[#allocation9_spill] sm:$0xff] %v7323_v6  ;;  %5489 = vpow2.f32 %v3069_v48  ;;  %v2930_v18 = vsub.f32 %v6741_v41, %v7323_v6  ;;  %v2047_v7 = vpop.f32.mrb[106].mxu1  ;;  %v4847_v60 = vpop.f32.mrb[107].mxu0  ;;  %5005 = vmatmul.mubr.msk.f32.gmra.mrb[212].mxu0 %vm275_vm1, %v123_v19  ;;  %v249_v48 = vmul.f32 %v124_v30, %v124_v30  ;;  %v125_v41 = vld [vmem:[%s9042_s0 + $0x360] sm:$0xff] }
 0x1b4   :  { %v2048_v23 = vadd.f32 %v2047_v7, %v982_v28  ;;  %v5230_v26 = vpop.f32.mrb[107].mxu1  ;;  %5388 = vmatmul.mubr.msk.f32.gmra.mrb[212].mxu1 %vm275_vm1, %v248_v38  ;;  %v2695_v45 = vsel %vm2538_vm2, %v7328_v4, -inf  ;;  %5007 = vmatprep.mubr.msk.f32.mxu0 %vm5964_vm0, %v9059_v8 }
 0x1b5   :  { %v5486_v43 = vpop.eup %5485  ;;  %v3071_v58 = vmul.f32 1.442695, %v2930_v18  ;;  %3326 = vadd.xlane.f32.xlu1 %v3325_v44  ;;  %2696 = vmax.xlane.f32.xlu0 %v2695_v45 }
 0x1b6   :  { %v7342_v19 = vpop.xlane.xlu1 %2591  ;;  %v987_v38 = vpop.f32.mrb[108].mxu0  ;;  %5390 = vmatprep.mubr.msk.f32.mxu1 %vm5964_vm0, %v9059_v8  ;;  %v7347_v46 = vadd.f32 %v7025_v36, %v2048_v23  ;;  %v3328_v44 = vsel %vm2538_vm2, %v5486_v43, 0.0 }
 0x1b7   :  { %9125 = vst [vmem:[#allocation10_spill] sm:$0xff] %v7342_v19  ;;  %5491 = vpow2.f32 %v3071_v58  ;;  %v2931_v28 = vsub.f32 %v6755_v53, %v7342_v19  ;;  %v2052_v18 = vpop.f32.mrb[108].mxu1  ;;  %v4850_v7 = vpop.f32.mrb[109].mxu0  ;;  %5008 = vmatmul.mubr.msk.f32.gmra.mrb[214].mxu0 %vm275_vm1, %v124_v30  ;;  %v250_v58 = vmul.f32 %v125_v41, %v125_v41  ;;  %v126_v53 = vld [vmem:[%s9042_s0 + $0x368] sm:$0xff] }
 0x1b8   :  { %v2053_v60 = vadd.f32 %v2052_v18, %v987_v38  ;;  %v5233_v26 = vpop.f32.mrb[109].mxu1  ;;  %5391 = vmatmul.mubr.msk.f32.gmra.mrb[214].mxu1 %vm275_vm1, %v249_v48  ;;  %v2698_v45 = vsel %vm2538_vm2, %v7347_v46, -inf  ;;  %5010 = vmatprep.mubr.msk.f32.mxu0 %vm5964_vm0, %v9059_v8 }
 0x1b9   :  { %v5488_v23 = vpop.eup %5487  ;;  %v3073_v6 = vmul.f32 1.442695, %v2931_v28  ;;  %3329 = vadd.xlane.f32.xlu0 %v3328_v44  ;;  %2699 = vmax.xlane.f32.xlu1 %v2698_v45 }
 0x1ba   :  { %v7361_v30 = vpop.xlane.xlu0 %2594  ;;  %v992_v48 = vpop.f32.mrb[110].mxu0  ;;  %5393 = vmatprep.mubr.msk.f32.mxu1 %vm5964_vm0, %v9059_v8  ;;  %v7366_v43 = vadd.f32 %v7025_v36, %v2053_v60  ;;  %v3331_v44 = vsel %vm2538_vm2, %v5488_v23, 0.0 }
 0x1bb   :  { %9126 = vst [vmem:[#allocation11_spill] sm:$0xff] %v7361_v30  ;;  %5493 = vpow2.f32 %v3073_v6  ;;  %v2932_v38 = vsub.f32 %v6769_v1, %v7361_v30  ;;  %v2057_v28 = vpop.f32.mrb[110].mxu1  ;;  %v4853_v18 = vpop.f32.mrb[111].mxu0  ;;  %5011 = vmatmul.mubr.msk.f32.gmra.mrb[216].mxu0 %vm275_vm1, %v125_v41  ;;  %v251_v6 = vmul.f32 %v126_v53, %v126_v53  ;;  %v127_v1 = vld [vmem:[%s9042_s0 + $0x370] sm:$0xff] }
 0x1bc   :  { %v2058_v7 = vadd.f32 %v2057_v28, %v992_v48  ;;  %v5236_v26 = vpop.f32.mrb[111].mxu1  ;;  %5394 = vmatmul.mubr.msk.f32.gmra.mrb[216].mxu1 %vm275_vm1, %v250_v58  ;;  %v2701_v45 = vsel %vm2538_vm2, %v7366_v43, -inf  ;;  %5013 = vmatprep.mubr.msk.f32.mxu0 %vm5964_vm0, %v9059_v8 }
 0x1bd   :  { %v5490_v60 = vpop.eup %5489  ;;  %v3075_v19 = vmul.f32 1.442695, %v2932_v38  ;;  %3332 = vadd.xlane.f32.xlu1 %v3331_v44  ;;  %2702 = vmax.xlane.f32.xlu0 %v2701_v45 }
 0x1be   :  { %v7380_v41 = vpop.xlane.xlu1 %2597  ;;  %v997_v58 = vpop.f32.mrb[112].mxu0  ;;  %5396 = vmatprep.mubr.msk.f32.mxu1 %vm5964_vm0, %v9059_v8  ;;  %v7385_v23 = vadd.f32 %v7025_v36, %v2058_v7  ;;  %v3334_v44 = vsel %vm2538_vm2, %v5490_v60, 0.0 }
 0x1bf   :  { %9127 = vst [vmem:[#allocation12_spill] sm:$0xff] %v7380_v41  ;;  %5495 = vpow2.f32 %v3075_v19  ;;  %v2933_v48 = vsub.f32 %v6783_v14, %v7380_v41  ;;  %v2062_v38 = vpop.f32.mrb[112].mxu1  ;;  %v4856_v28 = vpop.f32.mrb[113].mxu0  ;;  %5014 = vmatmul.mubr.msk.f32.gmra.mrb[218].mxu0 %vm275_vm1, %v126_v53  ;;  %v252_v19 = vmul.f32 %v127_v1, %v127_v1  ;;  %v128_v14 = vld [vmem:[%s9042_s0 + $0x378] sm:$0xff] }
 0x1c0   :  { %v2063_v18 = vadd.f32 %v2062_v38, %v997_v58  ;;  %v5239_v26 = vpop.f32.mrb[113].mxu1  ;;  %5397 = vmatmul.mubr.msk.f32.gmra.mrb[218].mxu1 %vm275_vm1, %v251_v6  ;;  %v2704_v45 = vsel %vm2538_vm2, %v7385_v23, -inf  ;;  %5016 = vmatprep.mubr.msk.f32.mxu0 %vm5964_vm0, %v9059_v8 }
 0x1c1   :  { %v5492_v7 = vpop.eup %5491  ;;  %v3077_v30 = vmul.f32 1.442695, %v2933_v48  ;;  %3335 = vadd.xlane.f32.xlu0 %v3334_v44  ;;  %2705 = vmax.xlane.f32.xlu1 %v2704_v45 }
 0x1c2   :  { %v7399_v53 = vpop.xlane.xlu0 %2600  ;;  %v1002_v6 = vpop.f32.mrb[114].mxu0  ;;  %5399 = vmatprep.mubr.msk.f32.mxu1 %vm5964_vm0, %v9059_v8  ;;  %v7404_v60 = vadd.f32 %v7025_v36, %v2063_v18  ;;  %v3337_v44 = vsel %vm2538_vm2, %v5492_v7, 0.0 }
 0x1c3   :  { %9128 = vst [vmem:[#allocation13_spill] sm:$0xff] %v7399_v53  ;;  %5497 = vpow2.f32 %v3077_v30  ;;  %v2934_v58 = vsub.f32 %v6797_v27, %v7399_v53  ;;  %v2067_v48 = vpop.f32.mrb[114].mxu1  ;;  %v4859_v38 = vpop.f32.mrb[115].mxu0  ;;  %5017 = vmatmul.mubr.msk.f32.gmra.mrb[220].mxu0 %vm275_vm1, %v127_v1  ;;  %v253_v30 = vmul.f32 %v128_v14, %v128_v14  ;;  %v129_v27 = vld [vmem:[%s9042_s0 + $0x380] sm:$0xff] }
 0x1c4   :  { %v2068_v28 = vadd.f32 %v2067_v48, %v1002_v6  ;;  %v5242_v26 = vpop.f32.mrb[115].mxu1  ;;  %5400 = vmatmul.mubr.msk.f32.gmra.mrb[220].mxu1 %vm275_vm1, %v252_v19  ;;  %v2707_v45 = vsel %vm2538_vm2, %v7404_v60, -inf  ;;  %5019 = vmatprep.mubr.msk.f32.mxu0 %vm5964_vm0, %v9059_v8 }
 0x1c5   :  { %v5494_v18 = vpop.eup %5493  ;;  %v3079_v41 = vmul.f32 1.442695, %v2934_v58  ;;  %3338 = vadd.xlane.f32.xlu1 %v3337_v44  ;;  %2708 = vmax.xlane.f32.xlu0 %v2707_v45 }
 0x1c6   :  { %v7418_v1 = vpop.xlane.xlu1 %2603  ;;  %v1007_v19 = vpop.f32.mrb[116].mxu0  ;;  %5402 = vmatprep.mubr.msk.f32.mxu1 %vm5964_vm0, %v9059_v8  ;;  %v7423_v7 = vadd.f32 %v7025_v36, %v2068_v28  ;;  %v3340_v44 = vsel %vm2538_vm2, %v5494_v18, 0.0 }
 0x1c7   :  { %9129 = vst [vmem:[#allocation14_spill] sm:$0xff] %v7418_v1  ;;  %5499 = vpow2.f32 %v3079_v41  ;;  %v2935_v6 = vsub.f32 %v6811_v40, %v7418_v1  ;;  %v2072_v58 = vpop.f32.mrb[116].mxu1  ;;  %v4862_v48 = vpop.f32.mrb[117].mxu0  ;;  %5020 = vmatmul.mubr.msk.f32.gmra.mrb[222].mxu0 %vm275_vm1, %v128_v14  ;;  %v254_v41 = vmul.f32 %v129_v27, %v129_v27  ;;  %v130_v40 = vld [vmem:[%s9042_s0 + $0x388] sm:$0xff] }
 0x1c8   :  { %v2073_v38 = vadd.f32 %v2072_v58, %v1007_v19  ;;  %v5245_v26 = vpop.f32.mrb[117].mxu1  ;;  %5403 = vmatmul.mubr.msk.f32.gmra.mrb[222].mxu1 %vm275_vm1, %v253_v30  ;;  %v2710_v45 = vsel %vm2538_vm2, %v7423_v7, -inf  ;;  %5022 = vmatprep.mubr.msk.f32.mxu0 %vm5964_vm0, %v9059_v8 }
 0x1c9   :  { %v5496_v28 = vpop.eup %5495  ;;  %v3081_v53 = vmul.f32 1.442695, %v2935_v6  ;;  %3341 = vadd.xlane.f32.xlu0 %v3340_v44  ;;  %2711 = vmax.xlane.f32.xlu1 %v2710_v45 }
 0x1ca   :  { %v7437_v14 = vpop.xlane.xlu0 %2606  ;;  %v1012_v30 = vpop.f32.mrb[118].mxu0  ;;  %5405 = vmatprep.mubr.msk.f32.mxu1 %vm5964_vm0, %v9059_v8  ;;  %v7442_v18 = vadd.f32 %v7025_v36, %v2073_v38  ;;  %v3343_v44 = vsel %vm2538_vm2, %v5496_v28, 0.0 }
 0x1cb   :  { %9130 = vst [vmem:[#allocation15_spill] sm:$0xff] %v7437_v14  ;;  %5501 = vpow2.f32 %v3081_v53  ;;  %v2936_v19 = vsub.f32 %v6825_v54, %v7437_v14  ;;  %v2077_v6 = vpop.f32.mrb[118].mxu1  ;;  %v4865_v58 = vpop.f32.mrb[119].mxu0  ;;  %5023 = vmatmul.mubr.msk.f32.gmra.mrb[224].mxu0 %vm275_vm1, %v129_v27  ;;  %v255_v53 = vmul.f32 %v130_v40, %v130_v40  ;;  %v131_v54 = vld [vmem:[%s9042_s0 + $0x390] sm:$0xff] }
 0x1cc   :  { %v2078_v48 = vadd.f32 %v2077_v6, %v1012_v30  ;;  %v5248_v26 = vpop.f32.mrb[119].mxu1  ;;  %5406 = vmatmul.mubr.msk.f32.gmra.mrb[224].mxu1 %vm275_vm1, %v254_v41  ;;  %v2713_v45 = vsel %vm2538_vm2, %v7442_v18, -inf  ;;  %5025 = vmatprep.mubr.msk.f32.mxu0 %vm5964_vm0, %v9059_v8 }
 0x1cd   :  { %v5498_v38 = vpop.eup %5497  ;;  %v3083_v1 = vmul.f32 1.442695, %v2936_v19  ;;  %3344 = vadd.xlane.f32.xlu1 %v3343_v44  ;;  %2714 = vmax.xlane.f32.xlu0 %v2713_v45 }
 0x1ce   :  { %v7456_v27 = vpop.xlane.xlu1 %2609  ;;  %v1017_v41 = vpop.f32.mrb[120].mxu0  ;;  %5408 = vmatprep.mubr.msk.f32.mxu1 %vm5964_vm0, %v9059_v8  ;;  %v7461_v28 = vadd.f32 %v7025_v36, %v2078_v48  ;;  %v3346_v44 = vsel %vm2538_vm2, %v5498_v38, 0.0 }
 0x1cf   :  { %9131 = vst [vmem:[#allocation16_spill] sm:$0xff] %v7456_v27  ;;  %5503 = vpow2.f32 %v3083_v1  ;;  %v2937_v30 = vsub.f32 %v6839_v3, %v7456_v27  ;;  %v2082_v19 = vpop.f32.mrb[120].mxu1  ;;  %v4868_v6 = vpop.f32.mrb[121].mxu0  ;;  %5026 = vmatmul.mubr.msk.f32.gmra.mrb[226].mxu0 %vm275_vm1, %v130_v40  ;;  %v256_v1 = vmul.f32 %v131_v54, %v131_v54  ;;  %v132_v3 = vld [vmem:[%s9042_s0 + $0x398] sm:$0xff] }
 0x1d0   :  { %v2083_v58 = vadd.f32 %v2082_v19, %v1017_v41  ;;  %v5251_v26 = vpop.f32.mrb[121].mxu1  ;;  %5409 = vmatmul.mubr.msk.f32.gmra.mrb[226].mxu1 %vm275_vm1, %v255_v53  ;;  %v2716_v45 = vsel %vm2538_vm2, %v7461_v28, -inf  ;;  %5028 = vmatprep.mubr.msk.f32.mxu0 %vm5964_vm0, %v9059_v8 }
 0x1d1   :  { %v5500_v48 = vpop.eup %5499  ;;  %v3085_v14 = vmul.f32 1.442695, %v2937_v30  ;;  %3347 = vadd.xlane.f32.xlu0 %v3346_v44  ;;  %2717 = vmax.xlane.f32.xlu1 %v2716_v45 }
 0x1d2   :  { %v7475_v40 = vpop.xlane.xlu0 %2612  ;;  %v1022_v53 = vpop.f32.mrb[122].mxu0  ;;  %5411 = vmatprep.mubr.msk.f32.mxu1 %vm5964_vm0, %v9059_v8  ;;  %v7480_v38 = vadd.f32 %v7025_v36, %v2083_v58  ;;  %v3349_v44 = vsel %vm2538_vm2, %v5500_v48, 0.0  ;;  %v257_v36 = vmul.f32 %v132_v3, %v132_v3  ;;  %v7501_v48 = vld [vmem:[%s9043_s3] ss:$0 sm:$0xff] }
 0x1d3   :  { %9132 = vst [vmem:[#allocation17_spill] sm:$0xff] %v7475_v40  ;;  %5505 = vpow2.f32 %v3085_v14  ;;  %v2938_v41 = vsub.f32 %v6853_v20, %v7475_v40  ;;  %v2087_v30 = vpop.f32.mrb[122].mxu1  ;;  %v4871_v19 = vpop.f32.mrb[123].mxu0  ;;  %5029 = vmatmul.mubr.msk.f32.gmra.mrb[228].mxu0 %vm275_vm1, %v131_v54  ;;  %v133_v20 = vld [vmem:[%s9042_s0 + $0x3a0] sm:$0xff]  ;;  %v9134_v40 = vmov 0.0  }
 0x1d4   :  { %v2088_v6 = vadd.f32 %v2087_v30, %v1022_v53  ;;  %v5254_v26 = vpop.f32.mrb[123].mxu1  ;;  %5412 = vmatmul.mubr.msk.f32.gmra.mrb[228].mxu1 %vm275_vm1, %v256_v1  ;;  %v2719_v45 = vsel %vm2538_vm2, %v7480_v38, -inf  ;;  %5031 = vmatprep.mubr.msk.f32.mxu0 %vm5964_vm0, %v9059_v8 }
 0x1d5   :  { %v5502_v14 = vpop.eup %5501  ;;  %v3087_v58 = vmul.f32 1.442695, %v2938_v41  ;;  %3350 = vadd.xlane.f32.xlu1 %v3349_v44  ;;  %2720 = vmax.xlane.f32.xlu0 %v2719_v45 }
 0x1d6   :  { %v7494_v54 = vpop.xlane.xlu1 %2615  ;;  %v1027_v1 = vpop.f32.mrb[124].mxu0  ;;  %5414 = vmatprep.mubr.msk.f32.mxu1 %vm5964_vm0, %v9059_v8  ;;  %v7504_v53 = vadd.f32 %v7501_v48, %v2088_v6  ;;  %v3352_v45 = vsel %vm2538_vm2, %v5502_v14, 0.0  ;;  %v258_v6 = vmul.f32 %v133_v20, %v133_v20 }
 0x1d7   :  { %9133 = vst [vmem:[#allocation18_spill] sm:$0xff] %v7494_v54  ;;  %5507 = vpow2.f32 %v3087_v58  ;;  %v2939_v41 = vsub.f32 %v6867_v34, %v7494_v54  ;;  %v2092_v30 = vpop.f32.mrb[124].mxu1  ;;  %v4874_v19 = vpop.f32.mrb[125].mxu0  ;;  %5032 = vmatmul.mubr.msk.f32.gmra.mrb[230].mxu0 %vm275_vm1, %v132_v3  ;;  %v134_v34 = vld [vmem:[%s9042_s0 + $0x3a8] sm:$0xff] }
 0x1d8   :  { %v2093_v26 = vadd.f32 %v2092_v30, %v1027_v1  ;;  %v5257_v44 = vpop.f32.mrb[125].mxu1  ;;  %5415 = vmatmul.mubr.msk.f32.gmra.mrb[230].mxu1 %vm275_vm1, %v257_v36  ;;  %v2722_v8 = vsel %vm2538_vm2, %v7504_v53, -inf  ;;  %5034 = vmatprep.mubr.msk.f32.mxu0 %vm5964_vm0, %v9134_v40 }
 0x1d9   :  { %v5504_v58 = vpop.eup %5503  ;;  %v3089_v27 = vmul.f32 1.442695, %v2939_v41  ;;  %3353 = vadd.xlane.f32.xlu0 %v3352_v45  ;;  %2723 = vmax.xlane.f32.xlu1 %v2722_v8 }
 0x1da   :  { %v7518_v3 = vpop.xlane.xlu0 %2618  ;;  %v1032_v36 = vpop.f32.mrb[126].mxu0  ;;  %5417 = vmatprep.mubr.msk.f32.mxu1 %vm5964_vm0, %v9134_v40  ;;  %v7523_v14 = vadd.f32 %v7501_v48, %v2093_v26  ;;  %v3355_v44 = vsel %vm2538_vm2, %v5504_v58, 0.0 }
 0x1db   :  { %9135 = vst [vmem:[#allocation19_spill] sm:$0xff] %v7518_v3  ;;  %5509 = vpow2.f32 %v3089_v27  ;;  %v2940_v1 = vsub.f32 %v6881_v47, %v7518_v3  ;;  %v2097_v41 = vpop.f32.mrb[126].mxu1  ;;  %v4877_v30 = vpop.f32.mrb[127].mxu0  ;;  %5035 = vmatmul.mubr.msk.f32.gmra.mrb[232].mxu0 %vm275_vm1, %v133_v20  ;;  %v259_v27 = vmul.f32 %v134_v34, %v134_v34  ;;  %v135_v47 = vld [vmem:[%s9042_s0 + $0x3b0] sm:$0xff] }
 0x1dc   :  { %v2098_v8 = vadd.f32 %v2097_v41, %v1032_v36  ;;  %v5260_v19 = vpop.f32.mrb[127].mxu1  ;;  %5418 = vmatmul.mubr.msk.f32.gmra.mrb[232].mxu1 %vm275_vm1, %v258_v6  ;;  %v2725_v45 = vsel %vm2538_vm2, %v7523_v14, -inf  ;;  %5037 = vmatprep.mubr.msk.f32.mxu0 %vm5964_vm0, %v9134_v40 }
 0x1dd   :  { %v5506_v26 = vpop.eup %5505  ;;  %v3091_v54 = vmul.f32 1.442695, %v2940_v1  ;;  %3356 = vadd.xlane.f32.xlu1 %v3355_v44  ;;  %2726 = vmax.xlane.f32.xlu0 %v2725_v45 }
 0x1de   :  { %v7537_v20 = vpop.xlane.xlu1 %2621  ;;  %v1037_v6 = vpop.f32.mrb[128].mxu0  ;;  %5420 = vmatprep.mubr.msk.f32.mxu1 %vm5964_vm0, %v9134_v40  ;;  %v7542_v58 = vadd.f32 %v7501_v48, %v2098_v8  ;;  %v3358_v44 = vsel %vm2538_vm2, %v5506_v26, 0.0 }
 0x1df   :  { %9136 = vst [vmem:[#allocation20_spill] sm:$0xff] %v7537_v20  ;;  %5511 = vpow2.f32 %v3091_v54  ;;  %v2941_v36 = vsub.f32 %v6895_v62, %v7537_v20  ;;  %v2102_v1 = vpop.f32.mrb[128].mxu1  ;;  %v4880_v41 = vpop.f32.mrb[129].mxu0  ;;  %5038 = vmatmul.mubr.msk.f32.gmra.mrb[234].mxu0 %vm275_vm1, %v134_v34  ;;  %v260_v54 = vmul.f32 %v135_v47, %v135_v47  ;;  %v136_v62 = vld [vmem:[%s9042_s0 + $0x3b8] sm:$0xff] }
 0x1e0   :  { %v2103_v30 = vadd.f32 %v2102_v1, %v1037_v6  ;;  %v5263_v19 = vpop.f32.mrb[129].mxu1  ;;  %5421 = vmatmul.mubr.msk.f32.gmra.mrb[234].mxu1 %vm275_vm1, %v259_v27  ;;  %v2728_v45 = vsel %vm2538_vm2, %v7542_v58, -inf  ;;  %5040 = vmatprep.mubr.msk.f32.mxu0 %vm5964_vm0, %v9134_v40 }
 0x1e1   :  { %v5508_v8 = vpop.eup %5507  ;;  %v3093_v3 = vmul.f32 1.442695, %v2941_v36  ;;  %3359 = vadd.xlane.f32.xlu0 %v3358_v44  ;;  %2729 = vmax.xlane.f32.xlu1 %v2728_v45 }
 0x1e2   :  { %v7556_v34 = vpop.xlane.xlu0 %2624  ;;  %v1042_v27 = vpop.f32.mrb[130].mxu0  ;;  %5423 = vmatprep.mubr.msk.f32.mxu1 %vm5964_vm0, %v9134_v40  ;;  %v7561_v26 = vadd.f32 %v7501_v48, %v2103_v30  ;;  %v3361_v44 = vsel %vm2538_vm2, %v5508_v8, 0.0 }
 0x1e3   :  { %9137 = vst [vmem:[#allocation21_spill] sm:$0xff] %v7556_v34  ;;  %5513 = vpow2.f32 %v3093_v3  ;;  %v2942_v6 = vsub.f32 %v6909_v16, %v7556_v34  ;;  %v2107_v36 = vpop.f32.mrb[130].mxu1  ;;  %v4883_v1 = vpop.f32.mrb[131].mxu0  ;;  %5041 = vmatmul.mubr.msk.f32.gmra.mrb[236].mxu0 %vm275_vm1, %v135_v47  ;;  %v261_v3 = vmul.f32 %v136_v62, %v136_v62  ;;  %v137_v16 = vld [vmem:[%s9042_s0 + $0x3c0] sm:$0xff] }
 0x1e4   :  { %v2108_v41 = vadd.f32 %v2107_v36, %v1042_v27  ;;  %v5266_v19 = vpop.f32.mrb[131].mxu1  ;;  %5424 = vmatmul.mubr.msk.f32.gmra.mrb[236].mxu1 %vm275_vm1, %v260_v54  ;;  %v2731_v45 = vsel %vm2538_vm2, %v7561_v26, -inf  ;;  %5043 = vmatprep.mubr.msk.f32.mxu0 %vm5964_vm0, %v9134_v40 }
 0x1e5   :  { %v5510_v30 = vpop.eup %5509  ;;  %v3095_v20 = vmul.f32 1.442695, %v2942_v6  ;;  %3362 = vadd.xlane.f32.xlu1 %v3361_v44  ;;  %2732 = vmax.xlane.f32.xlu0 %v2731_v45 }
 0x1e6   :  { %v7575_v47 = vpop.xlane.xlu1 %2627  ;;  %v1047_v54 = vpop.f32.mrb[132].mxu0  ;;  %5426 = vmatprep.mubr.msk.f32.mxu1 %vm5964_vm0, %v9134_v40  ;;  %v7580_v8 = vadd.f32 %v7501_v48, %v2108_v41  ;;  %v3364_v44 = vsel %vm2538_vm2, %v5510_v30, 0.0 }
 0x1e7   :  { %9138 = vst [vmem:[#allocation22_spill] sm:$0xff] %v7575_v47  ;;  %5515 = vpow2.f32 %v3095_v20  ;;  %v2943_v27 = vsub.f32 %v6923_v32, %v7575_v47  ;;  %v2112_v6 = vpop.f32.mrb[132].mxu1  ;;  %v4886_v36 = vpop.f32.mrb[133].mxu0  ;;  %5044 = vmatmul.mubr.msk.f32.gmra.mrb[238].mxu0 %vm275_vm1, %v136_v62  ;;  %v262_v20 = vmul.f32 %v137_v16, %v137_v16  ;;  %v138_v32 = vld [vmem:[%s9042_s0 + $0x3c8] sm:$0xff] }
 0x1e8   :  { %v2113_v1 = vadd.f32 %v2112_v6, %v1047_v54  ;;  %v5269_v19 = vpop.f32.mrb[133].mxu1  ;;  %5427 = vmatmul.mubr.msk.f32.gmra.mrb[238].mxu1 %vm275_vm1, %v261_v3  ;;  %v2734_v45 = vsel %vm2538_vm2, %v7580_v8, -inf  ;;  %5046 = vmatprep.mubr.msk.f32.mxu0 %vm5964_vm0, %v9134_v40 }
 0x1e9   :  { %v5512_v41 = vpop.eup %5511  ;;  %v3097_v34 = vmul.f32 1.442695, %v2943_v27  ;;  %3365 = vadd.xlane.f32.xlu0 %v3364_v44  ;;  %2735 = vmax.xlane.f32.xlu1 %v2734_v45 }
 0x1ea   :  { %v7594_v62 = vpop.xlane.xlu0 %2630  ;;  %v1052_v3 = vpop.f32.mrb[134].mxu0  ;;  %5429 = vmatprep.mubr.msk.f32.mxu1 %vm5964_vm0, %v9134_v40  ;;  %v7599_v30 = vadd.f32 %v7501_v48, %v2113_v1  ;;  %v3367_v44 = vsel %vm2538_vm2, %v5512_v41, 0.0 }
 0x1eb   :  { %9139 = vst [vmem:[#allocation23_spill] sm:$0xff] %v7594_v62  ;;  %5517 = vpow2.f32 %v3097_v34  ;;  %v2944_v54 = vsub.f32 %v6937_v49, %v7594_v62  ;;  %v2117_v27 = vpop.f32.mrb[134].mxu1  ;;  %v4889_v6 = vpop.f32.mrb[135].mxu0  ;;  %5047 = vmatmul.mubr.msk.f32.gmra.mrb[240].mxu0 %vm275_vm1, %v137_v16  ;;  %v263_v34 = vmul.f32 %v138_v32, %v138_v32  ;;  %v139_v49 = vld [vmem:[%s9042_s0 + $0x3d0] sm:$0xff] }
 0x1ec   :  { %v2118_v36 = vadd.f32 %v2117_v27, %v1052_v3  ;;  %v5272_v19 = vpop.f32.mrb[135].mxu1  ;;  %5430 = vmatmul.mubr.msk.f32.gmra.mrb[240].mxu1 %vm275_vm1, %v262_v20  ;;  %v2737_v45 = vsel %vm2538_vm2, %v7599_v30, -inf  ;;  %5049 = vmatprep.mubr.msk.f32.mxu0 %vm5964_vm0, %v9134_v40 }
 0x1ed   :  { %v5514_v1 = vpop.eup %5513  ;;  %v3099_v47 = vmul.f32 1.442695, %v2944_v54  ;;  %3368 = vadd.xlane.f32.xlu1 %v3367_v44  ;;  %2738 = vmax.xlane.f32.xlu0 %v2737_v45 }
 0x1ee   :  { %v7613_v16 = vpop.xlane.xlu1 %2633  ;;  %v1057_v20 = vpop.f32.mrb[136].mxu0  ;;  %5432 = vmatprep.mubr.msk.f32.mxu1 %vm5964_vm0, %v9134_v40  ;;  %v7618_v41 = vadd.f32 %v7501_v48, %v2118_v36  ;;  %v3370_v44 = vsel %vm2538_vm2, %v5514_v1, 0.0 }
 0x1ef   :  { %9140 = vst [vmem:[#allocation24_spill] sm:$0xff] %v7613_v16  ;;  %5519 = vpow2.f32 %v3099_v47  ;;  %v2945_v3 = vsub.f32 %v6951_v2, %v7613_v16  ;;  %v2122_v54 = vpop.f32.mrb[136].mxu1  ;;  %v4892_v27 = vpop.f32.mrb[137].mxu0  ;;  %5050 = vmatmul.mubr.msk.f32.gmra.mrb[242].mxu0 %vm275_vm1, %v138_v32  ;;  %v264_v47 = vmul.f32 %v139_v49, %v139_v49  ;;  %v140_v2 = vld [vmem:[%s9042_s0 + $0x3d8] sm:$0xff] }
 0x1f0   :  { %v2123_v6 = vadd.f32 %v2122_v54, %v1057_v20  ;;  %v5275_v19 = vpop.f32.mrb[137].mxu1  ;;  %5433 = vmatmul.mubr.msk.f32.gmra.mrb[242].mxu1 %vm275_vm1, %v263_v34  ;;  %v2740_v45 = vsel %vm2538_vm2, %v7618_v41, -inf  ;;  %5052 = vmatprep.mubr.msk.f32.mxu0 %vm5964_vm0, %v9134_v40 }
 0x1f1   :  { %v5516_v36 = vpop.eup %5515  ;;  %v3101_v62 = vmul.f32 1.442695, %v2945_v3  ;;  %3371 = vadd.xlane.f32.xlu0 %v3370_v44  ;;  %2741 = vmax.xlane.f32.xlu1 %v2740_v45 }
 0x1f2   :  { %v7632_v32 = vpop.xlane.xlu0 %2636  ;;  %v1062_v34 = vpop.f32.mrb[138].mxu0  ;;  %5435 = vmatprep.mubr.msk.f32.mxu1 %vm5964_vm0, %v9134_v40  ;;  %v7637_v1 = vadd.f32 %v7501_v48, %v2123_v6  ;;  %v3373_v44 = vsel %vm2538_vm2, %v5516_v36, 0.0 }
 0x1f3   :  { %9141 = vst [vmem:[#allocation25_spill] sm:$0xff] %v7632_v32  ;;  %5521 = vpow2.f32 %v3101_v62  ;;  %v2946_v20 = vsub.f32 %v6965_v22, %v7632_v32  ;;  %v2127_v3 = vpop.f32.mrb[138].mxu1  ;;  %v4895_v54 = vpop.f32.mrb[139].mxu0  ;;  %5053 = vmatmul.mubr.msk.f32.gmra.mrb[244].mxu0 %vm275_vm1, %v139_v49  ;;  %v265_v62 = vmul.f32 %v140_v2, %v140_v2  ;;  %v141_v22 = vld [vmem:[%s9042_s0 + $0x3e0] sm:$0xff] }
 0x1f4   :  { %v2128_v27 = vadd.f32 %v2127_v3, %v1062_v34  ;;  %v5278_v19 = vpop.f32.mrb[139].mxu1  ;;  %5436 = vmatmul.mubr.msk.f32.gmra.mrb[244].mxu1 %vm275_vm1, %v264_v47  ;;  %v2743_v45 = vsel %vm2538_vm2, %v7637_v1, -inf  ;;  %5055 = vmatprep.mubr.msk.f32.mxu0 %vm5964_vm0, %v9134_v40 }
 0x1f5   :  { %v5518_v6 = vpop.eup %5517  ;;  %v3103_v16 = vmul.f32 1.442695, %v2946_v20  ;;  %3374 = vadd.xlane.f32.xlu1 %v3373_v44  ;;  %2744 = vmax.xlane.f32.xlu0 %v2743_v45 }
 0x1f6   :  { %v7652_v49 = vadd.f32 %v7501_v48, %v2128_v27  ;;  %v7654_v47 = vpop.xlane.xlu1 %2639  ;;  %v1067_v36 = vpop.f32.mrb[140].mxu0  ;;  %5438 = vmatprep.mubr.msk.f32.mxu1 %vm5964_vm0, %v9134_v40  ;;  %v3376_v27 = vsel %vm2538_vm2, %v5518_v6, 0.0 }
 0x1f7   :  { %5523 = vpow2.f32 %v3103_v16  ;;  %v2947_v34 = vsub.f32 %v6979_v39, %v7654_v47  ;;  %v2132_v20 = vpop.f32.mrb[140].mxu1  ;;  %v4898_v3 = vpop.f32.mrb[141].mxu0  ;;  %5056 = vmatmul.mubr.msk.f32.gmra.mrb[246].mxu0 %vm275_vm1, %v140_v2  ;;  %v266_v16 = vmul.f32 %v141_v22, %v141_v22 }
 0x1f8   :  { %v2133_v54 = vadd.f32 %v2132_v20, %v1067_v36  ;;  %v5281_v19 = vpop.f32.mrb[141].mxu1  ;;  %5439 = vmatmul.mubr.msk.f32.gmra.mrb[246].mxu1 %vm275_vm1, %v265_v62  ;;  %v2746_v44 = vsel %vm2538_vm2, %v7652_v49, -inf  ;;  %5058 = vmatprep.mubr.msk.f32.mxu0 %vm5964_vm0, %v9134_v40 }
 0x1f9   :  { %v5520_v45 = vpop.eup %5519  ;;  %v3105_v32 = vmul.f32 1.442695, %v2947_v34  ;;  %3377 = vadd.xlane.f32.xlu0 %v3376_v27  ;;  %2747 = vmax.xlane.f32.xlu1 %v2746_v44 }
 0x1fa   :  { %v7668_v39 = vadd.f32 %v7501_v48, %v2133_v54  ;;  %v7670_v2 = vpop.xlane.xlu0 %2642  ;;  %v1072_v36 = vpop.f32.mrb[142].mxu0  ;;  %5441 = vmatprep.mubr.msk.f32.mxu1 %vm5964_vm0, %v9134_v40  ;;  %v3379_v54 = vsel %vm2538_vm2, %v5520_v45, 0.0 }
 0x1fb   :  { %9142 = vst [vmem:[#allocation26_spill] sm:$0xff] %v7670_v2  ;;  %5525 = vpow2.f32 %v3105_v32  ;;  %v2948_v62 = vsub.f32 %v6993_v57, %v7670_v2  ;;  %v2137_v6 = vpop.f32.mrb[142].mxu1  ;;  %v4901_v20 = vpop.f32.mrb[143].mxu0  ;;  %5059 = vmatmul.mubr.msk.f32.gmra.mrb[248].mxu0 %vm275_vm1, %v141_v22 }
 0x1fc   :  { %v2138_v34 = vadd.f32 %v2137_v6, %v1072_v36  ;;  %v5284_v3 = vpop.f32.mrb[143].mxu1  ;;  %5442 = vmatmul.mubr.msk.f32.gmra.mrb[248].mxu1 %vm275_vm1, %v266_v16  ;;  %v2749_v19 = vsel %vm2538_vm2, %v7668_v39, -inf }
 0x1fd   :  { %v5522_v27 = vpop.eup %5521  ;;  %v3107_v44 = vmul.f32 1.442695, %v2948_v62  ;;  %3380 = vadd.xlane.f32.xlu1 %v3379_v54  ;;  %2750 = vmax.xlane.f32.xlu0 %v2749_v19 }
 0x1fe   :  { %v7682_v40 = vadd.f32 %v7501_v48, %v2138_v34  ;;  %v7684_v57 = vpop.xlane.xlu1 %2645  ;;  %v1077_v32 = vpop.f32.mrb[144].mxu0  ;;  %v3382_v20 = vsel %vm2538_vm2, %v5522_v27, 0.0 }
 0x1ff   :  { %9143 = vst [vmem:[#allocation27_spill] sm:$0xff] %v7684_v57  ;;  %5527 = vpow2.f32 %v3107_v44  ;;  %v2949_v22 = vsub.f32 %v7007_v13, %v7684_v57  ;;  %v2142_v16 = vpop.f32.mrb[144].mxu1  ;;  %v4904_v36 = vpop.f32.mrb[145].mxu0 }
 0x200   :  { %v2143_v45 = vadd.f32 %v2142_v16, %v1077_v32  ;;  %v5287_v6 = vpop.f32.mrb[145].mxu1  ;;  %v2752_v62 = vsel %vm2538_vm2, %v7682_v40, -inf }
 0x201   :  { %v5524_v3 = vpop.eup %5523  ;;  %v3109_v54 = vmul.f32 1.442695, %v2949_v22  ;;  %3383 = vadd.xlane.f32.xlu0 %v3382_v20  ;;  %2753 = vmax.xlane.f32.xlu1 %v2752_v62 }
 0x202   :  { %v7692_v34 = vadd.f32 %v7501_v48, %v2143_v45  ;;  %v7694_v19 = vpop.xlane.xlu0 %2648  ;;  %v1082_v44 = vpop.f32.mrb[146].mxu0  ;;  %v3385_v6 = vsel %vm2538_vm2, %v5524_v3, 0.0 }
 0x203   :  { %9144 = vst [vmem:[#allocation28_spill] sm:$0xff] %v7694_v19  ;;  %5529 = vpow2.f32 %v3109_v54  ;;  %v2950_v13 = vsub.f32 %v7028_v37, %v7694_v19  ;;  %v2147_v32 = vpop.f32.mrb[146].mxu1  ;;  %v4907_v16 = vpop.f32.mrb[147].mxu0 }
 0x204   :  { %v2148_v27 = vadd.f32 %v2147_v32, %v1082_v44  ;;  %v5290_v36 = vpop.f32.mrb[147].mxu1  ;;  %v2755_v22 = vsel %vm2538_vm2, %v7692_v34, -inf }
 0x205   :  { %v5526_v20 = vpop.eup %5525  ;;  %v3111_v62 = vmul.f32 1.442695, %v2950_v13  ;;  %3386 = vadd.xlane.f32.xlu1 %v3385_v6  ;;  %2756 = vmax.xlane.f32.xlu0 %v2755_v22 }
 0x206   :  { %v7702_v45 = vadd.f32 %v7501_v48, %v2148_v27  ;;  %v7704_v54 = vpop.xlane.xlu1 %2651  ;;  %v1087_v57 = vpop.f32.mrb[148].mxu0  ;;  %v3388_v36 = vsel %vm2538_vm2, %v5526_v20, 0.0 }
 0x207   :  { %9145 = vst [vmem:[#allocation29_spill] sm:$0xff] %v7704_v54  ;;  %5531 = vpow2.f32 %v3111_v62  ;;  %v2951_v37 = vsub.f32 %v7046_v0, %v7704_v54  ;;  %v2152_v44 = vpop.f32.mrb[148].mxu1  ;;  %v4910_v32 = vpop.f32.mrb[149].mxu0 }
 0x208   :  { %v2153_v3 = vadd.f32 %v2152_v44, %v1087_v57  ;;  %v5293_v16 = vpop.f32.mrb[149].mxu1  ;;  %v2758_v13 = vsel %vm2538_vm2, %v7702_v45, -inf }
 0x209   :  { %v5528_v6 = vpop.eup %5527  ;;  %v3113_v22 = vmul.f32 1.442695, %v2951_v37  ;;  %3389 = vadd.xlane.f32.xlu0 %v3388_v36  ;;  %2759 = vmax.xlane.f32.xlu1 %v2758_v13 }
 0x20a   :  { %v7712_v27 = vadd.f32 %v7501_v48, %v2153_v3  ;;  %v7714_v62 = vpop.xlane.xlu0 %2654  ;;  %v1092_v19 = vpop.f32.mrb[150].mxu0  ;;  %v3391_v16 = vsel %vm2538_vm2, %v5528_v6, 0.0 }
 0x20b   :  { %9146 = vst [vmem:[#allocation30_spill] sm:$0xff] %v7714_v62  ;;  %5533 = vpow2.f32 %v3113_v22  ;;  %v2952_v0 = vsub.f32 %v7064_v29, %v7714_v62  ;;  %v2157_v57 = vpop.f32.mrb[150].mxu1  ;;  %v4913_v44 = vpop.f32.mrb[151].mxu0 }
 0x20c   :  { %v2158_v20 = vadd.f32 %v2157_v57, %v1092_v19  ;;  %v5296_v32 = vpop.f32.mrb[151].mxu1  ;;  %v2761_v37 = vsel %vm2538_vm2, %v7712_v27, -inf }
 0x20d   :  { %v5530_v36 = vpop.eup %5529  ;;  %v3115_v13 = vmul.f32 1.442695, %v2952_v0  ;;  %3392 = vadd.xlane.f32.xlu1 %v3391_v16  ;;  %2762 = vmax.xlane.f32.xlu0 %v2761_v37 }
 0x20e   :  { %v7722_v3 = vadd.f32 %v7501_v48, %v2158_v20  ;;  %v7724_v22 = vpop.xlane.xlu1 %2657  ;;  %v1097_v54 = vpop.f32.mrb[152].mxu0  ;;  %v3394_v32 = vsel %vm2538_vm2, %v5530_v36, 0.0 }
 0x20f   :  { %9147 = vst [vmem:[#allocation31_spill] sm:$0xff] %v7724_v22  ;;  %5535 = vpow2.f32 %v3115_v13  ;;  %v2953_v29 = vsub.f32 %v7082_v5, %v7724_v22  ;;  %v2162_v19 = vpop.f32.mrb[152].mxu1  ;;  %v4916_v57 = vpop.f32.mrb[153].mxu0 }
 0x210   :  { %v2163_v6 = vadd.f32 %v2162_v19, %v1097_v54  ;;  %v5299_v44 = vpop.f32.mrb[153].mxu1  ;;  %v2764_v0 = vsel %vm2538_vm2, %v7722_v3, -inf }
 0x211   :  { %v5532_v16 = vpop.eup %5531  ;;  %v3117_v37 = vmul.f32 1.442695, %v2953_v29  ;;  %3395 = vadd.xlane.f32.xlu0 %v3394_v32  ;;  %2765 = vmax.xlane.f32.xlu1 %v2764_v0 }
 0x212   :  { %v7732_v20 = vadd.f32 %v7501_v48, %v2163_v6  ;;  %v3291_v13 = vpop.xlane.xlu1 %3290  ;;  %v7734_v62 = vpop.xlane.xlu0 %2660  ;;  %v3397_v29 = vsel %vm2538_vm2, %v5532_v16, 0.0 }
 0x213   :  { %9148 = vst [vmem:[#allocation32_spill] sm:$0xff] %v7734_v62  ;;  %5537 = vpow2.f32 %v3117_v37  ;;  %v2954_v5 = vsub.f32 %v7100_v63, %v7734_v62  ;;  %v1102_v54 = vpop.f32.mrb[154].mxu0  ;;  %v2167_v19 = vpop.f32.mrb[154].mxu1 }
 0x214   :  { %5539 = vlog2.f32 %v3291_v13  ;;  %v2168_v36 = vadd.f32 %v2167_v19, %v1102_v54  ;;  %v4919_v57 = vpop.f32.mrb[155].mxu0  ;;  %v5302_v44 = vpop.f32.mrb[155].mxu1  ;;  %v2767_v32 = vsel %vm2538_vm2, %v7732_v20, -inf }
 0x215   :  { %v5534_v6 = vpop.eup %5533  ;;  %v3119_v0 = vmul.f32 1.442695, %v2954_v5  ;;  %3398 = vadd.xlane.f32.xlu1 %v3397_v29  ;;  %2768 = vmax.xlane.f32.xlu0 %v2767_v32 }
 0x216   :  { %v7742_v37 = vadd.f32 %v7501_v48, %v2168_v36  ;;  %v3294_v22 = vpop.xlane.xlu0 %3293  ;;  %v7744_v63 = vpop.xlane.xlu1 %2663  ;;  %v3400_v5 = vsel %vm2538_vm2, %v5534_v6, 0.0 }
 0x217   :  { %9149 = vst [vmem:[#allocation33_spill] sm:$0xff] %v7744_v63  ;;  %5541 = vpow2.f32 %v3119_v0  ;;  %v2955_v13 = vsub.f32 %v7119_v10, %v7744_v63  ;;  %v1107_v54 = vpop.f32.mrb[156].mxu0  ;;  %v2172_v19 = vpop.f32.mrb[156].mxu1 }
 0x218   :  { %5543 = vlog2.f32 %v3294_v22  ;;  %v2173_v16 = vadd.f32 %v2172_v19, %v1107_v54  ;;  %v4922_v57 = vpop.f32.mrb[157].mxu0  ;;  %v5305_v44 = vpop.f32.mrb[157].mxu1  ;;  %v2770_v29 = vsel %vm2538_vm2, %v7742_v37, -inf }
 0x219   :  { %v5536_v36 = vpop.eup %5535  ;;  %v3121_v32 = vmul.f32 1.442695, %v2955_v13  ;;  %3401 = vadd.xlane.f32.xlu0 %v3400_v5  ;;  %2771 = vmax.xlane.f32.xlu1 %v2770_v29 }
 0x21a   :  { %v7752_v0 = vadd.f32 %v7501_v48, %v2173_v16  ;;  %v3297_v62 = vpop.xlane.xlu1 %3296  ;;  %v7754_v10 = vpop.xlane.xlu0 %2666  ;;  %v3403_v13 = vsel %vm2538_vm2, %v5536_v36, 0.0 }
 0x21b   :  { %9151 = vst [vmem:[#allocation35_spill] sm:$0xff] %v7754_v10  ;;  %5545 = vpow2.f32 %v3121_v32  ;;  %v2956_v22 = vsub.f32 %v7138_v50, %v7754_v10  ;;  %v1112_v54 = vpop.f32.mrb[158].mxu0  ;;  %v2177_v19 = vpop.f32.mrb[158].mxu1 }
 0x21c   :  { %9150 = vst [vmem:[#allocation34_spill] sm:$0xff] %v7752_v0  ;;  %5547 = vlog2.f32 %v3297_v62  ;;  %v2178_v6 = vadd.f32 %v2177_v19, %v1112_v54  ;;  %v4925_v57 = vpop.f32.mrb[159].mxu0  ;;  %v5308_v44 = vpop.f32.mrb[159].mxu1  ;;  %v2773_v5 = vsel %vm2538_vm2, %v7752_v0, -inf }
 0x21d   :  { %v5538_v16 = vpop.eup %5537  ;;  %v3123_v29 = vmul.f32 1.442695, %v2956_v22  ;;  %3404 = vadd.xlane.f32.xlu1 %v3403_v13  ;;  %2774 = vmax.xlane.f32.xlu0 %v2773_v5 }
 0x21e   :  { %v5540_v63 = vpop.eup %5539  ;;  %v7762_v32 = vadd.f32 %v7501_v48, %v2178_v6  ;;  %v3300_v50 = vpop.xlane.xlu0 %3299  ;;  %v3406_v13 = vsel %vm2538_vm2, %v5538_v16, 0.0 }
 0x21f   :  { %v7764_v10 = vpop.xlane.xlu1 %2669  ;;  %v3665_v62 = vmul.f32 0.6931472, %v5540_v63  ;;  %5549 = vpow2.f32 %v3123_v29  ;;  %v1117_v54 = vpop.f32.mrb[160].mxu0 }
 0x220   :  { %v2957_v36 = vsub.f32 %v7157_v35, %v7764_v10  ;;  %v2182_v19 = vpop.f32.mrb[160].mxu1  ;;  %5551 = vlog2.f32 %v3300_v50  ;;  %v4928_v22 = vpop.f32.mrb[161].mxu0  ;;  %v2776_v6 = vsel %vm2538_vm2, %v7762_v32, -inf }
 0x221   :  { %v2183_v57 = vadd.f32 %v2182_v19, %v1117_v54  ;;  %v5311_v44 = vpop.f32.mrb[161].mxu1  ;;  %v5542_v5 = vpop.eup %5541  ;;  %v3914_v0 = vadd.f32 %v3665_v62, %v7020_v31  ;;  %3407 = vadd.xlane.f32.xlu0 %v3406_v13  ;;  %2777 = vmax.xlane.f32.xlu1 %v2776_v6 }
 0x222   :  { %v3125_v2 = vmul.f32 1.442695, %v2957_v36  ;;  %v5544_v63 = vpop.eup %5543  ;;  %v7775_v50 = vpop.xlane.xlu0 %2672  ;;  %v3409_v22 = vsel %vm2538_vm2, %v5542_v5, 0.0 }
 0x223   :  { %v7773_v35 = vadd.f32 %v7501_v48, %v2183_v57  ;;  %v3303_v29 = vpop.xlane.xlu1 %3302  ;;  %4040 = vst.msk [vmem:[%s9044_s4] sm:$0xff] %vm4039_vm3, %v3914_v0  ;;  %v3667_v16 = vmul.f32 0.6931472, %v5544_v63  ;;  %v2958_v31 = vsub.f32 %v7176_v17, %v7775_v50  ;;  %v1122_v62 = vpop.f32.mrb[162].mxu0 }
 0x224   :  { %5553 = vpow2.f32 %v3125_v2  ;;  %v2187_v36 = vpop.f32.mrb[162].mxu1  ;;  %v4931_v19 = vpop.f32.mrb[163].mxu0 }
 0x225   :  { %5555 = vlog2.f32 %v3303_v29  ;;  %v2188_v54 = vadd.f32 %v2187_v36, %v1122_v62  ;;  %v5314_v57 = vpop.f32.mrb[163].mxu1  ;;  %v2779_v44 = vsel %vm2538_vm2, %v7773_v35, -inf  ;;  %v5546_v13 = vpop.eup %5545  ;;  %v3915_v6 = vadd.f32 %v3667_v16, %v7043_v59  ;;  %3410 = vadd.xlane.f32.xlu1 %v3409_v22 }
 0x226   :  { %v3127_v0 = vmul.f32 1.442695, %v2958_v31  ;;  %2780 = vmax.xlane.f32.xlu0 %v2779_v44  ;;  %v5548_v2 = vpop.eup %5547  ;;  %v3306_v63 = vpop.xlane.xlu0 %3305  ;;  %v3412_v19 = vsel %vm2538_vm2, %v5546_v13, 0.0 }
 0x227   :  { %v7788_v17 = vadd.f32 %v7501_v48, %v2188_v54  ;;  %v7790_v29 = vpop.xlane.xlu1 %2675  ;;  %4041 = vst.msk [vmem:[%s9044_s4 + $0x8] sm:$0xff] %vm4039_vm3, %v3915_v6  ;;  %v3669_v5 = vmul.f32 0.6931472, %v5548_v2  ;;  %v1127_v16 = vpop.f32.mrb[164].mxu0 }
 0x228   :  { %5557 = vpow2.f32 %v3127_v0  ;;  %v2959_v59 = vsub.f32 %v7195_v9, %v7790_v29  ;;  %v2192_v31 = vpop.f32.mrb[164].mxu1  ;;  %v4934_v36 = vpop.f32.mrb[165].mxu0 }
 0x229   :  { %5559 = vlog2.f32 %v3306_v63  ;;  %v2193_v62 = vadd.f32 %v2192_v31, %v1127_v16  ;;  %v5317_v54 = vpop.f32.mrb[165].mxu1  ;;  %v2782_v57 = vsel %vm2538_vm2, %v7788_v17, -inf  ;;  %v5550_v22 = vpop.eup %5549  ;;  %v3916_v44 = vadd.f32 %v3669_v5, %v7061_v25 }
 0x22a   :  { %v3129_v6 = vmul.f32 1.442695, %v2959_v59  ;;  %3413 = vadd.xlane.f32.xlu0 %v3412_v19  ;;  %2783 = vmax.xlane.f32.xlu1 %v2782_v57  ;;  %v5552_v0 = vpop.eup %5551  ;;  %v7805_v63 = vpop.xlane.xlu0 %2678  ;;  %v3415_v36 = vsel %vm2538_vm2, %v5550_v22, 0.0 }
 0x22b   :  { %v7803_v9 = vadd.f32 %v7501_v48, %v2193_v62  ;;  %v3309_v2 = vpop.xlane.xlu1 %3308  ;;  %4042 = vst.msk [vmem:[%s9044_s4 + $0x10] sm:$0xff] %vm4039_vm3, %v3916_v44  ;;  %v3671_v13 = vmul.f32 0.6931472, %v5552_v0  ;;  %v2960_v25 = vsub.f32 %v7214_v56, %v7805_v63  ;;  %v1132_v5 = vpop.f32.mrb[166].mxu0 }
 0x22c   :  { %5561 = vpow2.f32 %v3129_v6  ;;  %v2197_v59 = vpop.f32.mrb[166].mxu1  ;;  %v4937_v31 = vpop.f32.mrb[167].mxu0 }
 0x22d   :  { %5563 = vlog2.f32 %v3309_v2  ;;  %v2198_v16 = vadd.f32 %v2197_v59, %v1132_v5  ;;  %v5320_v62 = vpop.f32.mrb[167].mxu1  ;;  %v2785_v54 = vsel %vm2538_vm2, %v7803_v9, -inf  ;;  %v3917_v57 = vadd.f32 %v3671_v13, %v7079_v55 }
 0x22e   :  { %v5554_v19 = vpop.eup %5553  ;;  %v3131_v44 = vmul.f32 1.442695, %v2960_v25  ;;  %3416 = vadd.xlane.f32.xlu1 %v3415_v36  ;;  %2786 = vmax.xlane.f32.xlu0 %v2785_v54  ;;  %v3312_v0 = vpop.xlane.xlu0 %3311 }
 0x22f   :  { %v5556_v6 = vpop.eup %5555  ;;  %v7818_v56 = vadd.f32 %v7501_v48, %v2198_v16  ;;  %v7820_v2 = vpop.xlane.xlu1 %2681  ;;  %4043 = vst.msk [vmem:[%s9044_s4 + $0x18] sm:$0xff] %vm4039_vm3, %v3917_v57  ;;  %v3418_v31 = vsel %vm2538_vm2, %v5554_v19, 0.0 }
 0x230   :  { %v3673_v22 = vmul.f32 0.6931472, %v5556_v6  ;;  %5565 = vpow2.f32 %v3131_v44  ;;  %v2961_v55 = vsub.f32 %v7233_v52, %v7820_v2  ;;  %v1137_v13 = vpop.f32.mrb[168].mxu0  ;;  %v2202_v25 = vpop.f32.mrb[168].mxu1 }
 0x231   :  { %5567 = vlog2.f32 %v3312_v0  ;;  %v2203_v5 = vadd.f32 %v2202_v25, %v1137_v13  ;;  %v4940_v59 = vpop.f32.mrb[169].mxu0  ;;  %v5323_v16 = vpop.f32.mrb[169].mxu1  ;;  %v2788_v62 = vsel %vm2538_vm2, %v7818_v56, -inf }
 0x232   :  { %v5558_v36 = vpop.eup %5557  ;;  %v3918_v54 = vadd.f32 %v3673_v22, %v7097_v15  ;;  %v3133_v57 = vmul.f32 1.442695, %v2961_v55  ;;  %3419 = vadd.xlane.f32.xlu0 %v3418_v31  ;;  %2789 = vmax.xlane.f32.xlu1 %v2788_v62  ;;  %v7835_v0 = vpop.xlane.xlu0 %2684 }
 0x233   :  { %v5560_v44 = vpop.eup %5559  ;;  %v7833_v52 = vadd.f32 %v7501_v48, %v2203_v5  ;;  %v3315_v6 = vpop.xlane.xlu1 %3314  ;;  %v2962_v15 = vsub.f32 %v7252_v61, %v7835_v0  ;;  %v3421_v59 = vsel %vm2538_vm2, %v5558_v36, 0.0 }
 0x234   :  { %4044 = vst.msk [vmem:[%s9044_s4 + $0x20] sm:$0xff] %vm4039_vm3, %v3918_v54  ;;  %v3675_v19 = vmul.f32 0.6931472, %v5560_v44  ;;  %5569 = vpow2.f32 %v3133_v57  ;;  %v1142_v22 = vpop.f32.mrb[170].mxu0  ;;  %v2207_v55 = vpop.f32.mrb[170].mxu1 }
 0x235   :  { %5571 = vlog2.f32 %v3315_v6  ;;  %v2208_v13 = vadd.f32 %v2207_v55, %v1142_v22  ;;  %v4943_v25 = vpop.f32.mrb[171].mxu0  ;;  %v5326_v5 = vpop.f32.mrb[171].mxu1  ;;  %v2791_v16 = vsel %vm2538_vm2, %v7833_v52, -inf  ;;  %v3135_v54 = vmul.f32 1.442695, %v2962_v15 }
 0x236   :  { %v5562_v31 = vpop.eup %5561  ;;  %v3919_v62 = vadd.f32 %v3675_v19, %v7114_v24  ;;  %3422 = vadd.xlane.f32.xlu1 %v3421_v59  ;;  %2792 = vmax.xlane.f32.xlu0 %v2791_v16  ;;  %v3318_v44 = vpop.xlane.xlu0 %3317 }
 0x237   :  { %v5564_v57 = vpop.eup %5563  ;;  %v7848_v61 = vadd.f32 %v7501_v48, %v2208_v13  ;;  %v7850_v6 = vpop.xlane.xlu1 %2687  ;;  %5573 = vpow2.f32 %v3135_v54  ;;  %v3424_v25 = vsel %vm2538_vm2, %v5562_v31, 0.0 }
 0x238   :  { %4045 = vst.msk [vmem:[%s9044_s4 + $0x28] sm:$0xff] %vm4039_vm3, %v3919_v62  ;;  %v3677_v36 = vmul.f32 0.6931472, %v5564_v57  ;;  %v2963_v24 = vsub.f32 %v7271_v21, %v7850_v6  ;;  %v1147_v19 = vpop.f32.mrb[172].mxu0  ;;  %v2212_v15 = vpop.f32.mrb[172].mxu1  ;;  %5575 = vlog2.f32 %v3318_v44 }
 0x239   :  { %v2213_v22 = vadd.f32 %v2212_v15, %v1147_v19  ;;  %v4946_v55 = vpop.f32.mrb[173].mxu0  ;;  %v5329_v13 = vpop.f32.mrb[173].mxu1  ;;  %v2794_v5 = vsel %vm2538_vm2, %v7848_v61, -inf }
 0x23a   :  { %v5566_v59 = vpop.eup %5565  ;;  %v3920_v16 = vadd.f32 %v3677_v36, %v7133_v33  ;;  %v3137_v62 = vmul.f32 1.442695, %v2963_v24  ;;  %3425 = vadd.xlane.f32.xlu0 %v3424_v25  ;;  %2795 = vmax.xlane.f32.xlu1 %v2794_v5  ;;  %v7865_v44 = vpop.xlane.xlu0 %2690 }
 0x23b   :  { %v5568_v54 = vpop.eup %5567  ;;  %v7863_v21 = vadd.f32 %v7501_v48, %v2213_v22  ;;  %v3321_v57 = vpop.xlane.xlu1 %3320  ;;  %v2964_v33 = vsub.f32 %v7290_v12, %v7865_v44  ;;  %v3427_v55 = vsel %vm2538_vm2, %v5566_v59, 0.0 }
 0x23c   :  { %4046 = vst.msk [vmem:[%s9044_s4 + $0x30] sm:$0xff] %vm4039_vm3, %v3920_v16  ;;  %v3679_v31 = vmul.f32 0.6931472, %v5568_v54  ;;  %5577 = vpow2.f32 %v3137_v62  ;;  %v1152_v36 = vpop.f32.mrb[174].mxu0  ;;  %v2217_v24 = vpop.f32.mrb[174].mxu1 }
 0x23d   :  { %5579 = vlog2.f32 %v3321_v57  ;;  %v2218_v19 = vadd.f32 %v2217_v24, %v1152_v36  ;;  %v4949_v15 = vpop.f32.mrb[175].mxu0  ;;  %v5332_v22 = vpop.f32.mrb[175].mxu1  ;;  %v2797_v13 = vsel %vm2538_vm2, %v7863_v21, -inf  ;;  %v3139_v16 = vmul.f32 1.442695, %v2964_v33 }
 0x23e   :  { %v5570_v25 = vpop.eup %5569  ;;  %v3921_v5 = vadd.f32 %v3679_v31, %v7152_v42  ;;  %3428 = vadd.xlane.f32.xlu1 %v3427_v55  ;;  %2798 = vmax.xlane.f32.xlu0 %v2797_v13  ;;  %v3324_v54 = vpop.xlane.xlu0 %3323 }
 0x23f   :  { %v5572_v62 = vpop.eup %5571  ;;  %v7878_v12 = vadd.f32 %v7501_v48, %v2218_v19  ;;  %v7880_v57 = vpop.xlane.xlu1 %2693  ;;  %5581 = vpow2.f32 %v3139_v16  ;;  %v3430_v19 = vsel %vm2538_vm2, %v5570_v25, 0.0 }
 0x240   :  { %9152 = vst [vmem:[#allocation36_spill] sm:$0xff] %v7880_v57  ;;  %4047 = vst.msk [vmem:[%s9044_s4 + $0x38] sm:$0xff] %vm4039_vm3, %v3921_v5  ;;  %v3681_v59 = vmul.f32 0.6931472, %v5572_v62  ;;  %v2965_v42 = vsub.f32 %v7309_v11, %v7880_v57  ;;  %v1157_v31 = vpop.f32.mrb[176].mxu0  ;;  %v2222_v33 = vpop.f32.mrb[176].mxu1  ;;  %5583 = vlog2.f32 %v3324_v54 }
 0x241   :  { %v2223_v36 = vadd.f32 %v2222_v33, %v1157_v31  ;;  %v4952_v24 = vpop.f32.mrb[177].mxu0  ;;  %v5335_v48 = vpop.f32.mrb[177].mxu1  ;;  %v2800_v15 = vsel %vm2538_vm2, %v7878_v12, -inf  ;;  %v7895_v11 = vld [vmem:[%s9043_s3] ss:$0 sm:$0xff] }
 0x242   :  { %v5574_v22 = vpop.eup %5573  ;;  %v3922_v55 = vadd.f32 %v3681_v59, %v7171_v51  ;;  %v3141_v13 = vmul.f32 1.442695, %v2965_v42  ;;  %3431 = vadd.xlane.f32.xlu0 %v3430_v19  ;;  %2801 = vmax.xlane.f32.xlu1 %v2800_v15  ;;  %v7900_v25 = vpop.xlane.xlu0 %2696  ;;  %v9154_v15 = vld [vmem:[#allocation2_spill] sm:$0xff] }
 0x243   :  { %v5576_v5 = vpop.eup %5575  ;;  %v7898_v16 = vadd.f32 %v7895_v11, %v2223_v36  ;;  %v3327_v62 = vpop.xlane.xlu1 %3326  ;;  %9153 = vst [vmem:[#allocation37_spill] sm:$0xff] %v7900_v25  ;;  %v2966_v54 = vsub.f32 %v7328_v4, %v7900_v25  ;;  %v3433_v24 = vsel %vm2538_vm2, %v5574_v22, 0.0 }
 0x244   :  { %4048 = vst.msk [vmem:[%s9044_s4 + $0x40] sm:$0xff] %vm4039_vm3, %v3922_v55  ;;  %v3683_v51 = vmul.f32 0.6931472, %v5576_v5  ;;  %5585 = vpow2.f32 %v3141_v13  ;;  %v1162_v59 = vpop.f32.mrb[178].mxu0  ;;  %v2227_v42 = vpop.f32.mrb[178].mxu1 }
 0x245   :  { %5587 = vlog2.f32 %v3327_v62  ;;  %v2228_v31 = vadd.f32 %v2227_v42, %v1162_v59  ;;  %v4955_v33 = vpop.f32.mrb[179].mxu0  ;;  %v5338_v36 = vpop.f32.mrb[179].mxu1  ;;  %v2803_v48 = vsel %vm2538_vm2, %v7898_v16, -inf  ;;  %v3143_v55 = vmul.f32 1.442695, %v2966_v54 }
 0x246   :  { %v5578_v19 = vpop.eup %5577  ;;  %v3923_v57 = vadd.f32 %v3683_v51, %v9154_v15  ;;  %3434 = vadd.xlane.f32.xlu1 %v3433_v24  ;;  %2804 = vmax.xlane.f32.xlu0 %v2803_v48  ;;  %v3330_v5 = vpop.xlane.xlu0 %3329  ;;  %v9156_v15 = vld [vmem:[#allocation3_spill] sm:$0xff] }
 0x247   :  { %v5580_v13 = vpop.eup %5579  ;;  %v7913_v4 = vadd.f32 %v7895_v11, %v2228_v31  ;;  %v7915_v62 = vpop.xlane.xlu1 %2699  ;;  %5589 = vpow2.f32 %v3143_v55  ;;  %v3436_v36 = vsel %vm2538_vm2, %v5578_v19, 0.0 }
 0x248   :  { %9155 = vst [vmem:[#allocation2_spill] sm:$0xff] %v7915_v62  ;;  %4049 = vst.msk [vmem:[%s9044_s4 + $0x48] sm:$0xff] %vm4039_vm3, %v3923_v57  ;;  %v3685_v22 = vmul.f32 0.6931472, %v5580_v13  ;;  %v2967_v51 = vsub.f32 %v7347_v46, %v7915_v62  ;;  %v1167_v54 = vpop.f32.mrb[180].mxu0  ;;  %v2232_v59 = vpop.f32.mrb[180].mxu1  ;;  %5591 = vlog2.f32 %v3330_v5 }
 0x249   :  { %v2233_v42 = vadd.f32 %v2232_v59, %v1167_v54  ;;  %v4958_v33 = vpop.f32.mrb[181].mxu0  ;;  %v5341_v31 = vpop.f32.mrb[181].mxu1  ;;  %v2806_v24 = vsel %vm2538_vm2, %v7913_v4, -inf }
 0x24a   :  { %v5582_v48 = vpop.eup %5581  ;;  %v3924_v25 = vadd.f32 %v3685_v22, %v9156_v15  ;;  %v3145_v57 = vmul.f32 1.442695, %v2967_v51  ;;  %3437 = vadd.xlane.f32.xlu0 %v3436_v36  ;;  %2807 = vmax.xlane.f32.xlu1 %v2806_v24  ;;  %v7930_v5 = vpop.xlane.xlu0 %2702  ;;  %v9158_v15 = vld [vmem:[#allocation4_spill] sm:$0xff] }
 0x24b   :  { %v5584_v55 = vpop.eup %5583  ;;  %v7928_v46 = vadd.f32 %v7895_v11, %v2233_v42  ;;  %v3333_v13 = vpop.xlane.xlu1 %3332  ;;  %9157 = vst [vmem:[#allocation3_spill] sm:$0xff] %v7930_v5  ;;  %v2968_v22 = vsub.f32 %v7366_v43, %v7930_v5  ;;  %v3439_v31 = vsel %vm2538_vm2, %v5582_v48, 0.0 }
 0x24c   :  { %4050 = vst.msk [vmem:[%s9044_s4 + $0x50] sm:$0xff] %vm4039_vm3, %v3924_v25  ;;  %v3687_v19 = vmul.f32 0.6931472, %v5584_v55  ;;  %5593 = vpow2.f32 %v3145_v57  ;;  %v1172_v51 = vpop.f32.mrb[182].mxu0  ;;  %v2237_v54 = vpop.f32.mrb[182].mxu1 }
 0x24d   :  { %5595 = vlog2.f32 %v3333_v13  ;;  %v2238_v59 = vadd.f32 %v2237_v54, %v1172_v51  ;;  %v4961_v33 = vpop.f32.mrb[183].mxu0  ;;  %v5344_v42 = vpop.f32.mrb[183].mxu1  ;;  %v2809_v36 = vsel %vm2538_vm2, %v7928_v46, -inf  ;;  %v3147_v25 = vmul.f32 1.442695, %v2968_v22 }
 0x24e   :  { %v5586_v24 = vpop.eup %5585  ;;  %v3925_v62 = vadd.f32 %v3687_v19, %v9158_v15  ;;  %3440 = vadd.xlane.f32.xlu1 %v3439_v31  ;;  %2810 = vmax.xlane.f32.xlu0 %v2809_v36  ;;  %v3336_v55 = vpop.xlane.xlu0 %3335  ;;  %v9160_v15 = vld [vmem:[#allocation5_spill] sm:$0xff] }
 0x24f   :  { %v5588_v57 = vpop.eup %5587  ;;  %v7943_v43 = vadd.f32 %v7895_v11, %v2238_v59  ;;  %v7945_v13 = vpop.xlane.xlu1 %2705  ;;  %5597 = vpow2.f32 %v3147_v25  ;;  %v3442_v42 = vsel %vm2538_vm2, %v5586_v24, 0.0 }
 0x250   :  { %9159 = vst [vmem:[#allocation4_spill] sm:$0xff] %v7945_v13  ;;  %4051 = vst.msk [vmem:[%s9044_s4 + $0x58] sm:$0xff] %vm4039_vm3, %v3925_v62  ;;  %v3689_v48 = vmul.f32 0.6931472, %v5588_v57  ;;  %v2969_v19 = vsub.f32 %v7385_v23, %v7945_v13  ;;  %v1177_v22 = vpop.f32.mrb[184].mxu0  ;;  %v2242_v51 = vpop.f32.mrb[184].mxu1  ;;  %5599 = vlog2.f32 %v3336_v55 }
 0x251   :  { %v2243_v54 = vadd.f32 %v2242_v51, %v1177_v22  ;;  %v4964_v33 = vpop.f32.mrb[185].mxu0  ;;  %v5347_v59 = vpop.f32.mrb[185].mxu1  ;;  %v2812_v31 = vsel %vm2538_vm2, %v7943_v43, -inf }
 0x252   :  { %v5590_v36 = vpop.eup %5589  ;;  %v3926_v5 = vadd.f32 %v3689_v48, %v9160_v15  ;;  %v3149_v62 = vmul.f32 1.442695, %v2969_v19  ;;  %3443 = vadd.xlane.f32.xlu0 %v3442_v42  ;;  %2813 = vmax.xlane.f32.xlu1 %v2812_v31  ;;  %v7960_v55 = vpop.xlane.xlu0 %2708  ;;  %v9162_v15 = vld [vmem:[#allocation6_spill] sm:$0xff] }
 0x253   :  { %v5592_v25 = vpop.eup %5591  ;;  %v7958_v23 = vadd.f32 %v7895_v11, %v2243_v54  ;;  %v3339_v57 = vpop.xlane.xlu1 %3338  ;;  %9161 = vst [vmem:[#allocation5_spill] sm:$0xff] %v7960_v55  ;;  %v2970_v48 = vsub.f32 %v7404_v60, %v7960_v55  ;;  %v3445_v59 = vsel %vm2538_vm2, %v5590_v36, 0.0 }
 0x254   :  { %4052 = vst.msk [vmem:[%s9044_s4 + $0x60] sm:$0xff] %vm4039_vm3, %v3926_v5  ;;  %v3691_v24 = vmul.f32 0.6931472, %v5592_v25  ;;  %5601 = vpow2.f32 %v3149_v62  ;;  %v1182_v19 = vpop.f32.mrb[186].mxu0  ;;  %v2247_v22 = vpop.f32.mrb[186].mxu1 }
 0x255   :  { %5603 = vlog2.f32 %v3339_v57  ;;  %v2248_v51 = vadd.f32 %v2247_v22, %v1182_v19  ;;  %v4967_v33 = vpop.f32.mrb[187].mxu0  ;;  %v5350_v54 = vpop.f32.mrb[187].mxu1  ;;  %v2815_v42 = vsel %vm2538_vm2, %v7958_v23, -inf  ;;  %v3151_v5 = vmul.f32 1.442695, %v2970_v48 }
 0x256   :  { %v5594_v31 = vpop.eup %5593  ;;  %v3927_v13 = vadd.f32 %v3691_v24, %v9162_v15  ;;  %3446 = vadd.xlane.f32.xlu1 %v3445_v59  ;;  %2816 = vmax.xlane.f32.xlu0 %v2815_v42  ;;  %v3342_v25 = vpop.xlane.xlu0 %3341  ;;  %v9164_v15 = vld [vmem:[#allocation7_spill] sm:$0xff] }
 0x257   :  { %v5596_v62 = vpop.eup %5595  ;;  %v7973_v60 = vadd.f32 %v7895_v11, %v2248_v51  ;;  %v7975_v57 = vpop.xlane.xlu1 %2711  ;;  %5605 = vpow2.f32 %v3151_v5  ;;  %v3448_v54 = vsel %vm2538_vm2, %v5594_v31, 0.0 }
 0x258   :  { %9163 = vst [vmem:[#allocation6_spill] sm:$0xff] %v7975_v57  ;;  %4053 = vst.msk [vmem:[%s9044_s4 + $0x68] sm:$0xff] %vm4039_vm3, %v3927_v13  ;;  %v3693_v36 = vmul.f32 0.6931472, %v5596_v62  ;;  %v2971_v24 = vsub.f32 %v7423_v7, %v7975_v57  ;;  %v1187_v48 = vpop.f32.mrb[188].mxu0  ;;  %v2252_v19 = vpop.f32.mrb[188].mxu1  ;;  %5607 = vlog2.f32 %v3342_v25 }
 0x259   :  { %v2253_v22 = vadd.f32 %v2252_v19, %v1187_v48  ;;  %v4970_v33 = vpop.f32.mrb[189].mxu0  ;;  %v5353_v51 = vpop.f32.mrb[189].mxu1  ;;  %v2818_v59 = vsel %vm2538_vm2, %v7973_v60, -inf }
 0x25a   :  { %v5598_v42 = vpop.eup %5597  ;;  %v3928_v55 = vadd.f32 %v3693_v36, %v9164_v15  ;;  %v3153_v13 = vmul.f32 1.442695, %v2971_v24  ;;  %3449 = vadd.xlane.f32.xlu0 %v3448_v54  ;;  %2819 = vmax.xlane.f32.xlu1 %v2818_v59  ;;  %v7990_v25 = vpop.xlane.xlu0 %2714  ;;  %v9166_v15 = vld [vmem:[#allocation8_spill] sm:$0xff] }
 0x25b   :  { %v5600_v5 = vpop.eup %5599  ;;  %v7988_v7 = vadd.f32 %v7895_v11, %v2253_v22  ;;  %v3345_v62 = vpop.xlane.xlu1 %3344  ;;  %9165 = vst [vmem:[#allocation7_spill] sm:$0xff] %v7990_v25  ;;  %v2972_v36 = vsub.f32 %v7442_v18, %v7990_v25  ;;  %v3451_v51 = vsel %vm2538_vm2, %v5598_v42, 0.0 }
 0x25c   :  { %4054 = vst.msk [vmem:[%s9044_s4 + $0x70] sm:$0xff] %vm4039_vm3, %v3928_v55  ;;  %v3695_v31 = vmul.f32 0.6931472, %v5600_v5  ;;  %5609 = vpow2.f32 %v3153_v13  ;;  %v1192_v24 = vpop.f32.mrb[190].mxu0  ;;  %v2257_v48 = vpop.f32.mrb[190].mxu1 }
 0x25d   :  { %5611 = vlog2.f32 %v3345_v62  ;;  %v2258_v19 = vadd.f32 %v2257_v48, %v1192_v24  ;;  %v4973_v33 = vpop.f32.mrb[191].mxu0  ;;  %v5356_v22 = vpop.f32.mrb[191].mxu1  ;;  %v2821_v54 = vsel %vm2538_vm2, %v7988_v7, -inf  ;;  %v3155_v55 = vmul.f32 1.442695, %v2972_v36 }
 0x25e   :  { %v5602_v59 = vpop.eup %5601  ;;  %v3929_v57 = vadd.f32 %v3695_v31, %v9166_v15  ;;  %3452 = vadd.xlane.f32.xlu1 %v3451_v51  ;;  %2822 = vmax.xlane.f32.xlu0 %v2821_v54  ;;  %v3348_v5 = vpop.xlane.xlu0 %3347  ;;  %v9168_v15 = vld [vmem:[#allocation9_spill] sm:$0xff] }
 0x25f   :  { %v5604_v13 = vpop.eup %5603  ;;  %v8003_v18 = vadd.f32 %v7895_v11, %v2258_v19  ;;  %v8005_v62 = vpop.xlane.xlu1 %2717  ;;  %5613 = vpow2.f32 %v3155_v55  ;;  %v3454_v22 = vsel %vm2538_vm2, %v5602_v59, 0.0 }
 0x260   :  { %9167 = vst [vmem:[#allocation8_spill] sm:$0xff] %v8005_v62  ;;  %4055 = vst.msk [vmem:[%s9044_s4 + $0x78] sm:$0xff] %vm4039_vm3, %v3929_v57  ;;  %v3697_v42 = vmul.f32 0.6931472, %v5604_v13  ;;  %v2973_v31 = vsub.f32 %v7461_v28, %v8005_v62  ;;  %v1197_v36 = vpop.f32.mrb[192].mxu0  ;;  %v2262_v24 = vpop.f32.mrb[192].mxu1  ;;  %5615 = vlog2.f32 %v3348_v5 }
 0x261   :  { %v2263_v48 = vadd.f32 %v2262_v24, %v1197_v36  ;;  %v4976_v33 = vpop.f32.mrb[193].mxu0  ;;  %v5359_v19 = vpop.f32.mrb[193].mxu1  ;;  %v2824_v51 = vsel %vm2538_vm2, %v8003_v18, -inf }
 0x262   :  { %v5606_v54 = vpop.eup %5605  ;;  %v3930_v25 = vadd.f32 %v3697_v42, %v9168_v15  ;;  %v3157_v57 = vmul.f32 1.442695, %v2973_v31  ;;  %3455 = vadd.xlane.f32.xlu0 %v3454_v22  ;;  %2825 = vmax.xlane.f32.xlu1 %v2824_v51  ;;  %v8020_v5 = vpop.xlane.xlu0 %2720  ;;  %v9170_v15 = vld [vmem:[#allocation10_spill] sm:$0xff] }
 0x263   :  { %v5608_v55 = vpop.eup %5607  ;;  %v8018_v28 = vadd.f32 %v7895_v11, %v2263_v48  ;;  %v3351_v13 = vpop.xlane.xlu1 %3350  ;;  %9169 = vst [vmem:[#allocation9_spill] sm:$0xff] %v8020_v5  ;;  %v2974_v42 = vsub.f32 %v7480_v38, %v8020_v5  ;;  %v3457_v19 = vsel %vm2538_vm2, %v5606_v54, 0.0 }
 0x264   :  { %4056 = vst.msk [vmem:[%s9044_s4 + $0x80] sm:$0xff] %vm4039_vm3, %v3930_v25  ;;  %v3699_v59 = vmul.f32 0.6931472, %v5608_v55  ;;  %5617 = vpow2.f32 %v3157_v57  ;;  %v1202_v31 = vpop.f32.mrb[194].mxu0  ;;  %v2267_v36 = vpop.f32.mrb[194].mxu1 }
 0x265   :  { %5619 = vlog2.f32 %v3351_v13  ;;  %v2268_v24 = vadd.f32 %v2267_v36, %v1202_v31  ;;  %v4979_v33 = vpop.f32.mrb[195].mxu0  ;;  %v5362_v48 = vpop.f32.mrb[195].mxu1  ;;  %v2827_v22 = vsel %vm2538_vm2, %v8018_v28, -inf  ;;  %v3159_v25 = vmul.f32 1.442695, %v2974_v42 }
 0x266   :  { %v5610_v51 = vpop.eup %5609  ;;  %v3931_v62 = vadd.f32 %v3699_v59, %v9170_v15  ;;  %3458 = vadd.xlane.f32.xlu1 %v3457_v19  ;;  %2828 = vmax.xlane.f32.xlu0 %v2827_v22  ;;  %v3354_v55 = vpop.xlane.xlu0 %3353  ;;  %v9172_v15 = vld [vmem:[#allocation11_spill] sm:$0xff] }
 0x267   :  { %v5612_v57 = vpop.eup %5611  ;;  %v8033_v38 = vadd.f32 %v7895_v11, %v2268_v24  ;;  %v8035_v13 = vpop.xlane.xlu1 %2723  ;;  %5621 = vpow2.f32 %v3159_v25  ;;  %v3460_v48 = vsel %vm2538_vm2, %v5610_v51, 0.0 }
 0x268   :  { %9171 = vst [vmem:[#allocation10_spill] sm:$0xff] %v8035_v13  ;;  %4057 = vst.msk [vmem:[%s9044_s4 + $0x88] sm:$0xff] %vm4039_vm3, %v3931_v62  ;;  %v3701_v54 = vmul.f32 0.6931472, %v5612_v57  ;;  %v2975_v59 = vsub.f32 %v7504_v53, %v8035_v13  ;;  %v1207_v42 = vpop.f32.mrb[196].mxu0  ;;  %v2272_v31 = vpop.f32.mrb[196].mxu1  ;;  %5623 = vlog2.f32 %v3354_v55 }
 0x269   :  { %v2273_v36 = vadd.f32 %v2272_v31, %v1207_v42  ;;  %v4982_v33 = vpop.f32.mrb[197].mxu0  ;;  %v5365_v24 = vpop.f32.mrb[197].mxu1  ;;  %v2830_v19 = vsel %vm2538_vm2, %v8033_v38, -inf }
 0x26a   :  { %v5614_v22 = vpop.eup %5613  ;;  %v3932_v5 = vadd.f32 %v3701_v54, %v9172_v15  ;;  %v3161_v62 = vmul.f32 1.442695, %v2975_v59  ;;  %3461 = vadd.xlane.f32.xlu0 %v3460_v48  ;;  %2831 = vmax.xlane.f32.xlu1 %v2830_v19  ;;  %v8050_v55 = vpop.xlane.xlu0 %2726  ;;  %v9174_v15 = vld [vmem:[#allocation12_spill] sm:$0xff] }
 0x26b   :  { %v5616_v25 = vpop.eup %5615  ;;  %v8048_v53 = vadd.f32 %v7895_v11, %v2273_v36  ;;  %v3357_v57 = vpop.xlane.xlu1 %3356  ;;  %9173 = vst [vmem:[#allocation11_spill] sm:$0xff] %v8050_v55  ;;  %v2976_v54 = vsub.f32 %v7523_v14, %v8050_v55  ;;  %v3463_v24 = vsel %vm2538_vm2, %v5614_v22, 0.0 }
 0x26c   :  { %4058 = vst.msk [vmem:[%s9044_s4 + $0x90] sm:$0xff] %vm4039_vm3, %v3932_v5  ;;  %v3703_v51 = vmul.f32 0.6931472, %v5616_v25  ;;  %5625 = vpow2.f32 %v3161_v62  ;;  %v1212_v59 = vpop.f32.mrb[198].mxu0  ;;  %v2277_v42 = vpop.f32.mrb[198].mxu1 }
 0x26d   :  { %5627 = vlog2.f32 %v3357_v57  ;;  %v2278_v31 = vadd.f32 %v2277_v42, %v1212_v59  ;;  %v4985_v33 = vpop.f32.mrb[199].mxu0  ;;  %v5368_v36 = vpop.f32.mrb[199].mxu1  ;;  %v2833_v48 = vsel %vm2538_vm2, %v8048_v53, -inf  ;;  %v3163_v5 = vmul.f32 1.442695, %v2976_v54 }
 0x26e   :  { %v5618_v19 = vpop.eup %5617  ;;  %v3933_v13 = vadd.f32 %v3703_v51, %v9174_v15  ;;  %3464 = vadd.xlane.f32.xlu1 %v3463_v24  ;;  %2834 = vmax.xlane.f32.xlu0 %v2833_v48  ;;  %v3360_v25 = vpop.xlane.xlu0 %3359  ;;  %v9176_v15 = vld [vmem:[#allocation13_spill] sm:$0xff] }
 0x26f   :  { %v5620_v62 = vpop.eup %5619  ;;  %v8063_v14 = vadd.f32 %v7895_v11, %v2278_v31  ;;  %v8065_v57 = vpop.xlane.xlu1 %2729  ;;  %5629 = vpow2.f32 %v3163_v5  ;;  %v3466_v36 = vsel %vm2538_vm2, %v5618_v19, 0.0 }
 0x270   :  { %9175 = vst [vmem:[#allocation12_spill] sm:$0xff] %v8065_v57  ;;  %4059 = vst.msk [vmem:[%s9044_s4 + $0x98] sm:$0xff] %vm4039_vm3, %v3933_v13  ;;  %v3705_v22 = vmul.f32 0.6931472, %v5620_v62  ;;  %v2977_v51 = vsub.f32 %v7542_v58, %v8065_v57  ;;  %v1217_v54 = vpop.f32.mrb[200].mxu0  ;;  %v2282_v59 = vpop.f32.mrb[200].mxu1  ;;  %5631 = vlog2.f32 %v3360_v25 }
 0x271   :  { %v2283_v42 = vadd.f32 %v2282_v59, %v1217_v54  ;;  %v4988_v33 = vpop.f32.mrb[201].mxu0  ;;  %v5371_v31 = vpop.f32.mrb[201].mxu1  ;;  %v2836_v24 = vsel %vm2538_vm2, %v8063_v14, -inf }
 0x272   :  { %v5622_v48 = vpop.eup %5621  ;;  %v3934_v55 = vadd.f32 %v3705_v22, %v9176_v15  ;;  %v3165_v13 = vmul.f32 1.442695, %v2977_v51  ;;  %3467 = vadd.xlane.f32.xlu0 %v3466_v36  ;;  %2837 = vmax.xlane.f32.xlu1 %v2836_v24  ;;  %v8080_v25 = vpop.xlane.xlu0 %2732  ;;  %v9178_v15 = vld [vmem:[#allocation14_spill] sm:$0xff] }
 0x273   :  { %v5624_v5 = vpop.eup %5623  ;;  %v8078_v58 = vadd.f32 %v7895_v11, %v2283_v42  ;;  %v3363_v62 = vpop.xlane.xlu1 %3362  ;;  %9177 = vst [vmem:[#allocation13_spill] sm:$0xff] %v8080_v25  ;;  %v2978_v22 = vsub.f32 %v7561_v26, %v8080_v25  ;;  %v3469_v31 = vsel %vm2538_vm2, %v5622_v48, 0.0 }
 0x274   :  { %4060 = vst.msk [vmem:[%s9044_s4 + $0xa0] sm:$0xff] %vm4039_vm3, %v3934_v55  ;;  %v3707_v19 = vmul.f32 0.6931472, %v5624_v5  ;;  %5633 = vpow2.f32 %v3165_v13  ;;  %v1222_v51 = vpop.f32.mrb[202].mxu0  ;;  %v2287_v54 = vpop.f32.mrb[202].mxu1 }
 0x275   :  { %5635 = vlog2.f32 %v3363_v62  ;;  %v2288_v59 = vadd.f32 %v2287_v54, %v1222_v51  ;;  %v4991_v33 = vpop.f32.mrb[203].mxu0  ;;  %v5374_v42 = vpop.f32.mrb[203].mxu1  ;;  %v2839_v36 = vsel %vm2538_vm2, %v8078_v58, -inf  ;;  %v3167_v55 = vmul.f32 1.442695, %v2978_v22 }
 0x276   :  { %v5626_v24 = vpop.eup %5625  ;;  %v3935_v57 = vadd.f32 %v3707_v19, %v9178_v15  ;;  %3470 = vadd.xlane.f32.xlu1 %v3469_v31  ;;  %2840 = vmax.xlane.f32.xlu0 %v2839_v36  ;;  %v3366_v5 = vpop.xlane.xlu0 %3365  ;;  %v9180_v15 = vld [vmem:[#allocation15_spill] sm:$0xff] }
 0x277   :  { %v5628_v13 = vpop.eup %5627  ;;  %v8093_v26 = vadd.f32 %v7895_v11, %v2288_v59  ;;  %v8095_v62 = vpop.xlane.xlu1 %2735  ;;  %5637 = vpow2.f32 %v3167_v55  ;;  %v3472_v42 = vsel %vm2538_vm2, %v5626_v24, 0.0 }
 0x278   :  { %9179 = vst [vmem:[#allocation14_spill] sm:$0xff] %v8095_v62  ;;  %4061 = vst.msk [vmem:[%s9044_s4 + $0xa8] sm:$0xff] %vm4039_vm3, %v3935_v57  ;;  %v3709_v48 = vmul.f32 0.6931472, %v5628_v13  ;;  %v2979_v19 = vsub.f32 %v7580_v8, %v8095_v62  ;;  %v1227_v22 = vpop.f32.mrb[204].mxu0  ;;  %v2292_v51 = vpop.f32.mrb[204].mxu1  ;;  %5639 = vlog2.f32 %v3366_v5 }
 0x279   :  { %v2293_v54 = vadd.f32 %v2292_v51, %v1227_v22  ;;  %v4994_v33 = vpop.f32.mrb[205].mxu0  ;;  %v5377_v59 = vpop.f32.mrb[205].mxu1  ;;  %v2842_v31 = vsel %vm2538_vm2, %v8093_v26, -inf }
 0x27a   :  { %v5630_v36 = vpop.eup %5629  ;;  %v3936_v25 = vadd.f32 %v3709_v48, %v9180_v15  ;;  %v3169_v57 = vmul.f32 1.442695, %v2979_v19  ;;  %3473 = vadd.xlane.f32.xlu0 %v3472_v42  ;;  %2843 = vmax.xlane.f32.xlu1 %v2842_v31  ;;  %v8110_v5 = vpop.xlane.xlu0 %2738  ;;  %v9182_v15 = vld [vmem:[#allocation16_spill] sm:$0xff] }
 0x27b   :  { %v5632_v55 = vpop.eup %5631  ;;  %v8108_v8 = vadd.f32 %v7895_v11, %v2293_v54  ;;  %v3369_v13 = vpop.xlane.xlu1 %3368  ;;  %9181 = vst [vmem:[#allocation15_spill] sm:$0xff] %v8110_v5  ;;  %v2980_v48 = vsub.f32 %v7599_v30, %v8110_v5  ;;  %v3475_v59 = vsel %vm2538_vm2, %v5630_v36, 0.0 }
 0x27c   :  { %4062 = vst.msk [vmem:[%s9044_s4 + $0xb0] sm:$0xff] %vm4039_vm3, %v3936_v25  ;;  %v3711_v24 = vmul.f32 0.6931472, %v5632_v55  ;;  %5641 = vpow2.f32 %v3169_v57  ;;  %v1232_v19 = vpop.f32.mrb[206].mxu0  ;;  %v2297_v22 = vpop.f32.mrb[206].mxu1 }
 0x27d   :  { %5643 = vlog2.f32 %v3369_v13  ;;  %v2298_v51 = vadd.f32 %v2297_v22, %v1232_v19  ;;  %v4997_v33 = vpop.f32.mrb[207].mxu0  ;;  %v5380_v54 = vpop.f32.mrb[207].mxu1  ;;  %v2845_v42 = vsel %vm2538_vm2, %v8108_v8, -inf  ;;  %v3171_v25 = vmul.f32 1.442695, %v2980_v48 }
 0x27e   :  { %v5634_v31 = vpop.eup %5633  ;;  %v3937_v62 = vadd.f32 %v3711_v24, %v9182_v15  ;;  %3476 = vadd.xlane.f32.xlu1 %v3475_v59  ;;  %2846 = vmax.xlane.f32.xlu0 %v2845_v42  ;;  %v3372_v55 = vpop.xlane.xlu0 %3371  ;;  %v9184_v15 = vld [vmem:[#allocation17_spill] sm:$0xff] }
 0x27f   :  { %v5636_v57 = vpop.eup %5635  ;;  %v8123_v30 = vadd.f32 %v7895_v11, %v2298_v51  ;;  %v8125_v13 = vpop.xlane.xlu1 %2741  ;;  %5645 = vpow2.f32 %v3171_v25  ;;  %v3478_v54 = vsel %vm2538_vm2, %v5634_v31, 0.0 }
 0x280   :  { %9183 = vst [vmem:[#allocation16_spill] sm:$0xff] %v8125_v13  ;;  %4063 = vst.msk [vmem:[%s9044_s4 + $0xb8] sm:$0xff] %vm4039_vm3, %v3937_v62  ;;  %v3713_v36 = vmul.f32 0.6931472, %v5636_v57  ;;  %v2981_v24 = vsub.f32 %v7618_v41, %v8125_v13  ;;  %v1237_v48 = vpop.f32.mrb[208].mxu0  ;;  %v2302_v19 = vpop.f32.mrb[208].mxu1  ;;  %5647 = vlog2.f32 %v3372_v55 }
 0x281   :  { %v2303_v22 = vadd.f32 %v2302_v19, %v1237_v48  ;;  %v5000_v33 = vpop.f32.mrb[209].mxu0  ;;  %v5383_v51 = vpop.f32.mrb[209].mxu1  ;;  %v2848_v59 = vsel %vm2538_vm2, %v8123_v30, -inf }
 0x282   :  { %v5638_v42 = vpop.eup %5637  ;;  %v3938_v5 = vadd.f32 %v3713_v36, %v9184_v15  ;;  %v3173_v62 = vmul.f32 1.442695, %v2981_v24  ;;  %3479 = vadd.xlane.f32.xlu0 %v3478_v54  ;;  %2849 = vmax.xlane.f32.xlu1 %v2848_v59  ;;  %v8140_v55 = vpop.xlane.xlu0 %2744  ;;  %v9186_v15 = vld [vmem:[#allocation18_spill] sm:$0xff] }
 0x283   :  { %v5640_v25 = vpop.eup %5639  ;;  %v8138_v41 = vadd.f32 %v7895_v11, %v2303_v22  ;;  %v3375_v57 = vpop.xlane.xlu1 %3374  ;;  %9185 = vst [vmem:[#allocation17_spill] sm:$0xff] %v8140_v55  ;;  %v2982_v36 = vsub.f32 %v7637_v1, %v8140_v55  ;;  %v3481_v51 = vsel %vm2538_vm2, %v5638_v42, 0.0 }
 0x284   :  { %4064 = vst.msk [vmem:[%s9044_s4 + $0xc0] sm:$0xff] %vm4039_vm3, %v3938_v5  ;;  %v3715_v31 = vmul.f32 0.6931472, %v5640_v25  ;;  %5649 = vpow2.f32 %v3173_v62  ;;  %v1242_v24 = vpop.f32.mrb[210].mxu0  ;;  %v2307_v48 = vpop.f32.mrb[210].mxu1 }
 0x285   :  { %5651 = vlog2.f32 %v3375_v57  ;;  %v2308_v19 = vadd.f32 %v2307_v48, %v1242_v24  ;;  %v5003_v33 = vpop.f32.mrb[211].mxu0  ;;  %v5386_v22 = vpop.f32.mrb[211].mxu1  ;;  %v2851_v54 = vsel %vm2538_vm2, %v8138_v41, -inf  ;;  %v3175_v5 = vmul.f32 1.442695, %v2982_v36 }
 0x286   :  { %v5642_v59 = vpop.eup %5641  ;;  %v3939_v13 = vadd.f32 %v3715_v31, %v9186_v15  ;;  %3482 = vadd.xlane.f32.xlu1 %v3481_v51  ;;  %2852 = vmax.xlane.f32.xlu0 %v2851_v54  ;;  %v3378_v25 = vpop.xlane.xlu0 %3377  ;;  %v9188_v15 = vld [vmem:[#allocation19_spill] sm:$0xff] }
 0x287   :  { %v5644_v62 = vpop.eup %5643  ;;  %v8153_v1 = vadd.f32 %v7895_v11, %v2308_v19  ;;  %v8155_v57 = vpop.xlane.xlu1 %2747  ;;  %5653 = vpow2.f32 %v3175_v5  ;;  %v3484_v22 = vsel %vm2538_vm2, %v5642_v59, 0.0 }
 0x288   :  { %9187 = vst [vmem:[#allocation18_spill] sm:$0xff] %v8155_v57  ;;  %4065 = vst.msk [vmem:[%s9044_s4 + $0xc8] sm:$0xff] %vm4039_vm3, %v3939_v13  ;;  %v3717_v42 = vmul.f32 0.6931472, %v5644_v62  ;;  %v2983_v31 = vsub.f32 %v7652_v49, %v8155_v57  ;;  %v1247_v36 = vpop.f32.mrb[212].mxu0  ;;  %v2312_v24 = vpop.f32.mrb[212].mxu1  ;;  %5655 = vlog2.f32 %v3378_v25 }
 0x289   :  { %v2313_v48 = vadd.f32 %v2312_v24, %v1247_v36  ;;  %v5006_v33 = vpop.f32.mrb[213].mxu0  ;;  %v5389_v19 = vpop.f32.mrb[213].mxu1  ;;  %v2854_v51 = vsel %vm2538_vm2, %v8153_v1, -inf }
 0x28a   :  { %v5646_v54 = vpop.eup %5645  ;;  %v3940_v55 = vadd.f32 %v3717_v42, %v9188_v15  ;;  %v3177_v13 = vmul.f32 1.442695, %v2983_v31  ;;  %3485 = vadd.xlane.f32.xlu0 %v3484_v22  ;;  %2855 = vmax.xlane.f32.xlu1 %v2854_v51  ;;  %v8170_v25 = vpop.xlane.xlu0 %2750  ;;  %v9190_v15 = vld [vmem:[#allocation20_spill] sm:$0xff] }
 0x28b   :  { %v5648_v5 = vpop.eup %5647  ;;  %v8168_v49 = vadd.f32 %v7895_v11, %v2313_v48  ;;  %v3381_v62 = vpop.xlane.xlu1 %3380  ;;  %9189 = vst [vmem:[#allocation19_spill] sm:$0xff] %v8170_v25  ;;  %v2984_v42 = vsub.f32 %v7668_v39, %v8170_v25  ;;  %v3487_v19 = vsel %vm2538_vm2, %v5646_v54, 0.0 }
 0x28c   :  { %4066 = vst.msk [vmem:[%s9044_s4 + $0xd0] sm:$0xff] %vm4039_vm3, %v3940_v55  ;;  %v3719_v59 = vmul.f32 0.6931472, %v5648_v5  ;;  %5657 = vpow2.f32 %v3177_v13  ;;  %v1252_v31 = vpop.f32.mrb[214].mxu0  ;;  %v2317_v36 = vpop.f32.mrb[214].mxu1 }
 0x28d   :  { %5659 = vlog2.f32 %v3381_v62  ;;  %v2318_v24 = vadd.f32 %v2317_v36, %v1252_v31  ;;  %v5009_v33 = vpop.f32.mrb[215].mxu0  ;;  %v5392_v48 = vpop.f32.mrb[215].mxu1  ;;  %v2857_v22 = vsel %vm2538_vm2, %v8168_v49, -inf  ;;  %v3179_v55 = vmul.f32 1.442695, %v2984_v42 }
 0x28e   :  { %v5650_v51 = vpop.eup %5649  ;;  %v3941_v57 = vadd.f32 %v3719_v59, %v9190_v15  ;;  %3488 = vadd.xlane.f32.xlu1 %v3487_v19  ;;  %2858 = vmax.xlane.f32.xlu0 %v2857_v22  ;;  %v3384_v5 = vpop.xlane.xlu0 %3383  ;;  %v9192_v15 = vld [vmem:[#allocation21_spill] sm:$0xff] }
 0x28f   :  { %v5652_v13 = vpop.eup %5651  ;;  %v8183_v39 = vadd.f32 %v7895_v11, %v2318_v24  ;;  %v8185_v62 = vpop.xlane.xlu1 %2753  ;;  %5661 = vpow2.f32 %v3179_v55  ;;  %v3490_v48 = vsel %vm2538_vm2, %v5650_v51, 0.0 }
 0x290   :  { %9191 = vst [vmem:[#allocation20_spill] sm:$0xff] %v8185_v62  ;;  %4067 = vst.msk [vmem:[%s9044_s4 + $0xd8] sm:$0xff] %vm4039_vm3, %v3941_v57  ;;  %v3721_v54 = vmul.f32 0.6931472, %v5652_v13  ;;  %v2985_v59 = vsub.f32 %v7682_v40, %v8185_v62  ;;  %v1257_v42 = vpop.f32.mrb[216].mxu0  ;;  %v2322_v31 = vpop.f32.mrb[216].mxu1  ;;  %5663 = vlog2.f32 %v3384_v5 }
 0x291   :  { %v2323_v36 = vadd.f32 %v2322_v31, %v1257_v42  ;;  %v5012_v33 = vpop.f32.mrb[217].mxu0  ;;  %v5395_v24 = vpop.f32.mrb[217].mxu1  ;;  %v2860_v19 = vsel %vm2538_vm2, %v8183_v39, -inf }
 0x292   :  { %v5654_v22 = vpop.eup %5653  ;;  %v3942_v25 = vadd.f32 %v3721_v54, %v9192_v15  ;;  %v3181_v57 = vmul.f32 1.442695, %v2985_v59  ;;  %3491 = vadd.xlane.f32.xlu0 %v3490_v48  ;;  %2861 = vmax.xlane.f32.xlu1 %v2860_v19  ;;  %v8200_v5 = vpop.xlane.xlu0 %2756  ;;  %v9194_v15 = vld [vmem:[#allocation22_spill] sm:$0xff] }
 0x293   :  { %v5656_v55 = vpop.eup %5655  ;;  %v8198_v40 = vadd.f32 %v7895_v11, %v2323_v36  ;;  %v3387_v13 = vpop.xlane.xlu1 %3386  ;;  %9193 = vst [vmem:[#allocation21_spill] sm:$0xff] %v8200_v5  ;;  %v2986_v54 = vsub.f32 %v7692_v34, %v8200_v5  ;;  %v3493_v24 = vsel %vm2538_vm2, %v5654_v22, 0.0 }
 0x294   :  { %4068 = vst.msk [vmem:[%s9044_s4 + $0xe0] sm:$0xff] %vm4039_vm3, %v3942_v25  ;;  %v3723_v51 = vmul.f32 0.6931472, %v5656_v55  ;;  %5665 = vpow2.f32 %v3181_v57  ;;  %v1262_v59 = vpop.f32.mrb[218].mxu0  ;;  %v2327_v42 = vpop.f32.mrb[218].mxu1 }
 0x295   :  { %5667 = vlog2.f32 %v3387_v13  ;;  %v2328_v31 = vadd.f32 %v2327_v42, %v1262_v59  ;;  %v5015_v33 = vpop.f32.mrb[219].mxu0  ;;  %v5398_v36 = vpop.f32.mrb[219].mxu1  ;;  %v2863_v48 = vsel %vm2538_vm2, %v8198_v40, -inf  ;;  %v3183_v25 = vmul.f32 1.442695, %v2986_v54 }
 0x296   :  { %v5658_v19 = vpop.eup %5657  ;;  %v3943_v62 = vadd.f32 %v3723_v51, %v9194_v15  ;;  %3494 = vadd.xlane.f32.xlu1 %v3493_v24  ;;  %2864 = vmax.xlane.f32.xlu0 %v2863_v48  ;;  %v3390_v55 = vpop.xlane.xlu0 %3389  ;;  %v9196_v15 = vld [vmem:[#allocation23_spill] sm:$0xff] }
 0x297   :  { %v5660_v57 = vpop.eup %5659  ;;  %v8213_v34 = vadd.f32 %v7895_v11, %v2328_v31  ;;  %v8215_v13 = vpop.xlane.xlu1 %2759  ;;  %5669 = vpow2.f32 %v3183_v25  ;;  %v3496_v36 = vsel %vm2538_vm2, %v5658_v19, 0.0 }
 0x298   :  { %9195 = vst [vmem:[#allocation22_spill] sm:$0xff] %v8215_v13  ;;  %4069 = vst.msk [vmem:[%s9044_s4 + $0xe8] sm:$0xff] %vm4039_vm3, %v3943_v62  ;;  %v3725_v22 = vmul.f32 0.6931472, %v5660_v57  ;;  %v2987_v51 = vsub.f32 %v7702_v45, %v8215_v13  ;;  %v1267_v54 = vpop.f32.mrb[220].mxu0  ;;  %v2332_v59 = vpop.f32.mrb[220].mxu1  ;;  %5671 = vlog2.f32 %v3390_v55 }
 0x299   :  { %v2333_v42 = vadd.f32 %v2332_v59, %v1267_v54  ;;  %v5018_v33 = vpop.f32.mrb[221].mxu0  ;;  %v5401_v31 = vpop.f32.mrb[221].mxu1  ;;  %v2866_v24 = vsel %vm2538_vm2, %v8213_v34, -inf }
 0x29a   :  { %v5662_v48 = vpop.eup %5661  ;;  %v3944_v5 = vadd.f32 %v3725_v22, %v9196_v15  ;;  %v3185_v62 = vmul.f32 1.442695, %v2987_v51  ;;  %3497 = vadd.xlane.f32.xlu0 %v3496_v36  ;;  %2867 = vmax.xlane.f32.xlu1 %v2866_v24  ;;  %v8230_v55 = vpop.xlane.xlu0 %2762  ;;  %v9198_v15 = vld [vmem:[#allocation24_spill] sm:$0xff] }
 0x29b   :  { %v5664_v25 = vpop.eup %5663  ;;  %v8228_v45 = vadd.f32 %v7895_v11, %v2333_v42  ;;  %v3393_v57 = vpop.xlane.xlu1 %3392  ;;  %9197 = vst [vmem:[#allocation23_spill] sm:$0xff] %v8230_v55  ;;  %v2988_v22 = vsub.f32 %v7712_v27, %v8230_v55  ;;  %v3499_v31 = vsel %vm2538_vm2, %v5662_v48, 0.0 }
 0x29c   :  { %4070 = vst.msk [vmem:[%s9044_s4 + $0xf0] sm:$0xff] %vm4039_vm3, %v3944_v5  ;;  %v3727_v19 = vmul.f32 0.6931472, %v5664_v25  ;;  %5673 = vpow2.f32 %v3185_v62  ;;  %v1272_v51 = vpop.f32.mrb[222].mxu0  ;;  %v2337_v54 = vpop.f32.mrb[222].mxu1 }
 0x29d   :  { %5675 = vlog2.f32 %v3393_v57  ;;  %v2338_v59 = vadd.f32 %v2337_v54, %v1272_v51  ;;  %v5021_v33 = vpop.f32.mrb[223].mxu0  ;;  %v5404_v42 = vpop.f32.mrb[223].mxu1  ;;  %v2869_v36 = vsel %vm2538_vm2, %v8228_v45, -inf  ;;  %v3187_v5 = vmul.f32 1.442695, %v2988_v22 }
 0x29e   :  { %v5666_v24 = vpop.eup %5665  ;;  %v3945_v13 = vadd.f32 %v3727_v19, %v9198_v15  ;;  %3500 = vadd.xlane.f32.xlu1 %v3499_v31  ;;  %2870 = vmax.xlane.f32.xlu0 %v2869_v36  ;;  %v3396_v25 = vpop.xlane.xlu0 %3395  ;;  %v9200_v15 = vld [vmem:[#allocation25_spill] sm:$0xff] }
 0x29f   :  { %v5668_v62 = vpop.eup %5667  ;;  %v8243_v27 = vadd.f32 %v7895_v11, %v2338_v59  ;;  %v8245_v57 = vpop.xlane.xlu1 %2765  ;;  %5677 = vpow2.f32 %v3187_v5  ;;  %v3502_v42 = vsel %vm2538_vm2, %v5666_v24, 0.0 }
 0x2a0   :  { %9199 = vst [vmem:[#allocation24_spill] sm:$0xff] %v8245_v57  ;;  %4071 = vst.msk [vmem:[%s9044_s4 + $0xf8] sm:$0xff] %vm4039_vm3, %v3945_v13  ;;  %v3729_v48 = vmul.f32 0.6931472, %v5668_v62  ;;  %v2989_v19 = vsub.f32 %v7722_v3, %v8245_v57  ;;  %v1277_v22 = vpop.f32.mrb[224].mxu0  ;;  %v2342_v51 = vpop.f32.mrb[224].mxu1  ;;  %5679 = vlog2.f32 %v3396_v25 }
 0x2a1   :  { %v2343_v54 = vadd.f32 %v2342_v51, %v1277_v22  ;;  %v5024_v33 = vpop.f32.mrb[225].mxu0  ;;  %v5407_v59 = vpop.f32.mrb[225].mxu1  ;;  %v2872_v31 = vsel %vm2538_vm2, %v8243_v27, -inf }
 0x2a2   :  { %v5670_v36 = vpop.eup %5669  ;;  %v3946_v55 = vadd.f32 %v3729_v48, %v9200_v15  ;;  %v3189_v13 = vmul.f32 1.442695, %v2989_v19  ;;  %3503 = vadd.xlane.f32.xlu0 %v3502_v42  ;;  %2873 = vmax.xlane.f32.xlu1 %v2872_v31  ;;  %v8260_v25 = vpop.xlane.xlu0 %2768 }
 0x2a3   :  { %v5672_v5 = vpop.eup %5671  ;;  %v8258_v3 = vadd.f32 %v7895_v11, %v2343_v54  ;;  %v3399_v62 = vpop.xlane.xlu1 %3398  ;;  %9201 = vst [vmem:[#allocation25_spill] sm:$0xff] %v8260_v25  ;;  %v2990_v48 = vsub.f32 %v7732_v20, %v8260_v25  ;;  %v3505_v54 = vsel %vm2538_vm2, %v5670_v36, 0.0  ;;  %v8275_v20 = vld [vmem:[%s9043_s3] ss:$0 sm:$0xff] }
 0x2a4   :  { %4072 = vst.msk [vmem:[%s9044_s4 + $0x100] sm:$0xff] %vm4039_vm3, %v3946_v55  ;;  %v3731_v24 = vmul.f32 0.6931472, %v5672_v5  ;;  %5681 = vpow2.f32 %v3189_v13  ;;  %v1282_v19 = vpop.f32.mrb[226].mxu0  ;;  %v2347_v22 = vpop.f32.mrb[226].mxu1 }
 0x2a5   :  { %5683 = vlog2.f32 %v3399_v62  ;;  %v2348_v51 = vadd.f32 %v2347_v22, %v1282_v19  ;;  %v5027_v33 = vpop.f32.mrb[227].mxu0  ;;  %v5410_v11 = vpop.f32.mrb[227].mxu1  ;;  %v2875_v59 = vsel %vm2538_vm2, %v8258_v3, -inf  ;;  %v3191_v55 = vmul.f32 1.442695, %v2990_v48 }
 0x2a6   :  { %v5674_v42 = vpop.eup %5673  ;;  %v3947_v31 = vadd.f32 %v3731_v24, %v7654_v47  ;;  %3506 = vadd.xlane.f32.xlu1 %v3505_v54  ;;  %2876 = vmax.xlane.f32.xlu0 %v2875_v59  ;;  %v3402_v5 = vpop.xlane.xlu0 %3401  ;;  %v9203_v59 = vld [vmem:[#allocation26_spill] sm:$0xff] }
 0x2a7   :  { %v5676_v15 = vpop.eup %5675  ;;  %v8278_v13 = vadd.f32 %v8275_v20, %v2348_v51  ;;  %v8280_v36 = vpop.xlane.xlu1 %2771  ;;  %5685 = vpow2.f32 %v3191_v55  ;;  %v3508_v33 = vsel %vm2538_vm2, %v5674_v42, 0.0 }
 0x2a8   :  { %9202 = vst [vmem:[#allocation38_spill] sm:$0xff] %v8280_v36  ;;  %4073 = vst.msk [vmem:[%s9044_s4 + $0x108] sm:$0xff] %vm4039_vm3, %v3947_v31  ;;  %v3733_v47 = vmul.f32 0.6931472, %v5676_v15  ;;  %v2991_v62 = vsub.f32 %v7742_v37, %v8280_v36  ;;  %v1287_v24 = vpop.f32.mrb[228].mxu0  ;;  %v2352_v48 = vpop.f32.mrb[228].mxu1  ;;  %5687 = vlog2.f32 %v3402_v5 }
 0x2a9   :  { %v2353_v19 = vadd.f32 %v2352_v48, %v1287_v24  ;;  %v5030_v22 = vpop.f32.mrb[229].mxu0  ;;  %v5413_v51 = vpop.f32.mrb[229].mxu1  ;;  %v2878_v11 = vsel %vm2538_vm2, %v8278_v13, -inf  ;;  %v9205_v24 = vld [vmem:[#allocation34_spill] sm:$0xff]  ;;  %v9206_v36 = vld [vmem:[#allocation27_spill] sm:$0xff] }
 0x2aa   :  { %v5678_v54 = vpop.eup %5677  ;;  %v3948_v25 = vadd.f32 %v3733_v47, %v9203_v59  ;;  %v3193_v31 = vmul.f32 1.442695, %v2991_v62  ;;  %3509 = vadd.xlane.f32.xlu0 %v3508_v33  ;;  %2879 = vmax.xlane.f32.xlu1 %v2878_v11  ;;  %v8295_v5 = vpop.xlane.xlu0 %2774 }
 0x2ab   :  { %v5680_v55 = vpop.eup %5679  ;;  %v8293_v37 = vadd.f32 %v8275_v20, %v2353_v19  ;;  %v3405_v15 = vpop.xlane.xlu1 %3404  ;;  %9204 = vst [vmem:[#allocation26_spill] sm:$0xff] %v8295_v5  ;;  %v2992_v47 = vsub.f32 %v9205_v24, %v8295_v5  ;;  %v3511_v33 = vsel %vm2538_vm2, %v5678_v54, 0.0 }
 0x2ac   :  { %4074 = vst.msk [vmem:[%s9044_s4 + $0x110] sm:$0xff] %vm4039_vm3, %v3948_v25  ;;  %v3735_v42 = vmul.f32 0.6931472, %v5680_v55  ;;  %5689 = vpow2.f32 %v3193_v31  ;;  %v1292_v62 = vpop.f32.mrb[230].mxu0  ;;  %v2357_v48 = vpop.f32.mrb[230].mxu1 }
 0x2ad   :  { %5691 = vlog2.f32 %v3405_v15  ;;  %v2358_v22 = vadd.f32 %v2357_v48, %v1292_v62  ;;  %v5033_v51 = vpop.f32.mrb[231].mxu0  ;;  %v5416_v19 = vpop.f32.mrb[231].mxu1  ;;  %v2881_v11 = vsel %vm2538_vm2, %v8293_v37, -inf  ;;  %v3195_v25 = vmul.f32 1.442695, %v2992_v47 }
 0x2ae   :  { %v5682_v59 = vpop.eup %5681  ;;  %v3949_v57 = vadd.f32 %v3735_v42, %v9206_v36  ;;  %3512 = vadd.xlane.f32.xlu1 %v3511_v33  ;;  %2882 = vmax.xlane.f32.xlu0 %v2881_v11  ;;  %v3408_v24 = vpop.xlane.xlu0 %3407  ;;  %v9208_v11 = vld [vmem:[#allocation28_spill] sm:$0xff] }
 0x2af   :  { %v5684_v31 = vpop.eup %5683  ;;  %v8308_v55 = vadd.f32 %v8275_v20, %v2358_v22  ;;  %v8310_v15 = vpop.xlane.xlu1 %2777  ;;  %5693 = vpow2.f32 %v3195_v25  ;;  %v3514_v51 = vsel %vm2538_vm2, %v5682_v59, 0.0 }
 0x2b0   :  { %9207 = vst [vmem:[#allocation34_spill] sm:$0xff] %v8310_v15  ;;  %4075 = vst.msk [vmem:[%s9044_s4 + $0x118] sm:$0xff] %vm4039_vm3, %v3949_v57  ;;  %v3737_v54 = vmul.f32 0.6931472, %v5684_v31  ;;  %v2993_v36 = vsub.f32 %v7762_v32, %v8310_v15  ;;  %v1297_v42 = vpop.f32.mrb[232].mxu0  ;;  %v2362_v47 = vpop.f32.mrb[232].mxu1  ;;  %5695 = vlog2.f32 %v3408_v24 }
 0x2b1   :  { %v2363_v62 = vadd.f32 %v2362_v47, %v1297_v42  ;;  %v5036_v48 = vpop.f32.mrb[233].mxu0  ;;  %v5419_v22 = vpop.f32.mrb[233].mxu1  ;;  %v2884_v19 = vsel %vm2538_vm2, %v8308_v55, -inf }
 0x2b2   :  { %v5686_v33 = vpop.eup %5685  ;;  %v3950_v5 = vadd.f32 %v3737_v54, %v9208_v11  ;;  %v3197_v57 = vmul.f32 1.442695, %v2993_v36  ;;  %3515 = vadd.xlane.f32.xlu0 %v3514_v51  ;;  %2885 = vmax.xlane.f32.xlu1 %v2884_v19  ;;  %v1302_v36 = vpop.f32.mrb[234].mxu0  ;;  %v9211_v11 = vld [vmem:[#allocation29_spill] sm:$0xff] }
 0x2b3   :  { %v5688_v25 = vpop.eup %5687  ;;  %v8323_v32 = vadd.f32 %v8275_v20, %v2363_v62  ;;  %v3411_v31 = vpop.xlane.xlu1 %3410  ;;  %v3517_v22 = vsel %vm2538_vm2, %v5686_v33, 0.0 }
 0x2b4   :  { %v8325_v24 = vpop.xlane.xlu0 %2780  ;;  %4076 = vst.msk [vmem:[%s9044_s4 + $0x120] sm:$0xff] %vm4039_vm3, %v3950_v5  ;;  %v3739_v59 = vmul.f32 0.6931472, %v5688_v25  ;;  %5697 = vpow2.f32 %v3197_v57  ;;  %v2367_v42 = vpop.f32.mrb[234].mxu1 }
 0x2b5   :  { %9209 = vst [vmem:[#allocation27_spill] sm:$0xff] %v8323_v32  ;;  %9210 = vst [vmem:[#allocation28_spill] sm:$0xff] %v8325_v24  ;;  %v2994_v54 = vsub.f32 %v7773_v35, %v8325_v24  ;;  %5699 = vlog2.f32 %v3411_v31  ;;  %v2368_v47 = vadd.f32 %v2367_v42, %v1302_v36  ;;  %v5039_v48 = vpop.f32.mrb[235].mxu0  ;;  %v5422_v62 = vpop.f32.mrb[235].mxu1  ;;  %v2887_v51 = vsel %vm2538_vm2, %v8323_v32, -inf }
 0x2b6   :  { %v5690_v19 = vpop.eup %5689  ;;  %v3951_v15 = vadd.f32 %v3739_v59, %v9211_v11  ;;  %3518 = vadd.xlane.f32.xlu1 %v3517_v22  ;;  %2888 = vmax.xlane.f32.xlu0 %v2887_v51  ;;  %v1307_v36 = vpop.f32.mrb[236].mxu0  ;;  %v9214_v51 = vld [vmem:[#allocation30_spill] sm:$0xff] }
 0x2b7   :  { %v3199_v5 = vmul.f32 1.442695, %v2994_v54  ;;  %v5692_v57 = vpop.eup %5691  ;;  %v8338_v35 = vadd.f32 %v8275_v20, %v2368_v47  ;;  %v8340_v31 = vpop.xlane.xlu1 %2783  ;;  %v3520_v62 = vsel %vm2538_vm2, %v5690_v19, 0.0 }
 0x2b8   :  { %v3414_v25 = vpop.xlane.xlu0 %3413  ;;  %9213 = vst [vmem:[#allocation39_spill] sm:$0xff] %v8340_v31  ;;  %4077 = vst.msk [vmem:[%s9044_s4 + $0x128] sm:$0xff] %vm4039_vm3, %v3951_v15  ;;  %v3741_v33 = vmul.f32 0.6931472, %v5692_v57  ;;  %v2372_v42 = vpop.f32.mrb[236].mxu1 }
 0x2b9   :  { %9212 = vst [vmem:[#allocation29_spill] sm:$0xff] %v8338_v35  ;;  %5701 = vpow2.f32 %v3199_v5  ;;  %v2373_v59 = vadd.f32 %v2372_v42, %v1307_v36  ;;  %v5042_v54 = vpop.f32.mrb[237].mxu0  ;;  %v5425_v48 = vpop.f32.mrb[237].mxu1  ;;  %v2890_v47 = vsel %vm2538_vm2, %v8338_v35, -inf }
 0x2ba   :  { %5703 = vlog2.f32 %v3414_v25  ;;  %v5694_v22 = vpop.eup %5693  ;;  %v3952_v11 = vadd.f32 %v3741_v33, %v9214_v51  ;;  %3521 = vadd.xlane.f32.xlu0 %v3520_v62  ;;  %2891 = vmax.xlane.f32.xlu1 %v2890_v47  ;;  %v1312_v25 = vpop.f32.mrb[238].mxu0  ;;  %v9217_v47 = vld [vmem:[#allocation31_spill] sm:$0xff] }
 0x2bb   :  { %v5696_v24 = vpop.eup %5695  ;;  %v8351_v15 = vadd.f32 %v8275_v20, %v2373_v59  ;;  %v3417_v5 = vpop.xlane.xlu1 %3416  ;;  %v3523_v48 = vsel %vm2538_vm2, %v5694_v22, 0.0 }
 0x2bc   :  { %v8353_v57 = vpop.xlane.xlu0 %2786  ;;  %4078 = vst.msk [vmem:[%s9044_s4 + $0x130] sm:$0xff] %vm4039_vm3, %v3952_v11  ;;  %v3743_v19 = vmul.f32 0.6931472, %v5696_v24  ;;  %v2377_v36 = vpop.f32.mrb[238].mxu1  ;;  %5705 = vlog2.f32 %v3417_v5 }
 0x2bd   :  { %9215 = vst [vmem:[#allocation30_spill] sm:$0xff] %v8351_v15  ;;  %9216 = vst [vmem:[#allocation40_spill] sm:$0xff] %v8353_v57  ;;  %v2378_v42 = vadd.f32 %v2377_v36, %v1312_v25  ;;  %v5045_v33 = vpop.f32.mrb[239].mxu0  ;;  %v5428_v54 = vpop.f32.mrb[239].mxu1  ;;  %v2893_v59 = vsel %vm2538_vm2, %v8351_v15, -inf  ;;  %v2996_v5 = vsub.f32 %v7803_v9, %v8353_v57  ;;  %v2995_v9 = vsub.f32 %v7788_v17, %v8340_v31  ;;  %v9220_v31 = vld [vmem:[#allocation33_spill] sm:$0xff] }
 0x2be   :  { %v5698_v62 = vpop.eup %5697  ;;  %v3953_v51 = vadd.f32 %v3743_v19, %v9217_v47  ;;  %3524 = vadd.xlane.f32.xlu1 %v3523_v48  ;;  %2894 = vmax.xlane.f32.xlu0 %v2893_v59  ;;  %v1317_v25 = vpop.f32.mrb[240].mxu0  ;;  %v9219_v47 = vld [vmem:[#allocation32_spill] sm:$0xff] }
 0x2bf   :  { %v5700_v35 = vpop.eup %5699  ;;  %v8364_v11 = vadd.f32 %v8275_v20, %v2378_v42  ;;  %v8366_v32 = vpop.xlane.xlu1 %2789  ;;  %v3526_v42 = vsel %vm2538_vm2, %v5698_v62, 0.0 }
 0x2c0   :  { %v3420_v24 = vpop.xlane.xlu0 %3419  ;;  %9218 = vst [vmem:[#allocation31_spill] sm:$0xff] %v8366_v32  ;;  %4079 = vst.msk [vmem:[%s9044_s4 + $0x138] sm:$0xff] %vm4039_vm3, %v3953_v51  ;;  %v3745_v22 = vmul.f32 0.6931472, %v5700_v35  ;;  %v2382_v19 = vpop.f32.mrb[240].mxu1 }
 0x2c1   :  { %5707 = vlog2.f32 %v3420_v24  ;;  %v2383_v36 = vadd.f32 %v2382_v19, %v1317_v25  ;;  %v5048_v33 = vpop.f32.mrb[241].mxu0  ;;  %v5431_v54 = vpop.f32.mrb[241].mxu1  ;;  %v2896_v48 = vsel %vm2538_vm2, %v8364_v11, -inf  ;;  %v3203_v19 = vmul.f32 1.442695, %v2996_v5 }
 0x2c2   :  { %v3954_v15 = vadd.f32 %v3745_v22, %v9219_v47  ;;  %3527 = vadd.xlane.f32.xlu0 %v3526_v42  ;;  %2897 = vmax.xlane.f32.xlu1 %v2896_v48  ;;  %v1322_v33 = vpop.f32.mrb[242].mxu0  ;;  %v3201_v5 = vmul.f32 1.442695, %v2995_v9 }
 0x2c3   :  { %v5702_v59 = vpop.eup %5701  ;;  %v8381_v51 = vadd.f32 %v8275_v20, %v2383_v36  ;;  %v3423_v24 = vpop.xlane.xlu1 %3422 }
 0x2c4   :  { %v5704_v35 = vpop.eup %5703  ;;  %v8383_v25 = vpop.xlane.xlu0 %2792  ;;  %4080 = vst.msk [vmem:[%s9044_s4 + $0x140] sm:$0xff] %vm4039_vm3, %v3954_v15  ;;  %5709 = vlog2.f32 %v3423_v24  ;;  %v3529_v48 = vsel %vm2538_vm2, %v5702_v59, 0.0 }
 0x2c5   :  { %v3747_v62 = vmul.f32 0.6931472, %v5704_v35  ;;  %v2998_v22 = vsub.f32 %v7833_v52, %v8383_v25  ;;  %v2387_v54 = vpop.f32.mrb[242].mxu1  ;;  %v5051_v42 = vpop.f32.mrb[243].mxu0  ;;  %v2899_v47 = vsel %vm2538_vm2, %v8381_v51, -inf  ;;  %v2997_v52 = vsub.f32 %v7818_v56, %v8366_v32 }
 0x2c6   :  { %v2388_v17 = vadd.f32 %v2387_v54, %v1322_v33  ;;  %v5434_v36 = vpop.f32.mrb[243].mxu1  ;;  %3530 = vadd.xlane.f32.xlu1 %v3529_v48  ;;  %2900 = vmax.xlane.f32.xlu0 %v2899_v47  ;;  %v5706_v15 = vpop.eup %5705  ;;  %5711 = vpow2.f32 %v3203_v19 }
 0x2c7   :  { %v3955_v57 = vadd.f32 %v3747_v62, %v9220_v31  ;;  %v8400_v33 = vpop.xlane.xlu1 %2795  ;;  %v3749_v59 = vmul.f32 0.6931472, %v5706_v15  ;;  %v3207_v31 = vmul.f32 1.442695, %v2998_v22  ;;  %v1327_v62 = vpop.f32.mrb[244].mxu0  ;;  %v9221_v36 = vld [vmem:[#allocation35_spill] sm:$0xff] }
 0x2c8   :  { %v8398_v35 = vadd.f32 %v8275_v20, %v2388_v17  ;;  %v3426_v24 = vpop.xlane.xlu0 %3425  ;;  %v2392_v54 = vpop.f32.mrb[244].mxu1  ;;  %v3205_v32 = vmul.f32 1.442695, %v2997_v52 }
 0x2c9   :  { %4081 = vst.msk [vmem:[%s9044_s4 + $0x148] sm:$0xff] %vm4039_vm3, %v3955_v57  ;;  %5713 = vlog2.f32 %v3426_v24  ;;  %v2393_v9 = vadd.f32 %v2392_v54, %v1327_v62  ;;  %v5054_v42 = vpop.f32.mrb[245].mxu0  ;;  %v5437_v56 = vpop.f32.mrb[245].mxu1  ;;  %v3956_v48 = vadd.f32 %v3749_v59, %v9221_v36  ;;  %v2999_v24 = vsub.f32 %v7848_v61, %v8400_v33 }
 0x2ca   :  { %v2902_v17 = vsel %vm2538_vm2, %v8398_v35, -inf  ;;  %5715 = vpow2.f32 %v3201_v5  ;;  %v1332_v52 = vpop.f32.mrb[246].mxu0 }
 0x2cb   :  { %2903 = vmax.xlane.f32.xlu1 %v2902_v17  ;;  %v5708_v47 = vpop.eup %5707  ;;  %v8410_v57 = vadd.f32 %v8275_v20, %v2393_v9  ;;  %v3429_v19 = vpop.xlane.xlu1 %3428  ;;  %4082 = vst.msk [vmem:[%s9044_s4 + $0x150] sm:$0xff] %vm4039_vm3, %v3956_v48  ;;  %5717 = vpow2.f32 %v3207_v31 }
 0x2cc   :  { %v8412_v22 = vpop.xlane.xlu0 %2798  ;;  %v3751_v15 = vmul.f32 0.6931472, %v5708_v47  ;;  %v2397_v59 = vpop.f32.mrb[246].mxu1  ;;  %5719 = vlog2.f32 %v3429_v19  ;;  %v3209_v47 = vmul.f32 1.442695, %v2999_v24 }
 0x2cd   :  { %v3000_v5 = vsub.f32 %v7863_v21, %v8412_v22  ;;  %v2398_v62 = vadd.f32 %v2397_v59, %v1332_v52  ;;  %v5057_v54 = vpop.f32.mrb[247].mxu0  ;;  %v5440_v9 = vpop.f32.mrb[247].mxu1  ;;  %v2905_v42 = vsel %vm2538_vm2, %v8410_v57, -inf  ;;  %5721 = vpow2.f32 %v3205_v32 }
 0x2ce   :  { %v3957_v56 = vadd.f32 %v3751_v15, %v7764_v10  ;;  %2906 = vmax.xlane.f32.xlu0 %v2905_v42  ;;  %v5710_v31 = vpop.eup %5709  ;;  %v1337_v19 = vpop.f32.mrb[248].mxu0 }
 0x2cf   :  { %v3211_v17 = vmul.f32 1.442695, %v3000_v5  ;;  %v8426_v61 = vadd.f32 %v8275_v20, %v2398_v62  ;;  %v8428_v21 = vpop.xlane.xlu1 %2801  ;;  %v3753_v48 = vmul.f32 0.6931472, %v5710_v31  ;;  %v2402_v15 = vpop.f32.mrb[248].mxu1 }
 0x2d0   :  { %v3432_v36 = vpop.xlane.xlu0 %3431  ;;  %4083 = vst.msk [vmem:[%s9044_s4 + $0x158] sm:$0xff] %vm4039_vm3, %v3957_v56  ;;  %v3001_v10 = vsub.f32 %v7878_v12, %v8428_v21  ;;  %v2403_v32 = vadd.f32 %v2402_v15, %v1337_v19  ;;  %v5060_v5 = vpop.f32.mrb[249].mxu0 }
 0x2d1   :  { %5723 = vpow2.f32 %v3211_v17  ;;  %v5443_v52 = vpop.f32.mrb[249].mxu1  ;;  %v2908_v59 = vsel %vm2538_vm2, %v8426_v61, -inf  ;;  %v5712_v62 = vpop.eup %5711  ;;  %v3958_v54 = vadd.f32 %v3753_v48, %v7775_v50 }
 0x2d2   :  { %5725 = vlog2.f32 %v3432_v36  ;;  %2909 = vmax.xlane.f32.xlu1 %v2908_v59  ;;  %v3213_v42 = vmul.f32 1.442695, %v3001_v10  ;;  %v8440_v24 = vadd.f32 %v8275_v20, %v2403_v32  ;;  %v3535_v36 = vsel %vm2538_vm2, %v5712_v62, 0.0 }
 0x2d3   :  { %v5714_v9 = vpop.eup %5713  ;;  %v3435_v56 = vpop.xlane.xlu1 %3434  ;;  %4084 = vst.msk [vmem:[%s9044_s4 + $0x160] sm:$0xff] %vm4039_vm3, %v3958_v54  ;;  %5727 = vpow2.f32 %v3209_v47 }
 0x2d4   :  { %v8442_v12 = vpop.xlane.xlu0 %2804  ;;  %v3755_v17 = vmul.f32 0.6931472, %v5714_v9  ;;  %v5716_v50 = vpop.eup %5715  ;;  %5729 = vlog2.f32 %v3435_v56  ;;  %v2911_v20 = vsel %vm2538_vm2, %v8440_v24, -inf }
 0x2d5   :  { %v3002_v31 = vsub.f32 %v7898_v16, %v8442_v12  ;;  %v5718_v48 = vpop.eup %5717  ;;  %2912 = vmax.xlane.f32.xlu0 %v2911_v20  ;;  %5731 = vpow2.f32 %v3213_v42  ;;  %v3532_v59 = vsel %vm2538_vm2, %v5716_v50, 0.0 }
 0x2d6   :  { %v3959_v10 = vadd.f32 %v3755_v17, %v7790_v29  ;;  %3536 = vadd.xlane.f32.xlu1 %v3535_v36  ;;  %v5720_v15 = vpop.eup %5719  ;;  %v3541_v29 = vsel %vm2538_vm2, %v5718_v48, 0.0 }
 0x2d7   :  { %v3215_v19 = vmul.f32 1.442695, %v3002_v31  ;;  %v8454_v47 = vpop.xlane.xlu1 %2807  ;;  %v3757_v16 = vmul.f32 0.6931472, %v5720_v15  ;;  %v5722_v52 = vpop.eup %5721 }
 0x2d8   :  { %v3438_v32 = vpop.xlane.xlu0 %3437  ;;  %4085 = vst.msk [vmem:[%s9044_s4 + $0x168] sm:$0xff] %vm4039_vm3, %v3959_v10  ;;  %v3003_v5 = vsub.f32 %v7913_v4, %v8454_v47  ;;  %v3538_v50 = vsel %vm2538_vm2, %v5722_v52, 0.0 }
 0x2d9   :  { %5733 = vpow2.f32 %v3215_v19  ;;  %v3960_v54 = vadd.f32 %v3757_v16, %v7805_v63  ;;  %3533 = vadd.xlane.f32.xlu0 %v3532_v59 }
 0x2da   :  { %5735 = vlog2.f32 %v3438_v32  ;;  %v3217_v9 = vmul.f32 1.442695, %v3003_v5  ;;  %3542 = vadd.xlane.f32.xlu1 %v3541_v29 }
 0x2db   :  { %v5724_v62 = vpop.eup %5723  ;;  %v3441_v56 = vpop.xlane.xlu1 %3440  ;;  %4086 = vst.msk [vmem:[%s9044_s4 + $0x170] sm:$0xff] %vm4039_vm3, %v3960_v54 }
 0x2dc   :  { %v5726_v42 = vpop.eup %5725  ;;  %v8465_v17 = vpop.xlane.xlu0 %2810  ;;  %5737 = vpow2.f32 %v3217_v9  ;;  %v3547_v63 = vsel %vm2538_vm2, %v5724_v62, 0.0 }
 0x2dd   :  { %v3759_v4 = vmul.f32 0.6931472, %v5726_v42  ;;  %v3004_v31 = vsub.f32 %v7928_v46, %v8465_v17  ;;  %5739 = vlog2.f32 %v3441_v56  ;;  %v5728_v36 = vpop.eup %5727  ;;  %3539 = vadd.xlane.f32.xlu0 %v3538_v50 }
 0x2de   :  { %3548 = vadd.xlane.f32.xlu1 %v3547_v63  ;;  %v5730_v10 = vpop.eup %5729 }
 0x2df   :  { %v3961_v20 = vadd.f32 %v3759_v4, %v7820_v2  ;;  %v3219_v48 = vmul.f32 1.442695, %v3004_v31  ;;  %v8476_v15 = vpop.xlane.xlu1 %2813  ;;  %v3761_v46 = vmul.f32 0.6931472, %v5730_v10  ;;  %v5732_v16 = vpop.eup %5731  ;;  %v3544_v2 = vsel %vm2538_vm2, %v5728_v36, 0.0 }
 0x2e0   :  { %v3444_v19 = vpop.xlane.xlu0 %3443  ;;  %v3005_v32 = vsub.f32 %v7943_v43, %v8476_v15 }
 0x2e1   :  { %4087 = vst.msk [vmem:[%s9044_s4 + $0x178] sm:$0xff] %vm4039_vm3, %v3961_v20  ;;  %5741 = vpow2.f32 %v3219_v48  ;;  %v3962_v52 = vadd.f32 %v3761_v46, %v7835_v0  ;;  %3545 = vadd.xlane.f32.xlu0 %v3544_v2  ;;  %v3550_v0 = vsel %vm2538_vm2, %v5732_v16, 0.0 }
 0x2e2   :  { %5743 = vlog2.f32 %v3444_v19  ;;  %v3221_v29 = vmul.f32 1.442695, %v3005_v32 }
 0x2e3   :  { %v5734_v5 = vpop.eup %5733  ;;  %v3447_v62 = vpop.xlane.xlu1 %3446  ;;  %4088 = vst.msk [vmem:[%s9044_s4 + $0x180] sm:$0xff] %vm4039_vm3, %v3962_v52  ;;  %v9222_v52 = vld [vmem:[#allocation36_spill] sm:$0xff] }
 0x2e4   :  { %v5736_v59 = vpop.eup %5735  ;;  %v8486_v54 = vpop.xlane.xlu0 %2816  ;;  %v3553_v9 = vsel %vm2538_vm2, %v5734_v5, 0.0  ;;  %5745 = vpow2.f32 %v3221_v29 }
 0x2e5   :  { %v3763_v43 = vmul.f32 0.6931472, %v5736_v59  ;;  %v3006_v42 = vsub.f32 %v7958_v23, %v8486_v54  ;;  %3554 = vadd.xlane.f32.xlu1 %v3553_v9  ;;  %5747 = vlog2.f32 %v3447_v62  ;;  %3551 = vadd.xlane.f32.xlu0 %v3550_v0 }
 0x2e6   :  { %v5738_v56 = vpop.eup %5737 }
 0x2e7   :  { %v3963_v4 = vadd.f32 %v3763_v43, %v7850_v6  ;;  %v3223_v31 = vmul.f32 1.442695, %v3006_v42  ;;  %v5740_v63 = vpop.eup %5739  ;;  %v8497_v36 = vpop.xlane.xlu1 %2819  ;;  %v3556_v48 = vsel %vm2538_vm2, %v5738_v56, 0.0 }
 0x2e8   :  { %v3450_v50 = vpop.xlane.xlu0 %3449  ;;  %v3765_v20 = vmul.f32 0.6931472, %v5740_v63  ;;  %v3007_v23 = vsub.f32 %v7973_v60, %v8497_v36 }
 0x2e9   :  { %4089 = vst.msk [vmem:[%s9044_s4 + $0x188] sm:$0xff] %vm4039_vm3, %v3963_v4  ;;  %5749 = vpow2.f32 %v3223_v31  ;;  %3557 = vadd.xlane.f32.xlu0 %v3556_v48  ;;  %v9223_v4 = vld [vmem:[#allocation37_spill] sm:$0xff] }
 0x2ea   :  { %5751 = vlog2.f32 %v3450_v50  ;;  %v3964_v10 = vadd.f32 %v3765_v20, %v7865_v44  ;;  %v3225_v19 = vmul.f32 1.442695, %v3007_v23 }
 0x2eb   :  { %v5742_v6 = vpop.eup %5741  ;;  %v3453_v32 = vpop.xlane.xlu1 %3452 }
 0x2ec   :  { %v5744_v46 = vpop.eup %5743  ;;  %v8507_v16 = vpop.xlane.xlu0 %2822  ;;  %v3559_v2 = vsel %vm2538_vm2, %v5742_v6, 0.0  ;;  %4090 = vst.msk [vmem:[%s9044_s4 + $0x190] sm:$0xff] %vm4039_vm3, %v3964_v10  ;;  %5753 = vpow2.f32 %v3225_v19  ;;  %v9224_v19 = vld [vmem:[#allocation2_spill] sm:$0xff] }
 0x2ed   :  { %v3767_v60 = vmul.f32 0.6931472, %v5744_v46  ;;  %v3008_v5 = vsub.f32 %v7988_v7, %v8507_v16  ;;  %3560 = vadd.xlane.f32.xlu1 %v3559_v2  ;;  %5755 = vlog2.f32 %v3453_v32 }
 0x2ee   :  { %v5746_v44 = vpop.eup %5745 }
 0x2ef   :  { %v3965_v29 = vadd.f32 %v3767_v60, %v9222_v52  ;;  %v3227_v59 = vmul.f32 1.442695, %v3008_v5  ;;  %v5748_v62 = vpop.eup %5747  ;;  %v8517_v43 = vpop.xlane.xlu1 %2825  ;;  %v3562_v42 = vsel %vm2538_vm2, %v5746_v44, 0.0 }
 0x2f0   :  { %v3456_v9 = vpop.xlane.xlu0 %3455  ;;  %v3769_v0 = vmul.f32 0.6931472, %v5748_v62  ;;  %v3009_v7 = vsub.f32 %v8003_v18, %v8517_v43  ;;  %3563 = vadd.xlane.f32.xlu0 %v3562_v42 }
 0x2f1   :  { %4091 = vst.msk [vmem:[%s9044_s4 + $0x198] sm:$0xff] %vm4039_vm3, %v3965_v29  ;;  %5757 = vpow2.f32 %v3227_v59  ;;  %v9225_v59 = vld [vmem:[#allocation3_spill] sm:$0xff] }
 0x2f2   :  { %5759 = vlog2.f32 %v3456_v9  ;;  %v3966_v31 = vadd.f32 %v3769_v0, %v9223_v4  ;;  %v3229_v63 = vmul.f32 1.442695, %v3009_v7 }
 0x2f3   :  { %v5750_v56 = vpop.eup %5749  ;;  %v3459_v20 = vpop.xlane.xlu1 %3458 }
 0x2f4   :  { %v5752_v50 = vpop.eup %5751  ;;  %v8527_v23 = vpop.xlane.xlu0 %2828  ;;  %v3565_v48 = vsel %vm2538_vm2, %v5750_v56, 0.0  ;;  %4092 = vst.msk [vmem:[%s9044_s4 + $0x1a0] sm:$0xff] %vm4039_vm3, %v3966_v31  ;;  %5761 = vpow2.f32 %v3229_v63  ;;  %v9226_v63 = vld [vmem:[#allocation4_spill] sm:$0xff] }
 0x2f5   :  { %v3771_v6 = vmul.f32 0.6931472, %v5752_v50  ;;  %v3010_v18 = vsub.f32 %v8018_v28, %v8527_v23  ;;  %3566 = vadd.xlane.f32.xlu1 %v3565_v48  ;;  %5763 = vlog2.f32 %v3459_v20 }
 0x2f6   :  { %v5754_v10 = vpop.eup %5753 }
 0x2f7   :  { %v3967_v46 = vadd.f32 %v3771_v6, %v9224_v19  ;;  %v3231_v32 = vmul.f32 1.442695, %v3010_v18  ;;  %v5756_v2 = vpop.eup %5755  ;;  %v8537_v5 = vpop.xlane.xlu1 %2831  ;;  %v3568_v44 = vsel %vm2538_vm2, %v5754_v10, 0.0 }
 0x2f8   :  { %v3462_v60 = vpop.xlane.xlu0 %3461  ;;  %v3773_v52 = vmul.f32 0.6931472, %v5756_v2  ;;  %v3011_v28 = vsub.f32 %v8033_v38, %v8537_v5  ;;  %3569 = vadd.xlane.f32.xlu0 %v3568_v44 }
 0x2f9   :  { %4093 = vst.msk [vmem:[%s9044_s4 + $0x1a8] sm:$0xff] %vm4039_vm3, %v3967_v46  ;;  %5765 = vpow2.f32 %v3231_v32  ;;  %v9227_v32 = vld [vmem:[#allocation5_spill] sm:$0xff] }
 0x2fa   :  { %5767 = vlog2.f32 %v3462_v60  ;;  %v3968_v62 = vadd.f32 %v3773_v52, %v9225_v59  ;;  %v3233_v9 = vmul.f32 1.442695, %v3011_v28 }
 0x2fb   :  { %v5758_v29 = vpop.eup %5757  ;;  %v3465_v0 = vpop.xlane.xlu1 %3464 }
 0x2fc   :  { %v5760_v42 = vpop.eup %5759  ;;  %v8547_v7 = vpop.xlane.xlu0 %2834  ;;  %v3571_v56 = vsel %vm2538_vm2, %v5758_v29, 0.0  ;;  %4094 = vst.msk [vmem:[%s9044_s4 + $0x1b0] sm:$0xff] %vm4039_vm3, %v3968_v62  ;;  %5769 = vpow2.f32 %v3233_v9  ;;  %v9228_v9 = vld [vmem:[#allocation6_spill] sm:$0xff] }
 0x2fd   :  { %v3775_v4 = vmul.f32 0.6931472, %v5760_v42  ;;  %v3012_v38 = vsub.f32 %v8048_v53, %v8547_v7  ;;  %3572 = vadd.xlane.f32.xlu1 %v3571_v56  ;;  %5771 = vlog2.f32 %v3465_v0 }
 0x2fe   :  { %v5762_v31 = vpop.eup %5761 }
 0x2ff   :  { %v3969_v50 = vadd.f32 %v3775_v4, %v9226_v63  ;;  %v3235_v20 = vmul.f32 1.442695, %v3012_v38  ;;  %v5764_v48 = vpop.eup %5763  ;;  %v8557_v18 = vpop.xlane.xlu1 %2837  ;;  %v3574_v10 = vsel %vm2538_vm2, %v5762_v31, 0.0 }
 0x300   :  { %v3468_v6 = vpop.xlane.xlu0 %3467  ;;  %v3777_v19 = vmul.f32 0.6931472, %v5764_v48  ;;  %v3013_v53 = vsub.f32 %v8063_v14, %v8557_v18  ;;  %3575 = vadd.xlane.f32.xlu0 %v3574_v10 }
 0x301   :  { %4095 = vst.msk [vmem:[%s9044_s4 + $0x1b8] sm:$0xff] %vm4039_vm3, %v3969_v50  ;;  %5773 = vpow2.f32 %v3235_v20  ;;  %v9229_v20 = vld [vmem:[#allocation7_spill] sm:$0xff] }
 0x302   :  { %5775 = vlog2.f32 %v3468_v6  ;;  %v3970_v2 = vadd.f32 %v3777_v19, %v9227_v32  ;;  %v3237_v60 = vmul.f32 1.442695, %v3013_v53 }
 0x303   :  { %v5766_v46 = vpop.eup %5765  ;;  %v3471_v52 = vpop.xlane.xlu1 %3470 }
 0x304   :  { %v5768_v44 = vpop.eup %5767  ;;  %v8567_v28 = vpop.xlane.xlu0 %2840  ;;  %v3577_v29 = vsel %vm2538_vm2, %v5766_v46, 0.0  ;;  %4096 = vst.msk [vmem:[%s9044_s4 + $0x1c0] sm:$0xff] %vm4039_vm3, %v3970_v2  ;;  %5777 = vpow2.f32 %v3237_v60  ;;  %v9230_v60 = vld [vmem:[#allocation8_spill] sm:$0xff] }
 0x305   :  { %v3779_v59 = vmul.f32 0.6931472, %v5768_v44  ;;  %v3014_v14 = vsub.f32 %v8078_v58, %v8567_v28  ;;  %3578 = vadd.xlane.f32.xlu1 %v3577_v29  ;;  %5779 = vlog2.f32 %v3471_v52 }
 0x306   :  { %v5770_v62 = vpop.eup %5769 }
 0x307   :  { %v3971_v42 = vadd.f32 %v3779_v59, %v9228_v9  ;;  %v3239_v0 = vmul.f32 1.442695, %v3014_v14  ;;  %v5772_v56 = vpop.eup %5771  ;;  %v8577_v38 = vpop.xlane.xlu1 %2843  ;;  %v3580_v31 = vsel %vm2538_vm2, %v5770_v62, 0.0 }
 0x308   :  { %v3474_v4 = vpop.xlane.xlu0 %3473  ;;  %v3781_v63 = vmul.f32 0.6931472, %v5772_v56  ;;  %v3015_v58 = vsub.f32 %v8093_v26, %v8577_v38  ;;  %3581 = vadd.xlane.f32.xlu0 %v3580_v31 }
 0x309   :  { %4097 = vst.msk [vmem:[%s9044_s4 + $0x1c8] sm:$0xff] %vm4039_vm3, %v3971_v42  ;;  %5781 = vpow2.f32 %v3239_v0  ;;  %v9231_v0 = vld [vmem:[#allocation9_spill] sm:$0xff] }
 0x30a   :  { %5783 = vlog2.f32 %v3474_v4  ;;  %v3972_v48 = vadd.f32 %v3781_v63, %v9229_v20  ;;  %v3241_v6 = vmul.f32 1.442695, %v3015_v58 }
 0x30b   :  { %v5774_v50 = vpop.eup %5773  ;;  %v3477_v19 = vpop.xlane.xlu1 %3476 }
 0x30c   :  { %v5776_v10 = vpop.eup %5775  ;;  %v8587_v53 = vpop.xlane.xlu0 %2846  ;;  %v3583_v46 = vsel %vm2538_vm2, %v5774_v50, 0.0  ;;  %4098 = vst.msk [vmem:[%s9044_s4 + $0x1d0] sm:$0xff] %vm4039_vm3, %v3972_v48  ;;  %5785 = vpow2.f32 %v3241_v6  ;;  %v9232_v6 = vld [vmem:[#allocation10_spill] sm:$0xff] }
 0x30d   :  { %v3783_v32 = vmul.f32 0.6931472, %v5776_v10  ;;  %v3016_v26 = vsub.f32 %v8108_v8, %v8587_v53  ;;  %3584 = vadd.xlane.f32.xlu1 %v3583_v46  ;;  %5787 = vlog2.f32 %v3477_v19 }
 0x30e   :  { %v5778_v2 = vpop.eup %5777 }
 0x30f   :  { %v3973_v44 = vadd.f32 %v3783_v32, %v9230_v60  ;;  %v3243_v52 = vmul.f32 1.442695, %v3016_v26  ;;  %v5780_v29 = vpop.eup %5779  ;;  %v8597_v14 = vpop.xlane.xlu1 %2849  ;;  %v3586_v62 = vsel %vm2538_vm2, %v5778_v2, 0.0 }
 0x310   :  { %v3480_v59 = vpop.xlane.xlu0 %3479  ;;  %v3785_v9 = vmul.f32 0.6931472, %v5780_v29  ;;  %v3017_v8 = vsub.f32 %v8123_v30, %v8597_v14  ;;  %3587 = vadd.xlane.f32.xlu0 %v3586_v62 }
 0x311   :  { %4099 = vst.msk [vmem:[%s9044_s4 + $0x1d8] sm:$0xff] %vm4039_vm3, %v3973_v44  ;;  %5789 = vpow2.f32 %v3243_v52  ;;  %v9233_v52 = vld [vmem:[#allocation11_spill] sm:$0xff] }
 0x312   :  { %5791 = vlog2.f32 %v3480_v59  ;;  %v3974_v56 = vadd.f32 %v3785_v9, %v9231_v0  ;;  %v3245_v4 = vmul.f32 1.442695, %v3017_v8 }
 0x313   :  { %v5782_v42 = vpop.eup %5781  ;;  %v3483_v63 = vpop.xlane.xlu1 %3482 }
 0x314   :  { %v5784_v31 = vpop.eup %5783  ;;  %v8607_v58 = vpop.xlane.xlu0 %2852  ;;  %v3589_v50 = vsel %vm2538_vm2, %v5782_v42, 0.0  ;;  %4100 = vst.msk [vmem:[%s9044_s4 + $0x1e0] sm:$0xff] %vm4039_vm3, %v3974_v56  ;;  %5793 = vpow2.f32 %v3245_v4  ;;  %v9234_v4 = vld [vmem:[#allocation12_spill] sm:$0xff] }
 0x315   :  { %v3787_v20 = vmul.f32 0.6931472, %v5784_v31  ;;  %v3018_v30 = vsub.f32 %v8138_v41, %v8607_v58  ;;  %3590 = vadd.xlane.f32.xlu1 %v3589_v50  ;;  %5795 = vlog2.f32 %v3483_v63 }
 0x316   :  { %v5786_v48 = vpop.eup %5785 }
 0x317   :  { %v3975_v10 = vadd.f32 %v3787_v20, %v9232_v6  ;;  %v3247_v19 = vmul.f32 1.442695, %v3018_v30  ;;  %v5788_v46 = vpop.eup %5787  ;;  %v8617_v26 = vpop.xlane.xlu1 %2855  ;;  %v3592_v2 = vsel %vm2538_vm2, %v5786_v48, 0.0 }
 0x318   :  { %v3486_v32 = vpop.xlane.xlu0 %3485  ;;  %v3789_v60 = vmul.f32 0.6931472, %v5788_v46  ;;  %v3019_v41 = vsub.f32 %v8153_v1, %v8617_v26  ;;  %3593 = vadd.xlane.f32.xlu0 %v3592_v2 }
 0x319   :  { %4101 = vst.msk [vmem:[%s9044_s4 + $0x1e8] sm:$0xff] %vm4039_vm3, %v3975_v10  ;;  %5797 = vpow2.f32 %v3247_v19  ;;  %v9235_v19 = vld [vmem:[#allocation13_spill] sm:$0xff] }
 0x31a   :  { %5799 = vlog2.f32 %v3486_v32  ;;  %v3976_v29 = vadd.f32 %v3789_v60, %v9233_v52  ;;  %v3249_v59 = vmul.f32 1.442695, %v3019_v41 }
 0x31b   :  { %v5790_v44 = vpop.eup %5789  ;;  %v3489_v9 = vpop.xlane.xlu1 %3488 }
 0x31c   :  { %v5792_v62 = vpop.eup %5791  ;;  %v8627_v8 = vpop.xlane.xlu0 %2858  ;;  %v3595_v42 = vsel %vm2538_vm2, %v5790_v44, 0.0  ;;  %4102 = vst.msk [vmem:[%s9044_s4 + $0x1f0] sm:$0xff] %vm4039_vm3, %v3976_v29  ;;  %5801 = vpow2.f32 %v3249_v59  ;;  %v9236_v59 = vld [vmem:[#allocation14_spill] sm:$0xff] }
 0x31d   :  { %v3791_v0 = vmul.f32 0.6931472, %v5792_v62  ;;  %v3020_v1 = vsub.f32 %v8168_v49, %v8627_v8  ;;  %3596 = vadd.xlane.f32.xlu1 %v3595_v42  ;;  %5803 = vlog2.f32 %v3489_v9 }
 0x31e   :  { %v5794_v56 = vpop.eup %5793 }
 0x31f   :  { %v3977_v31 = vadd.f32 %v3791_v0, %v9234_v4  ;;  %v3251_v63 = vmul.f32 1.442695, %v3020_v1  ;;  %v5796_v50 = vpop.eup %5795  ;;  %v8637_v30 = vpop.xlane.xlu1 %2861  ;;  %v3598_v48 = vsel %vm2538_vm2, %v5794_v56, 0.0 }
 0x320   :  { %v3492_v20 = vpop.xlane.xlu0 %3491  ;;  %v3793_v6 = vmul.f32 0.6931472, %v5796_v50  ;;  %v3021_v49 = vsub.f32 %v8183_v39, %v8637_v30  ;;  %3599 = vadd.xlane.f32.xlu0 %v3598_v48 }
 0x321   :  { %4103 = vst.msk [vmem:[%s9044_s4 + $0x1f8] sm:$0xff] %vm4039_vm3, %v3977_v31  ;;  %5805 = vpow2.f32 %v3251_v63  ;;  %v9237_v63 = vld [vmem:[#allocation15_spill] sm:$0xff] }
 0x322   :  { %5807 = vlog2.f32 %v3492_v20  ;;  %v3978_v46 = vadd.f32 %v3793_v6, %v9235_v19  ;;  %v3253_v32 = vmul.f32 1.442695, %v3021_v49 }
 0x323   :  { %v5798_v10 = vpop.eup %5797  ;;  %v3495_v60 = vpop.xlane.xlu1 %3494 }
 0x324   :  { %v5800_v2 = vpop.eup %5799  ;;  %v8647_v41 = vpop.xlane.xlu0 %2864  ;;  %v3601_v44 = vsel %vm2538_vm2, %v5798_v10, 0.0  ;;  %4104 = vst.msk [vmem:[%s9044_s4 + $0x200] sm:$0xff] %vm4039_vm3, %v3978_v46  ;;  %5809 = vpow2.f32 %v3253_v32  ;;  %v9238_v32 = vld [vmem:[#allocation16_spill] sm:$0xff] }
 0x325   :  { %v3795_v52 = vmul.f32 0.6931472, %v5800_v2  ;;  %v3022_v39 = vsub.f32 %v8198_v40, %v8647_v41  ;;  %3602 = vadd.xlane.f32.xlu1 %v3601_v44  ;;  %5811 = vlog2.f32 %v3495_v60 }
 0x326   :  { %v5802_v29 = vpop.eup %5801 }
 0x327   :  { %v3979_v62 = vadd.f32 %v3795_v52, %v9236_v59  ;;  %v3255_v9 = vmul.f32 1.442695, %v3022_v39  ;;  %v5804_v42 = vpop.eup %5803  ;;  %v8657_v1 = vpop.xlane.xlu1 %2867  ;;  %v3604_v56 = vsel %vm2538_vm2, %v5802_v29, 0.0 }
 0x328   :  { %v3498_v0 = vpop.xlane.xlu0 %3497  ;;  %v3797_v4 = vmul.f32 0.6931472, %v5804_v42  ;;  %v3023_v40 = vsub.f32 %v8213_v34, %v8657_v1  ;;  %3605 = vadd.xlane.f32.xlu0 %v3604_v56 }
 0x329   :  { %4105 = vst.msk [vmem:[%s9044_s4 + $0x208] sm:$0xff] %vm4039_vm3, %v3979_v62  ;;  %5813 = vpow2.f32 %v3255_v9  ;;  %v9239_v9 = vld [vmem:[#allocation17_spill] sm:$0xff] }
 0x32a   :  { %5815 = vlog2.f32 %v3498_v0  ;;  %v3980_v50 = vadd.f32 %v3797_v4, %v9237_v63  ;;  %v3257_v20 = vmul.f32 1.442695, %v3023_v40 }
 0x32b   :  { %v5806_v31 = vpop.eup %5805  ;;  %v3501_v6 = vpop.xlane.xlu1 %3500 }
 0x32c   :  { %v5808_v48 = vpop.eup %5807  ;;  %v8667_v49 = vpop.xlane.xlu0 %2870  ;;  %v3607_v10 = vsel %vm2538_vm2, %v5806_v31, 0.0  ;;  %4106 = vst.msk [vmem:[%s9044_s4 + $0x210] sm:$0xff] %vm4039_vm3, %v3980_v50  ;;  %5817 = vpow2.f32 %v3257_v20  ;;  %v9240_v20 = vld [vmem:[#allocation18_spill] sm:$0xff] }
 0x32d   :  { %v3799_v19 = vmul.f32 0.6931472, %v5808_v48  ;;  %v3024_v34 = vsub.f32 %v8228_v45, %v8667_v49  ;;  %3608 = vadd.xlane.f32.xlu1 %v3607_v10  ;;  %5819 = vlog2.f32 %v3501_v6 }
 0x32e   :  { %v5810_v46 = vpop.eup %5809 }
 0x32f   :  { %v3981_v2 = vadd.f32 %v3799_v19, %v9238_v32  ;;  %v3259_v60 = vmul.f32 1.442695, %v3024_v34  ;;  %v5812_v44 = vpop.eup %5811  ;;  %v8677_v39 = vpop.xlane.xlu1 %2873  ;;  %v3610_v29 = vsel %vm2538_vm2, %v5810_v46, 0.0 }
 0x330   :  { %v3504_v52 = vpop.xlane.xlu0 %3503  ;;  %v3801_v59 = vmul.f32 0.6931472, %v5812_v44  ;;  %v3025_v45 = vsub.f32 %v8243_v27, %v8677_v39  ;;  %3611 = vadd.xlane.f32.xlu0 %v3610_v29 }
 0x331   :  { %4107 = vst.msk [vmem:[%s9044_s4 + $0x218] sm:$0xff] %vm4039_vm3, %v3981_v2  ;;  %5821 = vpow2.f32 %v3259_v60  ;;  %v9241_v60 = vld [vmem:[#allocation19_spill] sm:$0xff] }
 0x332   :  { %5823 = vlog2.f32 %v3504_v52  ;;  %v3982_v42 = vadd.f32 %v3801_v59, %v9239_v9  ;;  %v3261_v0 = vmul.f32 1.442695, %v3025_v45 }
 0x333   :  { %v5814_v62 = vpop.eup %5813  ;;  %v3507_v4 = vpop.xlane.xlu1 %3506 }
 0x334   :  { %v5816_v56 = vpop.eup %5815  ;;  %v8687_v40 = vpop.xlane.xlu0 %2876  ;;  %v3613_v31 = vsel %vm2538_vm2, %v5814_v62, 0.0  ;;  %4108 = vst.msk [vmem:[%s9044_s4 + $0x220] sm:$0xff] %vm4039_vm3, %v3982_v42  ;;  %5825 = vpow2.f32 %v3261_v0  ;;  %v9242_v0 = vld [vmem:[#allocation20_spill] sm:$0xff] }
 0x335   :  { %v3803_v63 = vmul.f32 0.6931472, %v5816_v56  ;;  %v3026_v27 = vsub.f32 %v8258_v3, %v8687_v40  ;;  %3614 = vadd.xlane.f32.xlu1 %v3613_v31  ;;  %5827 = vlog2.f32 %v3507_v4 }
 0x336   :  { %v5818_v50 = vpop.eup %5817 }
 0x337   :  { %v3983_v48 = vadd.f32 %v3803_v63, %v9240_v20  ;;  %v3263_v6 = vmul.f32 1.442695, %v3026_v27  ;;  %v5820_v10 = vpop.eup %5819  ;;  %v8697_v34 = vpop.xlane.xlu1 %2879  ;;  %v3616_v46 = vsel %vm2538_vm2, %v5818_v50, 0.0 }
 0x338   :  { %v3510_v19 = vpop.xlane.xlu0 %3509  ;;  %v3805_v32 = vmul.f32 0.6931472, %v5820_v10  ;;  %v3027_v3 = vsub.f32 %v8278_v13, %v8697_v34  ;;  %3617 = vadd.xlane.f32.xlu0 %v3616_v46 }
 0x339   :  { %4109 = vst.msk [vmem:[%s9044_s4 + $0x228] sm:$0xff] %vm4039_vm3, %v3983_v48  ;;  %5829 = vpow2.f32 %v3263_v6  ;;  %v9243_v6 = vld [vmem:[#allocation21_spill] sm:$0xff] }
 0x33a   :  { %5831 = vlog2.f32 %v3510_v19  ;;  %v3984_v44 = vadd.f32 %v3805_v32, %v9241_v60  ;;  %v3265_v52 = vmul.f32 1.442695, %v3027_v3 }
 0x33b   :  { %v5822_v2 = vpop.eup %5821  ;;  %v3513_v59 = vpop.xlane.xlu1 %3512 }
 0x33c   :  { %v5824_v29 = vpop.eup %5823  ;;  %v8707_v45 = vpop.xlane.xlu0 %2882  ;;  %v3619_v62 = vsel %vm2538_vm2, %v5822_v2, 0.0  ;;  %4110 = vst.msk [vmem:[%s9044_s4 + $0x230] sm:$0xff] %vm4039_vm3, %v3984_v44  ;;  %5833 = vpow2.f32 %v3265_v52 }
 0x33d   :  { %v3807_v9 = vmul.f32 0.6931472, %v5824_v29  ;;  %v3028_v13 = vsub.f32 %v8293_v37, %v8707_v45  ;;  %3620 = vadd.xlane.f32.xlu1 %v3619_v62  ;;  %5835 = vlog2.f32 %v3513_v59  ;;  %v9245_v29 = vld [vmem:[#allocation22_spill] sm:$0xff] }
 0x33e   :  { %v5826_v42 = vpop.eup %5825 }
 0x33f   :  { %v3985_v56 = vadd.f32 %v3807_v9, %v9242_v0  ;;  %v3267_v4 = vmul.f32 1.442695, %v3028_v13  ;;  %v5828_v31 = vpop.eup %5827  ;;  %v8717_v27 = vpop.xlane.xlu1 %2885  ;;  %v3622_v50 = vsel %vm2538_vm2, %v5826_v42, 0.0 }
 0x340   :  { %v3516_v63 = vpop.xlane.xlu0 %3515  ;;  %v3809_v20 = vmul.f32 0.6931472, %v5828_v31  ;;  %v3029_v37 = vsub.f32 %v8308_v55, %v8717_v27  ;;  %3623 = vadd.xlane.f32.xlu0 %v3622_v50  ;;  %v9244_v55 = vld [vmem:[#allocation27_spill] sm:$0xff] }
 0x341   :  { %4111 = vst.msk [vmem:[%s9044_s4 + $0x238] sm:$0xff] %vm4039_vm3, %v3985_v56  ;;  %5837 = vpow2.f32 %v3267_v4  ;;  %v9246_v4 = vld [vmem:[#allocation29_spill] sm:$0xff]  ;;  %v9247_v50 = vld [vmem:[#allocation23_spill] sm:$0xff] }
 0x342   :  { %5839 = vlog2.f32 %v3516_v63  ;;  %v3986_v10 = vadd.f32 %v3809_v20, %v9243_v6  ;;  %v3269_v19 = vmul.f32 1.442695, %v3029_v37 }
 0x343   :  { %v5830_v48 = vpop.eup %5829  ;;  %v3519_v32 = vpop.xlane.xlu1 %3518 }
 0x344   :  { %v5832_v46 = vpop.eup %5831  ;;  %v8727_v3 = vpop.xlane.xlu0 %2888  ;;  %v3625_v2 = vsel %vm2538_vm2, %v5830_v48, 0.0  ;;  %4112 = vst.msk [vmem:[%s9044_s4 + $0x240] sm:$0xff] %vm4039_vm3, %v3986_v10  ;;  %5841 = vpow2.f32 %v3269_v19 }
 0x345   :  { %v3811_v60 = vmul.f32 0.6931472, %v5832_v46  ;;  %v3030_v44 = vsub.f32 %v9244_v55, %v8727_v3  ;;  %3626 = vadd.xlane.f32.xlu1 %v3625_v2  ;;  %5843 = vlog2.f32 %v3519_v32  ;;  %v9248_v32 = vld [vmem:[#allocation30_spill] sm:$0xff]  ;;  %v9249_v55 = vld [vmem:[#allocation24_spill] sm:$0xff] }
 0x346   :  { %v5834_v52 = vpop.eup %5833 }
 0x347   :  { %v3987_v59 = vadd.f32 %v3811_v60, %v9245_v29  ;;  %v3271_v62 = vmul.f32 1.442695, %v3030_v44  ;;  %v5836_v9 = vpop.eup %5835  ;;  %v8737_v42 = vpop.xlane.xlu1 %2891  ;;  %v3628_v0 = vsel %vm2538_vm2, %v5834_v52, 0.0 }
 0x348   :  { %v3522_v13 = vpop.xlane.xlu0 %3521  ;;  %v3813_v56 = vmul.f32 0.6931472, %v5836_v9  ;;  %v3031_v31 = vsub.f32 %v9246_v4, %v8737_v42  ;;  %3629 = vadd.xlane.f32.xlu0 %v3628_v0  ;;  %v9250_v4 = vld [vmem:[#allocation25_spill] sm:$0xff] }
 0x349   :  { %4113 = vst.msk [vmem:[%s9044_s4 + $0x248] sm:$0xff] %vm4039_vm3, %v3987_v59  ;;  %5845 = vpow2.f32 %v3271_v62 }
 0x34a   :  { %5847 = vlog2.f32 %v3522_v13  ;;  %v3988_v20 = vadd.f32 %v3813_v56, %v9247_v50  ;;  %v3273_v37 = vmul.f32 1.442695, %v3031_v31 }
 0x34b   :  { %v5838_v63 = vpop.eup %5837  ;;  %v3525_v6 = vpop.xlane.xlu1 %3524 }
 0x34c   :  { %v5840_v48 = vpop.eup %5839  ;;  %v8747_v10 = vpop.xlane.xlu0 %2894  ;;  %v3631_v19 = vsel %vm2538_vm2, %v5838_v63, 0.0  ;;  %4114 = vst.msk [vmem:[%s9044_s4 + $0x250] sm:$0xff] %vm4039_vm3, %v3988_v20  ;;  %5849 = vpow2.f32 %v3273_v37 }
 0x34d   :  { %v3815_v46 = vmul.f32 0.6931472, %v5840_v48  ;;  %v3032_v2 = vsub.f32 %v9248_v32, %v8747_v10  ;;  %3632 = vadd.xlane.f32.xlu1 %v3631_v19  ;;  %5851 = vlog2.f32 %v3525_v6 }
 0x34e   :  { %v5842_v60 = vpop.eup %5841 }
 0x34f   :  { %v3989_v44 = vadd.f32 %v3815_v46, %v9249_v55  ;;  %v3275_v52 = vmul.f32 1.442695, %v3032_v2  ;;  %v5844_v29 = vpop.eup %5843  ;;  %v8757_v62 = vpop.xlane.xlu1 %2897  ;;  %v3634_v9 = vsel %vm2538_vm2, %v5842_v60, 0.0  ;;  %v9251_v46 = vld [vmem:[#allocation38_spill] sm:$0xff] }
 0x350   :  { %v3528_v59 = vpop.xlane.xlu0 %3527  ;;  %v3817_v13 = vmul.f32 0.6931472, %v5844_v29  ;;  %v3033_v0 = vsub.f32 %v8364_v11, %v8757_v62  ;;  %3635 = vadd.xlane.f32.xlu0 %v3634_v9 }
 0x351   :  { %4115 = vst.msk [vmem:[%s9044_s4 + $0x258] sm:$0xff] %vm4039_vm3, %v3989_v44  ;;  %5853 = vpow2.f32 %v3275_v52 }
 0x352   :  { %5855 = vlog2.f32 %v3528_v59  ;;  %v3990_v31 = vadd.f32 %v3817_v13, %v9250_v4  ;;  %v3277_v63 = vmul.f32 1.442695, %v3033_v0  ;;  %v9252_v59 = vld [vmem:[#allocation26_spill] sm:$0xff] }
 0x353   :  { %v5846_v56 = vpop.eup %5845  ;;  %v3531_v20 = vpop.xlane.xlu1 %3530 }
 0x354   :  { %v5848_v50 = vpop.eup %5847  ;;  %v8767_v37 = vpop.xlane.xlu0 %2900  ;;  %v3637_v48 = vsel %vm2538_vm2, %v5846_v56, 0.0  ;;  %4116 = vst.msk [vmem:[%s9044_s4 + $0x260] sm:$0xff] %vm4039_vm3, %v3990_v31  ;;  %5857 = vpow2.f32 %v3277_v63 }
 0x355   :  { %v3819_v6 = vmul.f32 0.6931472, %v5848_v50  ;;  %v3034_v11 = vsub.f32 %v8381_v51, %v8767_v37  ;;  %3638 = vadd.xlane.f32.xlu1 %v3637_v48  ;;  %5859 = vlog2.f32 %v3531_v20  ;;  %v9253_v50 = vld [vmem:[#allocation34_spill] sm:$0xff] }
 0x356   :  { %v5850_v19 = vpop.eup %5849 }
 0x357   :  { %v3991_v32 = vadd.f32 %v3819_v6, %v9251_v46  ;;  %v3279_v2 = vmul.f32 1.442695, %v3034_v11  ;;  %v5852_v60 = vpop.eup %5851  ;;  %v3640_v44 = vsel %vm2538_vm2, %v5850_v19, 0.0 }
 0x358   :  { %v8777_v55 = vpop.xlane.xlu1 %2903  ;;  %v3821_v52 = vmul.f32 0.6931472, %v5852_v60  ;;  %3641 = vadd.xlane.f32.xlu0 %v3640_v44 }
 0x359   :  { %4117 = vst.msk [vmem:[%s9044_s4 + $0x268] sm:$0xff] %vm4039_vm3, %v3991_v32  ;;  %5861 = vpow2.f32 %v3279_v2  ;;  %v3035_v51 = vsub.f32 %v8398_v35, %v8777_v55  ;;  %v9254_v2 = vld [vmem:[#allocation28_spill] sm:$0xff] }
 0x35a   :  { %v3992_v9 = vadd.f32 %v3821_v52, %v9252_v59 }
 0x35b   :  { %v5854_v29 = vpop.eup %5853  ;;  %v3281_v13 = vmul.f32 1.442695, %v3035_v51  ;;  %v8787_v56 = vpop.xlane.xlu0 %2906 }
 0x35c   :  { %v5856_v0 = vpop.eup %5855  ;;  %v3643_v4 = vsel %vm2538_vm2, %v5854_v29, 0.0  ;;  %4118 = vst.msk [vmem:[%s9044_s4 + $0x270] sm:$0xff] %vm4039_vm3, %v3992_v9  ;;  %v3036_v35 = vsub.f32 %v8410_v57, %v8787_v56 }
 0x35d   :  { %v3823_v31 = vmul.f32 0.6931472, %v5856_v0  ;;  %5863 = vpow2.f32 %v3281_v13  ;;  %3644 = vadd.xlane.f32.xlu1 %v3643_v4 }
 0x35e   :  { %v5858_v63 = vpop.eup %5857  ;;  %v3283_v48 = vmul.f32 1.442695, %v3036_v35 }
 0x35f   :  { %v3993_v20 = vadd.f32 %v3823_v31, %v9253_v50  ;;  %v5860_v6 = vpop.eup %5859  ;;  %v8797_v11 = vpop.xlane.xlu1 %2909  ;;  %v3646_v19 = vsel %vm2538_vm2, %v5858_v63, 0.0 }
 0x360   :  { %v3825_v46 = vmul.f32 0.6931472, %v5860_v6  ;;  %5865 = vpow2.f32 %v3283_v48  ;;  %v3037_v57 = vsub.f32 %v8426_v61, %v8797_v11  ;;  %3647 = vadd.xlane.f32.xlu0 %v3646_v19 }
 0x361   :  { %4119 = vst.msk [vmem:[%s9044_s4 + $0x278] sm:$0xff] %vm4039_vm3, %v3993_v20 }
 0x362   :  { %v3994_v60 = vadd.f32 %v3825_v46, %v9254_v2  ;;  %v3285_v44 = vmul.f32 1.442695, %v3037_v57  ;;  %v8807_v51 = vpop.xlane.xlu0 %2912 }
 0x363   :  { %v5862_v32 = vpop.eup %5861  ;;  %v3537_v52 = vpop.xlane.xlu1 %3536  ;;  %v3038_v59 = vsub.f32 %v8440_v24, %v8807_v51 }
 0x364   :  { %v3649_v29 = vsel %vm2538_vm2, %v5862_v32, 0.0  ;;  %4120 = vst.msk [vmem:[%s9044_s4 + $0x280] sm:$0xff] %vm4039_vm3, %v3994_v60  ;;  %5867 = vpow2.f32 %v3285_v44  ;;  %v9255_v32 = vld [vmem:[#allocation40_spill] sm:$0xff] }
 0x365   :  { %3650 = vadd.xlane.f32.xlu1 %v3649_v29  ;;  %5869 = vlog2.f32 %v3537_v52  ;;  %v3287_v9 = vmul.f32 1.442695, %v3038_v59 }
 0x366   :  { %v3534_v0 = vpop.xlane.xlu0 %3533 }
 0x367   :  { %v5864_v61 = vpop.eup %5863  ;;  %v3543_v13 = vpop.xlane.xlu1 %3542  ;;  %5871 = vpow2.f32 %v3287_v9 }
 0x368   :  { %v3652_v4 = vsel %vm2538_vm2, %v5864_v61, 0.0  ;;  %5873 = vlog2.f32 %v3543_v13 }
 0x369   :  { %3653 = vadd.xlane.f32.xlu0 %v3652_v4  ;;  %5875 = vlog2.f32 %v3534_v0  ;;  %v9256_v4 = vld [vmem:[#allocation39_spill] sm:$0xff] }
 0x36a   :  { %v5866_v31 = vpop.eup %5865  ;;  %v3540_v63 = vpop.xlane.xlu0 %3539 }
 0x36b   :  { %v3549_v35 = vpop.xlane.xlu1 %3548  ;;  %v3655_v50 = vsel %vm2538_vm2, %v5866_v31, 0.0 }
 0x36c   :  { %5877 = vlog2.f32 %v3549_v35  ;;  %3656 = vadd.xlane.f32.xlu1 %v3655_v50 }
 0x36d   :  { %5879 = vlog2.f32 %v3540_v63 }
 0x36e   :  { %v5868_v24 = vpop.eup %5867  ;;  %v3546_v48 = vpop.xlane.xlu0 %3545 }
 0x36f   :  { %v5870_v20 = vpop.eup %5869  ;;  %v3658_v6 = vsel %vm2538_vm2, %v5868_v24, 0.0  ;;  %5881 = vlog2.f32 %v3546_v48  ;;  %v9257_v48 = vld [vmem:[#allocation31_spill] sm:$0xff] }
 0x370   :  { %v3829_v19 = vmul.f32 0.6931472, %v5870_v20  ;;  %3659 = vadd.xlane.f32.xlu0 %v3658_v6 }
 0x371   :  { %v5872_v57 = vpop.eup %5871 }
 0x372   :  { %v3555_v46 = vpop.xlane.xlu1 %3554  ;;  %v3996_v2 = vadd.f32 %v3829_v19, %v9255_v32  ;;  %v5874_v60 = vpop.eup %5873  ;;  %v3661_v52 = vsel %vm2538_vm2, %v5872_v57, 0.0 }
 0x373   :  { %5883 = vlog2.f32 %v3555_v46  ;;  %v3552_v44 = vpop.xlane.xlu0 %3551  ;;  %v5876_v29 = vpop.eup %5875  ;;  %v3833_v59 = vmul.f32 0.6931472, %v5874_v60  ;;  %3662 = vadd.xlane.f32.xlu1 %v3661_v52 }
 0x374   :  { %4122 = vst.msk [vmem:[%s9044_s4 + $0x290] sm:$0xff] %vm4039_vm3, %v3996_v2  ;;  %5885 = vlog2.f32 %v3552_v44  ;;  %v3827_v61 = vmul.f32 0.6931472, %v5876_v29 }
 0x375   :  { %v3998_v13 = vadd.f32 %v3833_v59, %v8383_v25 }
 0x376   :  { %v5878_v9 = vpop.eup %5877  ;;  %v3995_v31 = vadd.f32 %v3827_v61, %v9256_v4 }
 0x377   :  { %v5880_v0 = vpop.eup %5879  ;;  %v3837_v35 = vmul.f32 0.6931472, %v5878_v9  ;;  %v3558_v63 = vpop.xlane.xlu0 %3557  ;;  %4124 = vst.msk [vmem:[%s9044_s4 + $0x2a0] sm:$0xff] %vm4039_vm3, %v3998_v13 }
 0x378   :  { %v3831_v50 = vmul.f32 0.6931472, %v5880_v0  ;;  %5887 = vlog2.f32 %v3558_v63  ;;  %4121 = vst.msk [vmem:[%s9044_s4 + $0x288] sm:$0xff] %vm4039_vm3, %v3995_v31 }
 0x379   :  { %v4000_v24 = vadd.f32 %v3837_v35, %v8412_v22  ;;  %v5882_v20 = vpop.eup %5881 }
 0x37a   :  { %v3561_v25 = vpop.xlane.xlu1 %3560  ;;  %v3997_v6 = vadd.f32 %v3831_v50, %v9257_v48  ;;  %v3835_v19 = vmul.f32 0.6931472, %v5882_v20 }
 0x37b   :  { %5889 = vlog2.f32 %v3561_v25  ;;  %4126 = vst.msk [vmem:[%s9044_s4 + $0x2b0] sm:$0xff] %vm4039_vm3, %v4000_v24 }
 0x37c   :  { %4123 = vst.msk [vmem:[%s9044_s4 + $0x298] sm:$0xff] %vm4039_vm3, %v3997_v6  ;;  %v3999_v57 = vadd.f32 %v3835_v19, %v8400_v33 }
 0x37d   :  { %v5884_v46 = vpop.eup %5883  ;;  %v3564_v32 = vpop.xlane.xlu0 %3563 }
 0x37e   :  { %v3841_v22 = vmul.f32 0.6931472, %v5884_v46  ;;  %v5886_v2 = vpop.eup %5885  ;;  %5891 = vlog2.f32 %v3564_v32  ;;  %4125 = vst.msk [vmem:[%s9044_s4 + $0x2a8] sm:$0xff] %vm4039_vm3, %v3999_v57 }
 0x37f   :  { %v3839_v44 = vmul.f32 0.6931472, %v5886_v2 }
 0x380   :  { %v4002_v60 = vadd.f32 %v3841_v22, %v8442_v12 }
 0x381   :  { %v4001_v52 = vadd.f32 %v3839_v44, %v8428_v21 }
 0x382   :  { %4128 = vst.msk [vmem:[%s9044_s4 + $0x2c0] sm:$0xff] %vm4039_vm3, %v4002_v60  ;;  %v3567_v33 = vpop.xlane.xlu1 %3566  ;;  %v5888_v29 = vpop.eup %5887 }
 0x383   :  { %5893 = vlog2.f32 %v3567_v33  ;;  %4127 = vst.msk [vmem:[%s9044_s4 + $0x2b8] sm:$0xff] %vm4039_vm3, %v4001_v52  ;;  %v3843_v59 = vmul.f32 0.6931472, %v5888_v29 }
 0x385   :  { %v5890_v61 = vpop.eup %5889  ;;  %v4003_v12 = vadd.f32 %v3843_v59, %v8454_v47  ;;  %v3570_v13 = vpop.xlane.xlu0 %3569 }
 0x386   :  { %v3845_v9 = vmul.f32 0.6931472, %v5890_v61  ;;  %5895 = vlog2.f32 %v3570_v13 }
 0x387   :  { %4129 = vst.msk [vmem:[%s9044_s4 + $0x2c8] sm:$0xff] %vm4039_vm3, %v4003_v12 }
 0x388   :  { %v4004_v21 = vadd.f32 %v3845_v9, %v8465_v17  ;;  %v5892_v0 = vpop.eup %5891 }
 0x389   :  { %v3847_v4 = vmul.f32 0.6931472, %v5892_v0 }
 0x38a   :  { %4130 = vst.msk [vmem:[%s9044_s4 + $0x2d0] sm:$0xff] %vm4039_vm3, %v4004_v21  ;;  %v3573_v31 = vpop.xlane.xlu1 %3572 }
 0x38b   :  { %5897 = vlog2.f32 %v3573_v31  ;;  %v4005_v47 = vadd.f32 %v3847_v4, %v8476_v15 }
 0x38d   :  { %v5894_v35 = vpop.eup %5893  ;;  %4131 = vst.msk [vmem:[%s9044_s4 + $0x2d8] sm:$0xff] %vm4039_vm3, %v4005_v47  ;;  %v3576_v50 = vpop.xlane.xlu0 %3575 }
 0x38e   :  { %v3849_v63 = vmul.f32 0.6931472, %v5894_v35  ;;  %5899 = vlog2.f32 %v3576_v50 }
 0x390   :  { %v4006_v17 = vadd.f32 %v3849_v63, %v8486_v54  ;;  %v5896_v24 = vpop.eup %5895 }
 0x391   :  { %v3851_v25 = vmul.f32 0.6931472, %v5896_v24 }
 0x392   :  { %4132 = vst.msk [vmem:[%s9044_s4 + $0x2e0] sm:$0xff] %vm4039_vm3, %v4006_v17  ;;  %v3579_v20 = vpop.xlane.xlu1 %3578 }
 0x393   :  { %5901 = vlog2.f32 %v3579_v20  ;;  %v4007_v15 = vadd.f32 %v3851_v25, %v8497_v36 }
 0x395   :  { %v5898_v48 = vpop.eup %5897  ;;  %4133 = vst.msk [vmem:[%s9044_s4 + $0x2e8] sm:$0xff] %vm4039_vm3, %v4007_v15  ;;  %v3582_v19 = vpop.xlane.xlu0 %3581 }
 0x396   :  { %v3853_v6 = vmul.f32 0.6931472, %v5898_v48  ;;  %5903 = vlog2.f32 %v3582_v19 }
 0x398   :  { %v4008_v54 = vadd.f32 %v3853_v6, %v8507_v16  ;;  %v5900_v46 = vpop.eup %5899 }
 0x399   :  { %v3855_v57 = vmul.f32 0.6931472, %v5900_v46 }
 0x39a   :  { %4134 = vst.msk [vmem:[%s9044_s4 + $0x2f0] sm:$0xff] %vm4039_vm3, %v4008_v54  ;;  %v3585_v22 = vpop.xlane.xlu1 %3584 }
 0x39b   :  { %5905 = vlog2.f32 %v3585_v22  ;;  %v4009_v36 = vadd.f32 %v3855_v57, %v8517_v43 }
 0x39d   :  { %v5902_v32 = vpop.eup %5901  ;;  %4135 = vst.msk [vmem:[%s9044_s4 + $0x2f8] sm:$0xff] %vm4039_vm3, %v4009_v36  ;;  %v3588_v60 = vpop.xlane.xlu0 %3587 }
 0x39e   :  { %v3857_v2 = vmul.f32 0.6931472, %v5902_v32  ;;  %5907 = vlog2.f32 %v3588_v60 }
 0x3a0   :  { %v4010_v16 = vadd.f32 %v3857_v2, %v8527_v23  ;;  %v5904_v44 = vpop.eup %5903 }
 0x3a1   :  { %v3859_v52 = vmul.f32 0.6931472, %v5904_v44 }
 0x3a2   :  { %4136 = vst.msk [vmem:[%s9044_s4 + $0x300] sm:$0xff] %vm4039_vm3, %v4010_v16  ;;  %v3591_v33 = vpop.xlane.xlu1 %3590 }
 0x3a3   :  { %5909 = vlog2.f32 %v3591_v33  ;;  %v4011_v43 = vadd.f32 %v3859_v52, %v8537_v5 }
 0x3a5   :  { %v5906_v29 = vpop.eup %5905  ;;  %4137 = vst.msk [vmem:[%s9044_s4 + $0x308] sm:$0xff] %vm4039_vm3, %v4011_v43  ;;  %v3594_v61 = vpop.xlane.xlu0 %3593 }
 0x3a6   :  { %v3861_v59 = vmul.f32 0.6931472, %v5906_v29  ;;  %5911 = vlog2.f32 %v3594_v61 }
 0x3a8   :  { %v4012_v23 = vadd.f32 %v3861_v59, %v8547_v7  ;;  %v5908_v12 = vpop.eup %5907 }
 0x3a9   :  { %v3863_v9 = vmul.f32 0.6931472, %v5908_v12 }
 0x3aa   :  { %4138 = vst.msk [vmem:[%s9044_s4 + $0x310] sm:$0xff] %vm4039_vm3, %v4012_v23  ;;  %v3597_v13 = vpop.xlane.xlu1 %3596 }
 0x3ab   :  { %5913 = vlog2.f32 %v3597_v13  ;;  %v4013_v5 = vadd.f32 %v3863_v9, %v8557_v18 }
 0x3ad   :  { %v5910_v21 = vpop.eup %5909  ;;  %4139 = vst.msk [vmem:[%s9044_s4 + $0x318] sm:$0xff] %vm4039_vm3, %v4013_v5  ;;  %v3600_v4 = vpop.xlane.xlu0 %3599 }
 0x3ae   :  { %v3865_v0 = vmul.f32 0.6931472, %v5910_v21  ;;  %5915 = vlog2.f32 %v3600_v4 }
 0x3b0   :  { %v4014_v7 = vadd.f32 %v3865_v0, %v8567_v28  ;;  %v5912_v31 = vpop.eup %5911 }
 0x3b1   :  { %v3867_v47 = vmul.f32 0.6931472, %v5912_v31 }
 0x3b2   :  { %4140 = vst.msk [vmem:[%s9044_s4 + $0x320] sm:$0xff] %vm4039_vm3, %v4014_v7  ;;  %v3603_v35 = vpop.xlane.xlu1 %3602 }
 0x3b3   :  { %5917 = vlog2.f32 %v3603_v35  ;;  %v4015_v18 = vadd.f32 %v3867_v47, %v8577_v38 }
 0x3b5   :  { %v5914_v63 = vpop.eup %5913  ;;  %4141 = vst.msk [vmem:[%s9044_s4 + $0x328] sm:$0xff] %vm4039_vm3, %v4015_v18  ;;  %v3606_v17 = vpop.xlane.xlu0 %3605 }
 0x3b6   :  { %v3869_v50 = vmul.f32 0.6931472, %v5914_v63  ;;  %5919 = vlog2.f32 %v3606_v17 }
 0x3b8   :  { %v4016_v28 = vadd.f32 %v3869_v50, %v8587_v53  ;;  %v5916_v24 = vpop.eup %5915 }
 0x3b9   :  { %v3871_v25 = vmul.f32 0.6931472, %v5916_v24 }
 0x3ba   :  { %4142 = vst.msk [vmem:[%s9044_s4 + $0x330] sm:$0xff] %vm4039_vm3, %v4016_v28  ;;  %v3609_v20 = vpop.xlane.xlu1 %3608 }
 0x3bb   :  { %5921 = vlog2.f32 %v3609_v20  ;;  %v4017_v38 = vadd.f32 %v3871_v25, %v8597_v14 }
 0x3bd   :  { %v5918_v15 = vpop.eup %5917  ;;  %4143 = vst.msk [vmem:[%s9044_s4 + $0x338] sm:$0xff] %vm4039_vm3, %v4017_v38  ;;  %v3612_v6 = vpop.xlane.xlu0 %3611 }
 0x3be   :  { %v3873_v48 = vmul.f32 0.6931472, %v5918_v15  ;;  %5923 = vlog2.f32 %v3612_v6 }
 0x3c0   :  { %v4018_v53 = vadd.f32 %v3873_v48, %v8607_v58  ;;  %v5920_v19 = vpop.eup %5919 }
 0x3c1   :  { %v3875_v54 = vmul.f32 0.6931472, %v5920_v19 }
 0x3c2   :  { %4144 = vst.msk [vmem:[%s9044_s4 + $0x340] sm:$0xff] %vm4039_vm3, %v4018_v53  ;;  %v3615_v46 = vpop.xlane.xlu1 %3614 }
 0x3c3   :  { %5925 = vlog2.f32 %v3615_v46  ;;  %v4019_v14 = vadd.f32 %v3875_v54, %v8617_v26 }
 0x3c5   :  { %v5922_v57 = vpop.eup %5921  ;;  %4145 = vst.msk [vmem:[%s9044_s4 + $0x348] sm:$0xff] %vm4039_vm3, %v4019_v14  ;;  %v3618_v36 = vpop.xlane.xlu0 %3617 }
 0x3c6   :  { %v3877_v22 = vmul.f32 0.6931472, %v5922_v57  ;;  %5927 = vlog2.f32 %v3618_v36 }
 0x3c8   :  { %v4020_v58 = vadd.f32 %v3877_v22, %v8627_v8  ;;  %v5924_v32 = vpop.eup %5923 }
 0x3c9   :  { %v3879_v2 = vmul.f32 0.6931472, %v5924_v32 }
 0x3ca   :  { %4146 = vst.msk [vmem:[%s9044_s4 + $0x350] sm:$0xff] %vm4039_vm3, %v4020_v58  ;;  %v3621_v60 = vpop.xlane.xlu1 %3620 }
 0x3cb   :  { %5929 = vlog2.f32 %v3621_v60  ;;  %v4021_v26 = vadd.f32 %v3879_v2, %v8637_v30 }
 0x3cd   :  { %v5926_v16 = vpop.eup %5925  ;;  %4147 = vst.msk [vmem:[%s9044_s4 + $0x358] sm:$0xff] %vm4039_vm3, %v4021_v26  ;;  %v3624_v52 = vpop.xlane.xlu0 %3623 }
 0x3ce   :  { %v3881_v44 = vmul.f32 0.6931472, %v5926_v16  ;;  %5931 = vlog2.f32 %v3624_v52 }
 0x3d0   :  { %v4022_v8 = vadd.f32 %v3881_v44, %v8647_v41  ;;  %v5928_v33 = vpop.eup %5927 }
 0x3d1   :  { %v3883_v43 = vmul.f32 0.6931472, %v5928_v33 }
 0x3d2   :  { %4148 = vst.msk [vmem:[%s9044_s4 + $0x360] sm:$0xff] %vm4039_vm3, %v4022_v8  ;;  %v3627_v29 = vpop.xlane.xlu1 %3626 }
 0x3d3   :  { %5933 = vlog2.f32 %v3627_v29  ;;  %v4023_v30 = vadd.f32 %v3883_v43, %v8657_v1 }
 0x3d5   :  { %v5930_v59 = vpop.eup %5929  ;;  %4149 = vst.msk [vmem:[%s9044_s4 + $0x368] sm:$0xff] %vm4039_vm3, %v4023_v30  ;;  %v3630_v23 = vpop.xlane.xlu0 %3629 }
 0x3d6   :  { %v3885_v61 = vmul.f32 0.6931472, %v5930_v59  ;;  %5935 = vlog2.f32 %v3630_v23 }
 0x3d8   :  { %v4024_v41 = vadd.f32 %v3885_v61, %v8667_v49  ;;  %v5932_v12 = vpop.eup %5931 }
 0x3d9   :  { %v3887_v9 = vmul.f32 0.6931472, %v5932_v12 }
 0x3da   :  { %4150 = vst.msk [vmem:[%s9044_s4 + $0x370] sm:$0xff] %vm4039_vm3, %v4024_v41  ;;  %v3633_v13 = vpop.xlane.xlu1 %3632 }
 0x3db   :  { %5937 = vlog2.f32 %v3633_v13  ;;  %v4025_v1 = vadd.f32 %v3887_v9, %v8677_v39 }
 0x3dd   :  { %v5934_v5 = vpop.eup %5933  ;;  %4151 = vst.msk [vmem:[%s9044_s4 + $0x378] sm:$0xff] %vm4039_vm3, %v4025_v1  ;;  %v3636_v0 = vpop.xlane.xlu0 %3635 }
 0x3de   :  { %v3889_v21 = vmul.f32 0.6931472, %v5934_v5  ;;  %5939 = vlog2.f32 %v3636_v0 }
 0x3e0   :  { %v4026_v49 = vadd.f32 %v3889_v21, %v8687_v40  ;;  %v5936_v4 = vpop.eup %5935 }
 0x3e1   :  { %v3891_v7 = vmul.f32 0.6931472, %v5936_v4 }
 0x3e2   :  { %4152 = vst.msk [vmem:[%s9044_s4 + $0x380] sm:$0xff] %vm4039_vm3, %v4026_v49  ;;  %v3639_v31 = vpop.xlane.xlu1 %3638 }
 0x3e3   :  { %5941 = vlog2.f32 %v3639_v31  ;;  %v4027_v39 = vadd.f32 %v3891_v7, %v8697_v34 }
 0x3e5   :  { %v5938_v47 = vpop.eup %5937  ;;  %4153 = vst.msk [vmem:[%s9044_s4 + $0x388] sm:$0xff] %vm4039_vm3, %v4027_v39  ;;  %v3642_v18 = vpop.xlane.xlu0 %3641 }
 0x3e6   :  { %v3893_v35 = vmul.f32 0.6931472, %v5938_v47  ;;  %5943 = vlog2.f32 %v3642_v18 }
 0x3e8   :  { %v4028_v40 = vadd.f32 %v3893_v35, %v8707_v45  ;;  %v5940_v63 = vpop.eup %5939 }
 0x3e9   :  { %v3895_v50 = vmul.f32 0.6931472, %v5940_v63 }
 0x3ea   :  { %4154 = vst.msk [vmem:[%s9044_s4 + $0x390] sm:$0xff] %vm4039_vm3, %v4028_v40  ;;  %v3645_v17 = vpop.xlane.xlu1 %3644 }
 0x3eb   :  { %5945 = vlog2.f32 %v3645_v17  ;;  %v4029_v34 = vadd.f32 %v3895_v50, %v8717_v27 }
 0x3ed   :  { %v5942_v28 = vpop.eup %5941  ;;  %4155 = vst.msk [vmem:[%s9044_s4 + $0x398] sm:$0xff] %vm4039_vm3, %v4029_v34  ;;  %v3648_v25 = vpop.xlane.xlu0 %3647 }
 0x3ee   :  { %v3897_v24 = vmul.f32 0.6931472, %v5942_v28  ;;  %5947 = vlog2.f32 %v3648_v25 }
 0x3f0   :  { %v4030_v45 = vadd.f32 %v3897_v24, %v8727_v3  ;;  %v5944_v20 = vpop.eup %5943 }
 0x3f1   :  { %v3899_v38 = vmul.f32 0.6931472, %v5944_v20 }
 0x3f2   :  { %4156 = vst.msk [vmem:[%s9044_s4 + $0x3a0] sm:$0xff] %vm4039_vm3, %v4030_v45  ;;  %v3651_v15 = vpop.xlane.xlu1 %3650 }
 0x3f3   :  { %5949 = vlog2.f32 %v3651_v15  ;;  %v4031_v27 = vadd.f32 %v3899_v38, %v8737_v42 }
 0x3f5   :  { %v5946_v48 = vpop.eup %5945  ;;  %4157 = vst.msk [vmem:[%s9044_s4 + $0x3a8] sm:$0xff] %vm4039_vm3, %v4031_v27 }
 0x3f6   :  { %v3901_v6 = vmul.f32 0.6931472, %v5946_v48  ;;  %v3654_v53 = vpop.xlane.xlu0 %3653 }
 0x3f7   :  { %5951 = vlog2.f32 %v3654_v53 }
 0x3f8   :  { %v4032_v3 = vadd.f32 %v3901_v6, %v8747_v10  ;;  %v5948_v19 = vpop.eup %5947 }
 0x3f9   :  { %v3903_v54 = vmul.f32 0.6931472, %v5948_v19  ;;  %v3657_v46 = vpop.xlane.xlu1 %3656 }
 0x3fa   :  { %4158 = vst.msk [vmem:[%s9044_s4 + $0x3b0] sm:$0xff] %vm4039_vm3, %v4032_v3  ;;  %5953 = vlog2.f32 %v3657_v46 }
 0x3fb   :  { %v4033_v42 = vadd.f32 %v3903_v54, %v8757_v62 }
 0x3fd   :  { %v5950_v14 = vpop.eup %5949  ;;  %4159 = vst.msk [vmem:[%s9044_s4 + $0x3b8] sm:$0xff] %vm4039_vm3, %v4033_v42  ;;  %v3660_v22 = vpop.xlane.xlu0 %3659 }
 0x3fe   :  { %v3905_v57 = vmul.f32 0.6931472, %v5950_v14  ;;  %5955 = vlog2.f32 %v3660_v22 }
 0x400   :  { %v4034_v10 = vadd.f32 %v3905_v57, %v8767_v37  ;;  %v3663_v32 = vpop.xlane.xlu1 %3662 }
 0x401   :  { %v5952_v36 = vpop.eup %5951  ;;  %5957 = vlog2.f32 %v3663_v32 }
 0x402   :  { %4160 = vst.msk [vmem:[%s9044_s4 + $0x3c0] sm:$0xff] %vm4039_vm3, %v4034_v10  ;;  %v3907_v58 = vmul.f32 0.6931472, %v5952_v36 }
 0x404   :  { %v4035_v62 = vadd.f32 %v3907_v58, %v8777_v55  ;;  %v5954_v2 = vpop.eup %5953 }
 0x405   :  { %v3909_v60 = vmul.f32 0.6931472, %v5954_v2 }
 0x406   :  { %4161 = vst.msk [vmem:[%s9044_s4 + $0x3c8] sm:$0xff] %vm4039_vm3, %v4035_v62 }
 0x407   :  { %v4036_v37 = vadd.f32 %v3909_v60, %v8787_v56 }
 0x408   :  { %v5956_v26 = vpop.eup %5955 }
 0x409   :  { %4162 = vst.msk [vmem:[%s9044_s4 + $0x3d0] sm:$0xff] %vm4039_vm3, %v4036_v37  ;;  %v3911_v16 = vmul.f32 0.6931472, %v5956_v26 }
 0x40b   :  { %v4037_v44 = vadd.f32 %v3911_v16, %v8797_v11  ;;  %v5958_v52 = vpop.eup %5957 }
 0x40c   :  { %v3913_v55 = vmul.f32 0.6931472, %v5958_v52 }
 0x40d   :  { %4163 = vst.msk [vmem:[%s9044_s4 + $0x3d8] sm:$0xff] %vm4039_vm3, %v4037_v44 }
 0x40e   :  { %v4038_v8 = vadd.f32 %v3913_v55, %v8807_v51 }
 0x410   :  { %4164 = vst.msk [vmem:[%s9044_s4 + $0x3e0] sm:$0xff] %vm4039_vm3, %v4038_v8 }

</bundles_post_ra>
